<compile_context>
chip_gen: v6e
topology: v6e:2x2x1
jax: 0.10.0
libtpu: 0.0.40
codegen_flags: <defaults>
</compile_context>

<pallas_src>
import functools

import jax
import jax.numpy as jnp
from jax import lax
from jax.experimental import pallas as pl
from jax.experimental.pallas import tpu as pltpu


# ----------------------------------------------------------------------------
# Helpers
# ----------------------------------------------------------------------------
def _round_up(x, m):
    return ((x + m - 1) // m) * m


def _pick_block(dim, target, align):
    """Largest divisor of `dim` <= target that is a multiple of `align`
    (falls back to the full dim, which is always a legal block)."""
    for cand in range(min(dim, target), 0, -1):
        if dim % cand == 0 and cand % align == 0:
            return cand
    return dim


def _vmem_budget():
    """Generation-aware VMEM budgeting: derive tile sizes from the real per-core
    capacity (64 MiB/TC on v7x, 128 MiB on v5e/v6e) instead of a fixed clamp."""
    cap = 64 << 20                        # conservative fallback (= v7x per-TC VMEM)
    try:
        cap = int(pltpu.get_tpu_info().vmem_capacity_bytes)
    except Exception:
        pass
    tile_budget = int(cap * 0.75)         # ~48 MiB on v7x, ~96 MiB on v5e/v6e
    vmem_limit = int(cap * 0.90)
    return tile_budget, vmem_limit


def _fast_sigmoid(x):
    # sigmoid(x) == 0.5 * tanh(0.5 * x) + 0.5 : one EUP op instead of exp + divide.
    return 0.5 * jnp.tanh(0.5 * x) + 0.5


# ----------------------------------------------------------------------------
# Kernel 1: fused input projection  out = sum_i inputs[i] @ weights[i] + bias
# ----------------------------------------------------------------------------
def _make_proj_kernel(n_in):
    def kernel(*refs):
        in_refs = refs[:n_in]
        w_refs = refs[n_in:2 * n_in]
        b_ref = refs[2 * n_in]
        o_ref = refs[2 * n_in + 1]
        acc = jnp.dot(in_refs[0][...], w_refs[0][...],
                      preferred_element_type=jnp.float32)
        for a_ref, w_ref in zip(in_refs[1:], w_refs[1:]):
            acc = acc + jnp.dot(a_ref[...], w_ref[...],
                                preferred_element_type=jnp.float32)
        o_ref[...] = (acc + b_ref[...].astype(jnp.float32)).astype(o_ref.dtype)
    return kernel


def fused_projection(inputs, weights, bias, *, out_dtype, tile_budget, vmem_limit):
    """inputs: list of (M, K_i); weights: list of (K_i, N) pre-transposed; bias (1, N).

    Mode A (preferred): all weights fully resident in VMEM (fetched from HBM exactly
      once, single-buffered), 1-D grid over row tiles -> zero redundant weight traffic.
    Mode B (fallback): 2-D grid ordered (column tiles OUTER, row tiles INNER); the
      weight/bias block index is constant along the inner axis so each weight tile is
      DMA'd exactly once and stays resident across the whole row sweep.
    """
    n_in = len(inputs)
    M = inputs[0].shape[0]
    N = weights[0].shape[1]
    in_size = jnp.dtype(inputs[0].dtype).itemsize
    w_size = jnp.dtype(weights[0].dtype).itemsize
    out_size = jnp.dtype(out_dtype).itemsize
    row_align = 16 if in_size < 4 else 8          # bf16 packs two rows per sublane
    k_sum = sum(a.shape[1] for a in inputs)
    margin = 2 << 20

    weight_bytes = sum(w.shape[0] * w.shape[1] for w in weights) * w_size + N * 4
    per_row_a = k_sum * in_size + N * out_size    # streamed bytes per output row (mode A)
    mode_a = weight_bytes + 2 * row_align * per_row_a + margin <= tile_budget

    kernel = _make_proj_kernel(n_in)

    if mode_a:
        bm = (tile_budget - weight_bytes - margin) // (2 * per_row_a)
        bm = max(row_align, min((bm // row_align) * row_align, 2048,
                                _round_up(M, row_align)))
        m_pad = _round_up(M, bm)
        ins = [jnp.pad(a, ((0, m_pad - M), (0, 0))) if m_pad != M else a
               for a in inputs]
        in_specs = ([pl.BlockSpec((bm, a.shape[1]), lambda i: (i, 0)) for a in ins]
                    # weights + bias fully resident in VMEM, single-buffered:
                    + [pl.BlockSpec(memory_space=pltpu.MemorySpace.VMEM)] * n_in
                    + [pl.BlockSpec(memory_space=pltpu.MemorySpace.VMEM)])
        out = pl.pallas_call(
            kernel,
            out_shape=jax.ShapeDtypeStruct((m_pad, N), out_dtype),
            grid=(m_pad // bm,),
            in_specs=in_specs,
            out_specs=pl.BlockSpec((bm, N), lambda i: (i, 0)),
            compiler_params=pltpu.CompilerParams(
                dimension_semantics=("parallel",),
                vmem_limit_bytes=vmem_limit),
        )(*ins, *weights, bias)
    else:
        bn = _pick_block(N, 512, 128)
        col_bytes = k_sum * bn * w_size + bn * 4
        per_row_b = k_sum * in_size + bn * out_size
        bm = (tile_budget - 2 * col_bytes - margin) // (2 * per_row_b)
        bm = max(row_align, min((bm // row_align) * row_align, 1024,
                                _round_up(M, row_align)))
        m_pad = _round_up(M, bm)
        ins = [jnp.pad(a, ((0, m_pad - M), (0, 0))) if m_pad != M else a
               for a in inputs]
        # grid = (column tiles [outer], row tiles [inner]): weight/bias index is
        # constant along the inner axis -> fetched from HBM once per column tile.
        in_specs = ([pl.BlockSpec((bm, a.shape[1]), lambda j, i: (i, 0)) for a in ins]
                    + [pl.BlockSpec((w.shape[0], bn), lambda j, i: (0, j))
                       for w in weights]
                    + [pl.BlockSpec((1, bn), lambda j, i: (0, j))])
        out = pl.pallas_call(
            kernel,
            out_shape=jax.ShapeDtypeStruct((m_pad, N), out_dtype),
            grid=(N // bn, m_pad // bm),
            in_specs=in_specs,
            out_specs=pl.BlockSpec((bm, bn), lambda j, i: (i, j)),
            compiler_params=pltpu.CompilerParams(
                dimension_semantics=("parallel", "parallel"),
                vmem_limit_bytes=vmem_limit),
        )(*ins, *weights, bias)

    return out if m_pad == M else out[:M]


# ----------------------------------------------------------------------------
# Kernel 2: bidirectional recurrent sweep over pre-computed gates
#   grid = (direction=2 ["parallel"], time-chunks ["arbitrary"])
# ----------------------------------------------------------------------------
def _lstm_rec_kernel(*refs, tc, hd, t_real, n_chunks, unroll, fused_fc):
    """pg_ref  : (tc, B, 4H) pre-gates (x@Wih + b_ih + b_hh) for this direction/chunk
       whh_ref : (2, H, 4H)  pre-transposed recurrent weights, whole-array VMEM resident
       fcw_ref : (2, H, Nfc) optional fused-FC weights (last layer), VMEM resident
       out_ref : (tc, B, H)  hidden states   OR (tc, B, Nfc) per-direction FC partials
       h_sc/c_sc: (B, H) f32 recurrent state carried across time chunks."""
    if fused_fc:
        pg_ref, whh_ref, fcw_ref, out_ref, h_sc, c_sc = refs
    else:
        pg_ref, whh_ref, out_ref, h_sc, c_sc = refs
        fcw_ref = None

    d = pl.program_id(0)                      # 0 = forward, 1 = backward
    c = pl.program_id(1)                      # time-chunk counter for this direction

    # NOTE: the h/c VMEM scratch carried across the inner "arbitrary" time-chunk axis
    # relies on that axis executing in order for a fixed value of the outer "parallel"
    # direction axis (true on current Mosaic); the c==0 reset makes each direction
    # self-contained even when the two directions are sharded across TensorCores.
    @pl.when(c == 0)
    def _():
        h_sc[...] = jnp.zeros_like(h_sc)
        c_sc[...] = jnp.zeros_like(c_sc)

    tb = c + d * (n_chunks - 1 - 2 * c)       # absolute time-chunk (bwd walks in reverse)
    padded = (t_real != tc * n_chunks)        # static: was the time axis zero-padded?

    def step(t, carry):
        row = t + d * (tc - 1 - 2 * t)        # fwd: t, bwd: tc-1-t
        h_prev = h_sc[...]
        c_prev = c_sc[...]
        # Whh slice is read straight from the resident VMEM copy (no hoisted value).
        gates = (pg_ref[row].astype(jnp.float32)
                 + jnp.dot(h_prev.astype(whh_ref.dtype), whh_ref[d],
                           preferred_element_type=jnp.float32))        # (B, 4H)
        i_g = _fast_sigmoid(gates[:, 0 * hd:1 * hd])
        f_g = _fast_sigmoid(gates[:, 1 * hd:2 * hd])
        g_g = jnp.tanh(gates[:, 2 * hd:3 * hd])
        o_g = _fast_sigmoid(gates[:, 3 * hd:4 * hd])
        c_new = f_g * c_prev + i_g * g_g
        h_new = o_g * jnp.tanh(c_new)
        if padded:
            # Padded timesteps must not touch the recurrent state (critical for the
            # backward direction, which hits the padding first).
            valid = (tb * tc + row) < t_real
            c_new = jnp.where(valid, c_new, c_prev)
            h_new = jnp.where(valid, h_new, h_prev)
        h_sc[...] = h_new
        c_sc[...] = c_new
        if fused_fc:
            # Final Linear fused into the epilogue: lane-dense (Nfc = 128-padded) output,
            # avoids writing the last hidden pair to HBM.
            out_ref[row] = jnp.dot(h_new.astype(fcw_ref.dtype), fcw_ref[d],
                                   preferred_element_type=jnp.float32
                                   ).astype(out_ref.dtype)
        else:
            out_ref[row] = h_new.astype(out_ref.dtype)
        return carry

    lax.fori_loop(0, tc, step, 0, unroll=unroll)


def _choose_time_chunk(T, B, H, n_fc, compute_dtype, tile_budget):
    """Pick the time-chunk length from the VMEM budget (multiple of 8, minimal padding)."""
    csize = jnp.dtype(compute_dtype).itemsize
    resident = 2 * H * 4 * H * csize + 2 * H * n_fc * csize      # whh + fused fc weights
    scratch = 2 * B * H * 4                                      # h/c f32 state
    per_step = B * 4 * H * csize + B * max(H * csize, n_fc * 4)  # pre-gate row + out row
    margin = 2 << 20
    avail = tile_budget - resident - scratch - margin
    tc_max = int(avail // (2 * per_step))                        # double-buffered chunks
    tc_max = max(8, min(256, (tc_max // 8) * 8))
    tc_max = max(8, min(tc_max, _round_up(T, 8)))
    best = None
    for tc in range(8, tc_max + 1, 8):
        pad = _round_up(T, tc) - T
        key = (pad, -tc)                                         # least padding, then largest
        if best is None or key < best[0]:
            best = (key, tc)
    return best[1]


def lstm_bidir_recurrent(pre_gates, whh, *, t_real, tc, out_dtype, vmem_limit, fc_w=None):
    """pre_gates: (T_pad, B, 8H)  [cols 0:4H fwd gates | 4H:8H bwd gates]
       whh: (2, H, 4H) pre-transposed, [fwd, bwd]
       fc_w: optional (2, H, Nfc) -> fuse the final Linear into the epilogue
       returns (2, T_pad, B, H) hidden states, or (2, T_pad, B, Nfc) FC partials."""
    T_pad, B, _ = pre_gates.shape
    H = whh.shape[1]
    assert T_pad % tc == 0
    nc = T_pad // tc
    unroll = tc if tc <= 8 else 4
    fused_fc = fc_w is not None
    out_feat = fc_w.shape[-1] if fused_fc else H

    def pg_index(d, c):
        tb = c + d * (nc - 1 - 2 * c)         # bwd direction walks chunks in reverse
        return (tb, 0, d)

    def out_index(d, c):
        tb = c + d * (nc - 1 - 2 * c)
        return (d, tb, 0, 0)

    in_specs = [pl.BlockSpec((tc, B, 4 * H), pg_index),
                # whole Whh resident in VMEM: fetched once, single-buffered (no per-chunk
                # double buffer as on the old blocked spec).
                pl.BlockSpec(memory_space=pltpu.MemorySpace.VMEM)]
    operands = [pre_gates, whh]
    if fused_fc:
        in_specs.append(pl.BlockSpec(memory_space=pltpu.MemorySpace.VMEM))
        operands.append(fc_w)

    kern = functools.partial(_lstm_rec_kernel, tc=tc, hd=H, t_real=t_real,
                             n_chunks=nc, unroll=unroll, fused_fc=fused_fc)

    return pl.pallas_call(
        kern,
        out_shape=jax.ShapeDtypeStruct((2, T_pad, B, out_feat), out_dtype),
        grid=(2, nc),
        in_specs=in_specs,
        out_specs=pl.BlockSpec((None, tc, B, out_feat), out_index),
        scratch_shapes=[pltpu.VMEM((B, H), jnp.float32),
                        pltpu.VMEM((B, H), jnp.float32)],
        compiler_params=pltpu.CompilerParams(
            dimension_semantics=("parallel", "arbitrary"),
            vmem_limit_bytes=vmem_limit),
    )(*operands)


# ----------------------------------------------------------------------------
# Model forward (Pallas)
# ----------------------------------------------------------------------------
def lstm_model_forward(x, params):
    """x: (B, T, input_dim) -> (B, T, output_dim) f32. `params` from pack_params."""
    layers = params["layers"]
    cdt = layers[0]["whh"].dtype
    B, T, Din = x.shape
    H = layers[0]["whh"].shape[1]
    n_fc = params["fc_w"].shape[-1]
    out_dim = params["fc_b"].shape[0]

    tile_budget, vmem_limit = _vmem_budget()
    tc = _choose_time_chunk(T, B, H, n_fc, cdt, tile_budget)
    t_pad = _round_up(T, tc)

    x_tm = jnp.transpose(x, (1, 0, 2)).astype(cdt)            # time-major (T, B, Din)
    if t_pad != T:
        # Zero time-padding is safe: padded steps are masked inside the recurrence.
        x_tm = jnp.pad(x_tm, ((0, t_pad - T), (0, 0), (0, 0)))

    n_layers = len(layers)
    h_pair, fc_partial = None, None
    for li, lp in enumerate(layers):
        if li == 0:
            pre = fused_projection([x_tm.reshape(t_pad * B, Din)], [lp["w_in"]],
                                   lp["b_in"], out_dtype=cdt,
                                   tile_budget=tile_budget, vmem_limit=vmem_limit)
        else:
            pre = fused_projection(
                [h_pair[0].reshape(t_pad * B, H), h_pair[1].reshape(t_pad * B, H)],
                [lp["w_in_f"], lp["w_in_b"]], lp["b_in"], out_dtype=cdt,
                tile_budget=tile_budget, vmem_limit=vmem_limit)
        pre = pre.reshape(t_pad, B, 8 * H)
        if li == n_layers - 1:
            # Final Linear fused into the recurrent epilogue (no HBM round trip of the
            # last hidden pair, no output_dim-wide masked stores).
            fc_partial = lstm_bidir_recurrent(
                pre, lp["whh"], t_real=T, tc=tc, out_dtype=jnp.float32,
                vmem_limit=vmem_limit, fc_w=params["fc_w"])    # (2, t_pad, B, n_fc)
        else:
            h_pair = lstm_bidir_recurrent(
                pre, lp["whh"], t_real=T, tc=tc, out_dtype=cdt,
                vmem_limit=vmem_limit)                          # (2, t_pad, B, H)

    y_tm = (fc_partial[0, :T] + fc_partial[1, :T])[..., :out_dim] + params["fc_b"]
    return jnp.transpose(y_tm, (1, 0, 2)).astype(jnp.float32)   # (B, T, output_dim)


# ----------------------------------------------------------------------------
# Parameter init (PyTorch layout) and packing (pre-transposed / fused, no .T in kernels)
# ----------------------------------------------------------------------------
def init_raw_params(key, input_dim, hidden_dim, num_layers, output_dim):
    bound = 1.0 / (hidden_dim ** 0.5)

    def u(k, shape, b):
        return jax.random.uniform(k, shape, jnp.float32, -b, b)

    layers = []
    for _ in range(num_layers):
        din = input_dim if not layers else 2 * hidden_dim
        lp = {}
        for tag in ("f", "b"):
            key, k1, k2, k3, k4 = jax.random.split(key, 5)
            lp[f"wih_{tag}"] = u(k1, (4 * hidden_dim, din), bound)
            lp[f"whh_{tag}"] = u(k2, (4 * hidden_dim, hidden_dim), bound)
            lp[f"bih_{tag}"] = u(k3, (4 * hidden_dim,), bound)
            lp[f"bhh_{tag}"] = u(k4, (4 * hidden_dim,), bound)
        layers.append(lp)

    key, k1, k2 = jax.random.split(key, 3)
    fc_bound = 1.0 / ((2 * hidden_dim) ** 0.5)
    return {"layers": layers,
            "fc_w": u(k1, (output_dim, 2 * hidden_dim), fc_bound),
            "fc_b": u(k2, (output_dim,), fc_bound)}


def pack_params(raw, dtype=jnp.float32):
    """Pre-transpose & fuse weights so no transposes / concats are needed at runtime."""
    H = raw["layers"][0]["whh_f"].shape[1]
    out_dim = raw["fc_w"].shape[0]
    n_fc = _round_up(out_dim, 128)                # lane-pad the tiny FC output dim

    packed = {"layers": []}
    for li, lp in enumerate(raw["layers"]):
        entry = {
            # (2, H, 4H): Whh pre-transposed, stacked [fwd, bwd]
            "whh": jnp.stack([lp["whh_f"].T, lp["whh_b"].T], axis=0).astype(dtype),
            # (1, 8H): b_ih + b_hh, [fwd gates | bwd gates]; kept f32
            "b_in": jnp.concatenate([lp["bih_f"] + lp["bhh_f"],
                                     lp["bih_b"] + lp["bhh_b"]])[None, :].astype(jnp.float32),
        }
        if li == 0:
            # (Din, 8H): Wih of both directions, pre-transposed & fused
            entry["w_in"] = jnp.concatenate(
                [lp["wih_f"].T, lp["wih_b"].T], axis=1).astype(dtype)
        else:
            # Split along the input-feature axis so the next layer consumes the
            # (2, T, B, H) hidden pair without concatenating activations.
            entry["w_in_f"] = jnp.concatenate(
                [lp["wih_f"][:, :H].T, lp["wih_b"][:, :H].T], axis=1).astype(dtype)  # (H, 8H)
            entry["w_in_b"] = jnp.concatenate(
                [lp["wih_f"][:, H:].T, lp["wih_b"][:, H:].T], axis=1).astype(dtype)  # (H, 8H)
        packed["layers"].append(entry)

    # FC fused into the last layer's recurrent epilogue: per-direction (2, H, n_fc),
    # output columns zero-padded to a full 128-lane tile.
    fcw_f = jnp.zeros((H, n_fc), jnp.float32).at[:, :out_dim].set(raw["fc_w"][:, :H].T)
    fcw_b = jnp.zeros((H, n_fc), jnp.float32).at[:, :out_dim].set(raw["fc_w"][:, H:].T)
    packed["fc_w"] = jnp.stack([fcw_f, fcw_b], axis=0).astype(dtype)
    packed["fc_b"] = raw["fc_b"].astype(jnp.float32)          # (output_dim,)
    return packed


# ----------------------------------------------------------------------------
# Pure-JAX reference (PyTorch semantics, raw-layout params) for correctness check
# ----------------------------------------------------------------------------
def _ref_direction(x_tm, wih, whh, bih, bhh, reverse):
    T, B, _ = x_tm.shape
    H = whh.shape[1]
    xs = x_tm[::-1] if reverse else x_tm

    def cell(carry, x_t):
        h, c = carry
        g = x_t @ wih.T + h @ whh.T + bih + bhh
        i = jax.nn.sigmoid(g[:, 0 * H:1 * H])
        f = jax.nn.sigmoid(g[:, 1 * H:2 * H])
        gg = jnp.tanh(g[:, 2 * H:3 * H])
        o = jax.nn.sigmoid(g[:, 3 * H:4 * H])
        c = f * c + i * gg
        h = o * jnp.tanh(c)
        return (h, c), h

    z = jnp.zeros((B, H), jnp.float32)
    _, hs = lax.scan(cell, (z, z), xs)
    return hs[::-1] if reverse else hs


def lstm_model_reference(x, raw):
    h = jnp.transpose(x, (1, 0, 2))
    for lp in raw["layers"]:
        f = _ref_direction(h, lp["wih_f"], lp["whh_f"], lp["bih_f"], lp["bhh_f"], False)
        b = _ref_direction(h, lp["wih_b"], lp["whh_b"], lp["bih_b"], lp["bhh_b"], True)
        h = jnp.concatenate([f, b], axis=-1)
    y = h @ raw["fc_w"].T + raw["fc_b"]
    return jnp.transpose(y, (1, 0, 2))


# ----------------------------------------------------------------------------
if __name__ == "__main__":
    # Small shapes consistent with the module (real: hidden_dim=1024, num_layers=5,
    # output_dim=2). hidden_dim must be a multiple of 32 here.
    B, T = 2, 8
    input_dim = 16
    hidden_dim = 32
    num_layers = 2
    output_dim = 2

    key = jax.random.PRNGKey(0)
    key, kx, kp, ka, kw, kb = jax.random.split(key, 6)
    x = jax.random.normal(kx, (B, T, input_dim), jnp.float32)
    raw = init_raw_params(kp, input_dim, hidden_dim, num_layers, output_dim)

    forward = jax.jit(lstm_model_forward)

    # f32 path: tight correctness check against the pure-JAX reference.
    params_f32 = pack_params(raw, jnp.float32)
    out = jax.block_until_ready(forward(x, params_f32))
    ref = jax.block_until_ready(lstm_model_reference(x, raw))
    assert out.shape == (B, T, output_dim), out.shape
    assert jnp.allclose(out, ref, rtol=1e-4, atol=1e-4), \
        f"max err {jnp.max(jnp.abs(out - ref))}"

    # Padded-time path: T=7 is not a multiple of the time chunk, exercising the
    # zero-padding + in-kernel masking of padded steps (esp. the backward direction).
    x7 = x[:, :7]
    out7 = jax.block_until_ready(forward(x7, params_f32))
    ref7 = jax.block_until_ready(lstm_model_reference(x7, raw))
    assert out7.shape == (B, 7, output_dim), out7.shape
    assert jnp.allclose(out7, ref7, rtol=1e-4, atol=1e-4), \
        f"padded max err {jnp.max(jnp.abs(out7 - ref7))}"

    # bf16 weight/activation path (recommended at real sizes, esp. v7x): f32 accumulation.
    params_bf16 = pack_params(raw, jnp.bfloat16)
    out_bf16 = jax.block_until_ready(forward(x, params_bf16))
    assert out_bf16.shape == (B, T, output_dim)
    err_bf16 = float(jnp.max(jnp.abs(out_bf16 - ref)))
    assert err_bf16 == err_bf16 and err_bf16 < 0.25, f"bf16 max err {err_bf16}"

    # Direct check of both fused_projection modes (resident-weight A and column-tiled B).
    a_u = jax.random.normal(ka, (24, 16), jnp.float32)
    w_u = jax.random.normal(kw, (16, 256), jnp.float32)
    b_u = jax.random.normal(kb, (1, 256), jnp.float32)
    ref_u = a_u @ w_u + b_u
    _, vlim = _vmem_budget()
    out_a = fused_projection([a_u], [w_u], b_u, out_dtype=jnp.float32,
                             tile_budget=32 << 20, vmem_limit=vlim)
    out_b = fused_projection([a_u], [w_u], b_u, out_dtype=jnp.float32,
                             tile_budget=1 << 16, vmem_limit=vlim)  # too small for mode A
    out_a, out_b = jax.block_until_ready((out_a, out_b))
    assert jnp.allclose(out_a, ref_u, rtol=1e-5, atol=1e-5)
    assert jnp.allclose(out_b, ref_u, rtol=1e-5, atol=1e-5)

    print("KERNEL_OK")
</pallas_src>

<mosaic_0001>
module attributes {stable_mosaic.version = 11 : i64} {
  func.func @kernel(%arg0: i32, %arg1: memref<16x16xf32, #tpu.memory_space<vmem>>, %arg2: memref<16x256xf32, #tpu.memory_space<vmem>>, %arg3: memref<1x256xf32, #tpu.memory_space<vmem>>, %arg4: memref<16x256xf32, #tpu.memory_space<vmem>>) attributes {dimension_semantics = [#tpu.dimension_semantics<parallel>], iteration_bounds = array<i64: 1>, scalar_prefetch = 0 : i64, scratch_operands = 0 : i64, tpu.core_type = #tpu.core_type<tc>, window_params = [{transform_indices = @transform_0, window_bounds = array<i64: 16, 16>}, {pipeline_mode = #tpu.pipeline_mode<synchronous>, transform_indices = @transform_1, window_bounds = array<i64: 16, 256>}, {pipeline_mode = #tpu.pipeline_mode<synchronous>, transform_indices = @transform_2, window_bounds = array<i64: 1, 256>}, {transform_indices = @transform_3, window_bounds = array<i64: 16, 256>}]} {
    %c0 = arith.constant 0 : index
    %c0_0 = arith.constant 0 : index
    %0 = vector.load %arg1[%c0, %c0_0] : memref<16x16xf32, #tpu.memory_space<vmem>>, vector<16x16xf32>
    %c0_1 = arith.constant 0 : index
    %c0_2 = arith.constant 0 : index
    %1 = vector.load %arg2[%c0_1, %c0_2] : memref<16x256xf32, #tpu.memory_space<vmem>>, vector<16x256xf32>
    %cst = arith.constant dense<0.000000e+00> : vector<16x256xf32>
    %2 = tpu.matmul %0, %1, %cst {dimension_numbers = #tpu.dot_dimension_numbers<[1], [0], [0], [1], [0, 0, 1, 1], [], []>} : vector<16x16xf32>, vector<16x256xf32>, vector<16x256xf32> -> vector<16x256xf32>
    %c0_3 = arith.constant 0 : index
    %c0_4 = arith.constant 0 : index
    %3 = vector.load %arg3[%c0_3, %c0_4] : memref<1x256xf32, #tpu.memory_space<vmem>>, vector<1x256xf32>
    %4 = vector.broadcast %3 : vector<1x256xf32> to vector<16x256xf32>
    %5 = arith.addf %2, %4 : vector<16x256xf32>
    %c0_5 = arith.constant 0 : index
    %c0_6 = arith.constant 0 : index
    %6 = vector.load %arg4[%c0_5, %c0_6] : memref<16x256xf32, #tpu.memory_space<vmem>>, vector<16x256xf32>
    tpu.vector_store %arg4[%c0_5, %c0_6], %5 {strides = array<i32>} : memref<16x256xf32, #tpu.memory_space<vmem>>, vector<16x256xf32>,
    return
  }
  func.func @transform_0(%arg0: i32) -> (i32, i32) {
    %c0_i32 = arith.constant 0 : i32
    %c0_i32_0 = arith.constant 0 : i32
    return %arg0, %c0_i32 : i32, i32
  }
  func.func @transform_1(%arg0: i32) -> (i32, i32) {
    %c0_i32 = arith.constant 0 : i32
    %c0_i32_0 = arith.constant 0 : i32
    %c0_i32_1 = arith.constant 0 : i32
    return %c0_i32, %c0_i32_0 : i32, i32
  }
  func.func @transform_2(%arg0: i32) -> (i32, i32) {
    %c0_i32 = arith.constant 0 : i32
    %c0_i32_0 = arith.constant 0 : i32
    %c0_i32_1 = arith.constant 0 : i32
    return %c0_i32, %c0_i32_0 : i32, i32
  }
  func.func @transform_3(%arg0: i32) -> (i32, i32) {
    %c0_i32 = arith.constant 0 : i32
    %c0_i32_0 = arith.constant 0 : i32
    return %arg0, %c0_i32 : i32, i32
  }
}

module attributes {stable_mosaic.version = 11 : i64} {
  func.func @_lstm_rec_kernel(%arg0: i32, %arg1: i32, %arg2: memref<8x2x128xf32, #tpu.memory_space<vmem>>, %arg3: memref<2x32x128xf32, #tpu.memory_space<vmem>>, %arg4: memref<1x8x2x32xf32, #tpu.memory_space<vmem>>, %arg5: memref<2x32xf32, #tpu.memory_space<vmem>>, %arg6: memref<2x32xf32, #tpu.memory_space<vmem>>) attributes {dimension_semantics = [#tpu.dimension_semantics<parallel>, #tpu.dimension_semantics<arbitrary>], iteration_bounds = array<i64: 2, 1>, scalar_prefetch = 0 : i64, scratch_operands = 2 : i64, tpu.core_type = #tpu.core_type<tc>, window_params = [{transform_indices = @transform_0, window_bounds = array<i64: 8, 2, 128>}, {pipeline_mode = #tpu.pipeline_mode<synchronous>, transform_indices = @transform_1, window_bounds = array<i64: 2, 32, 128>}, {transform_indices = @transform_2, window_bounds = array<i64: 1, 8, 2, 32>}]} {
    %c0_i32 = arith.constant 0 : i32
    %0 = arith.cmpi eq, %arg1, %c0_i32 : i32
    %1 = arith.extui %0 : i1 to i32
    %c0_i32_0 = arith.constant 0 : i32
    %2 = arith.cmpi ne, %1, %c0_i32_0 : i32
    scf.if %2 {
      %cst_216 = arith.constant 0.000000e+00 : f32
      %411 = vector.broadcast %cst_216 : f32 to vector<2x32xf32>
      %c0_217 = arith.constant 0 : index
      %c0_218 = arith.constant 0 : index
      %412 = vector.load %arg5[%c0_217, %c0_218] : memref<2x32xf32, #tpu.memory_space<vmem>>, vector<2x32xf32>
      tpu.vector_store %arg5[%c0_217, %c0_218], %411 {strides = array<i32>} : memref<2x32xf32, #tpu.memory_space<vmem>>, vector<2x32xf32>,
      %cst_219 = arith.constant 0.000000e+00 : f32
      %413 = vector.broadcast %cst_219 : f32 to vector<2x32xf32>
      %c0_220 = arith.constant 0 : index
      %c0_221 = arith.constant 0 : index
      %414 = vector.load %arg6[%c0_220, %c0_221] : memref<2x32xf32, #tpu.memory_space<vmem>>, vector<2x32xf32>
      tpu.vector_store %arg6[%c0_220, %c0_221], %413 {strides = array<i32>} : memref<2x32xf32, #tpu.memory_space<vmem>>, vector<2x32xf32>,
    } else {
    }
    %c0_i32_1 = arith.constant 0 : i32
    %c2_i32 = arith.constant 2 : i32
    %3 = arith.muli %c2_i32, %c0_i32_1 : i32
    %c7_i32 = arith.constant 7 : i32
    %4 = arith.subi %c7_i32, %3 : i32
    %5 = arith.muli %arg0, %4 : i32
    %6 = arith.addi %c0_i32_1, %5 : i32
    %c0 = arith.constant 0 : index
    %c0_2 = arith.constant 0 : index
    %7 = vector.load %arg5[%c0, %c0_2] : memref<2x32xf32, #tpu.memory_space<vmem>>, vector<2x32xf32>
    %c0_3 = arith.constant 0 : index
    %c0_4 = arith.constant 0 : index
    %8 = vector.load %arg6[%c0_3, %c0_4] : memref<2x32xf32, #tpu.memory_space<vmem>>, vector<2x32xf32>
    %9 = arith.index_cast %6 : i32 to index
    %c0_5 = arith.constant 0 : index
    %c0_6 = arith.constant 0 : index
    %10 = vector.load %arg2[%9, %c0_5, %c0_6] : memref<8x2x128xf32, #tpu.memory_space<vmem>>, vector<1x2x128xf32>
    %11 = vector.shape_cast %10 : vector<1x2x128xf32> to vector<2x128xf32>
    %12 = arith.index_cast %arg0 : i32 to index
    %c0_7 = arith.constant 0 : index
    %c0_8 = arith.constant 0 : index
    %13 = vector.load %arg3[%12, %c0_7, %c0_8] : memref<2x32x128xf32, #tpu.memory_space<vmem>>, vector<1x32x128xf32>
    %14 = vector.shape_cast %13 : vector<1x32x128xf32> to vector<32x128xf32>
    %cst = arith.constant dense<0.000000e+00> : vector<2x128xf32>
    %15 = tpu.matmul %7, %14, %cst {dimension_numbers = #tpu.dot_dimension_numbers<[1], [0], [0], [1], [0, 0, 1, 1], [], []>} : vector<2x32xf32>, vector<32x128xf32>, vector<2x128xf32> -> vector<2x128xf32>
    %16 = arith.addf %11, %15 : vector<2x128xf32>
    %17 = vector.extract_strided_slice %16 {offsets = [0, 0], sizes = [2, 32], strides = [1, 1]} : vector<2x128xf32> to vector<2x32xf32>
    %cst_9 = arith.constant 5.000000e-01 : f32
    %18 = vector.broadcast %cst_9 : f32 to vector<2x32xf32>
    %19 = arith.mulf %18, %17 : vector<2x32xf32>
    %20 = math.tanh %19 : vector<2x32xf32>
    %cst_10 = arith.constant 5.000000e-01 : f32
    %21 = vector.broadcast %cst_10 : f32 to vector<2x32xf32>
    %22 = arith.mulf %21, %20 : vector<2x32xf32>
    %cst_11 = arith.constant 5.000000e-01 : f32
    %23 = vector.broadcast %cst_11 : f32 to vector<2x32xf32>
    %24 = arith.addf %22, %23 : vector<2x32xf32>
    %25 = vector.extract_strided_slice %16 {offsets = [0, 32], sizes = [2, 32], strides = [1, 1]} : vector<2x128xf32> to vector<2x32xf32>
    %cst_12 = arith.constant 5.000000e-01 : f32
    %26 = vector.broadcast %cst_12 : f32 to vector<2x32xf32>
    %27 = arith.mulf %26, %25 : vector<2x32xf32>
    %28 = math.tanh %27 : vector<2x32xf32>
    %cst_13 = arith.constant 5.000000e-01 : f32
    %29 = vector.broadcast %cst_13 : f32 to vector<2x32xf32>
    %30 = arith.mulf %29, %28 : vector<2x32xf32>
    %cst_14 = arith.constant 5.000000e-01 : f32
    %31 = vector.broadcast %cst_14 : f32 to vector<2x32xf32>
    %32 = arith.addf %30, %31 : vector<2x32xf32>
    %33 = vector.extract_strided_slice %16 {offsets = [0, 64], sizes = [2, 32], strides = [1, 1]} : vector<2x128xf32> to vector<2x32xf32>
    %34 = math.tanh %33 : vector<2x32xf32>
    %35 = vector.extract_strided_slice %16 {offsets = [0, 96], sizes = [2, 32], strides = [1, 1]} : vector<2x128xf32> to vector<2x32xf32>
    %cst_15 = arith.constant 5.000000e-01 : f32
    %36 = vector.broadcast %cst_15 : f32 to vector<2x32xf32>
    %37 = arith.mulf %36, %35 : vector<2x32xf32>
    %38 = math.tanh %37 : vector<2x32xf32>
    %cst_16 = arith.constant 5.000000e-01 : f32
    %39 = vector.broadcast %cst_16 : f32 to vector<2x32xf32>
    %40 = arith.mulf %39, %38 : vector<2x32xf32>
    %cst_17 = arith.constant 5.000000e-01 : f32
    %41 = vector.broadcast %cst_17 : f32 to vector<2x32xf32>
    %42 = arith.addf %40, %41 : vector<2x32xf32>
    %43 = arith.mulf %32, %8 : vector<2x32xf32>
    %44 = arith.mulf %24, %34 : vector<2x32xf32>
    %45 = arith.addf %43, %44 : vector<2x32xf32>
    %46 = math.tanh %45 : vector<2x32xf32>
    %47 = arith.mulf %42, %46 : vector<2x32xf32>
    %c0_18 = arith.constant 0 : index
    %c0_19 = arith.constant 0 : index
    %48 = vector.load %arg5[%c0_18, %c0_19] : memref<2x32xf32, #tpu.memory_space<vmem>>, vector<2x32xf32>
    tpu.vector_store %arg5[%c0_18, %c0_19], %47 {strides = array<i32>} : memref<2x32xf32, #tpu.memory_space<vmem>>, vector<2x32xf32>,
    %c0_20 = arith.constant 0 : index
    %c0_21 = arith.constant 0 : index
    %49 = vector.load %arg6[%c0_20, %c0_21] : memref<2x32xf32, #tpu.memory_space<vmem>>, vector<2x32xf32>
    tpu.vector_store %arg6[%c0_20, %c0_21], %45 {strides = array<i32>} : memref<2x32xf32, #tpu.memory_space<vmem>>, vector<2x32xf32>,
    %c0_22 = arith.constant 0 : index
    %50 = arith.index_cast %6 : i32 to index
    %c0_23 = arith.constant 0 : index
    %c0_24 = arith.constant 0 : index
    %51 = vector.load %arg4[%c0_22, %50, %c0_23, %c0_24] : memref<1x8x2x32xf32, #tpu.memory_space<vmem>>, vector<1x1x2x32xf32>
    %52 = vector.shape_cast %51 : vector<1x1x2x32xf32> to vector<2x32xf32>
    %53 = vector.shape_cast %47 : vector<2x32xf32> to vector<1x1x2x32xf32>
    tpu.vector_store %arg4[%c0_22, %50, %c0_23, %c0_24], %53 {strides = array<i32>} : memref<1x8x2x32xf32, #tpu.memory_space<vmem>>, vector<1x1x2x32xf32>,
    %c1_i32 = arith.constant 1 : i32
    %c2_i32_25 = arith.constant 2 : i32
    %54 = arith.muli %c2_i32_25, %c1_i32 : i32
    %c7_i32_26 = arith.constant 7 : i32
    %55 = arith.subi %c7_i32_26, %54 : i32
    %56 = arith.muli %arg0, %55 : i32
    %57 = arith.addi %c1_i32, %56 : i32
    %c0_27 = arith.constant 0 : index
    %c0_28 = arith.constant 0 : index
    %58 = vector.load %arg5[%c0_27, %c0_28] : memref<2x32xf32, #tpu.memory_space<vmem>>, vector<2x32xf32>
    %c0_29 = arith.constant 0 : index
    %c0_30 = arith.constant 0 : index
    %59 = vector.load %arg6[%c0_29, %c0_30] : memref<2x32xf32, #tpu.memory_space<vmem>>, vector<2x32xf32>
    %60 = arith.index_cast %57 : i32 to index
    %c0_31 = arith.constant 0 : index
    %c0_32 = arith.constant 0 : index
    %61 = vector.load %arg2[%60, %c0_31, %c0_32] : memref<8x2x128xf32, #tpu.memory_space<vmem>>, vector<1x2x128xf32>
    %62 = vector.shape_cast %61 : vector<1x2x128xf32> to vector<2x128xf32>
    %63 = arith.index_cast %arg0 : i32 to index
    %c0_33 = arith.constant 0 : index
    %c0_34 = arith.constant 0 : index
    %64 = vector.load %arg3[%63, %c0_33, %c0_34] : memref<2x32x128xf32, #tpu.memory_space<vmem>>, vector<1x32x128xf32>
    %65 = vector.shape_cast %64 : vector<1x32x128xf32> to vector<32x128xf32>
    %cst_35 = arith.constant dense<0.000000e+00> : vector<2x128xf32>
    %66 = tpu.matmul %58, %65, %cst_35 {dimension_numbers = #tpu.dot_dimension_numbers<[1], [0], [0], [1], [0, 0, 1, 1], [], []>} : vector<2x32xf32>, vector<32x128xf32>, vector<2x128xf32> -> vector<2x128xf32>
    %67 = arith.addf %62, %66 : vector<2x128xf32>
    %68 = vector.extract_strided_slice %67 {offsets = [0, 0], sizes = [2, 32], strides = [1, 1]} : vector<2x128xf32> to vector<2x32xf32>
    %cst_36 = arith.constant 5.000000e-01 : f32
    %69 = vector.broadcast %cst_36 : f32 to vector<2x32xf32>
    %70 = arith.mulf %69, %68 : vector<2x32xf32>
    %71 = math.tanh %70 : vector<2x32xf32>
    %cst_37 = arith.constant 5.000000e-01 : f32
    %72 = vector.broadcast %cst_37 : f32 to vector<2x32xf32>
    %73 = arith.mulf %72, %71 : vector<2x32xf32>
    %cst_38 = arith.constant 5.000000e-01 : f32
    %74 = vector.broadcast %cst_38 : f32 to vector<2x32xf32>
    %75 = arith.addf %73, %74 : vector<2x32xf32>
    %76 = vector.extract_strided_slice %67 {offsets = [0, 32], sizes = [2, 32], strides = [1, 1]} : vector<2x128xf32> to vector<2x32xf32>
    %cst_39 = arith.constant 5.000000e-01 : f32
    %77 = vector.broadcast %cst_39 : f32 to vector<2x32xf32>
    %78 = arith.mulf %77, %76 : vector<2x32xf32>
    %79 = math.tanh %78 : vector<2x32xf32>
    %cst_40 = arith.constant 5.000000e-01 : f32
    %80 = vector.broadcast %cst_40 : f32 to vector<2x32xf32>
    %81 = arith.mulf %80, %79 : vector<2x32xf32>
    %cst_41 = arith.constant 5.000000e-01 : f32
    %82 = vector.broadcast %cst_41 : f32 to vector<2x32xf32>
    %83 = arith.addf %81, %82 : vector<2x32xf32>
    %84 = vector.extract_strided_slice %67 {offsets = [0, 64], sizes = [2, 32], strides = [1, 1]} : vector<2x128xf32> to vector<2x32xf32>
    %85 = math.tanh %84 : vector<2x32xf32>
    %86 = vector.extract_strided_slice %67 {offsets = [0, 96], sizes = [2, 32], strides = [1, 1]} : vector<2x128xf32> to vector<2x32xf32>
    %cst_42 = arith.constant 5.000000e-01 : f32
    %87 = vector.broadcast %cst_42 : f32 to vector<2x32xf32>
    %88 = arith.mulf %87, %86 : vector<2x32xf32>
    %89 = math.tanh %88 : vector<2x32xf32>
    %cst_43 = arith.constant 5.000000e-01 : f32
    %90 = vector.broadcast %cst_43 : f32 to vector<2x32xf32>
    %91 = arith.mulf %90, %89 : vector<2x32xf32>
    %cst_44 = arith.constant 5.000000e-01 : f32
    %92 = vector.broadcast %cst_44 : f32 to vector<2x32xf32>
    %93 = arith.addf %91, %92 : vector<2x32xf32>
    %94 = arith.mulf %83, %59 : vector<2x32xf32>
    %95 = arith.mulf %75, %85 : vector<2x32xf32>
    %96 = arith.addf %94, %95 : vector<2x32xf32>
    %97 = math.tanh %96 : vector<2x32xf32>
    %98 = arith.mulf %93, %97 : vector<2x32xf32>
    %c0_45 = arith.constant 0 : index
    %c0_46 = arith.constant 0 : index
    %99 = vector.load %arg5[%c0_45, %c0_46] : memref<2x32xf32, #tpu.memory_space<vmem>>, vector<2x32xf32>
    tpu.vector_store %arg5[%c0_45, %c0_46], %98 {strides = array<i32>} : memref<2x32xf32, #tpu.memory_space<vmem>>, vector<2x32xf32>,
    %c0_47 = arith.constant 0 : index
    %c0_48 = arith.constant 0 : index
    %100 = vector.load %arg6[%c0_47, %c0_48] : memref<2x32xf32, #tpu.memory_space<vmem>>, vector<2x32xf32>
    tpu.vector_store %arg6[%c0_47, %c0_48], %96 {strides = array<i32>} : memref<2x32xf32, #tpu.memory_space<vmem>>, vector<2x32xf32>,
    %c0_49 = arith.constant 0 : index
    %101 = arith.index_cast %57 : i32 to index
    %c0_50 = arith.constant 0 : index
    %c0_51 = arith.constant 0 : index
    %102 = vector.load %arg4[%c0_49, %101, %c0_50, %c0_51] : memref<1x8x2x32xf32, #tpu.memory_space<vmem>>, vector<1x1x2x32xf32>
    %103 = vector.shape_cast %102 : vector<1x1x2x32xf32> to vector<2x32xf32>
    %104 = vector.shape_cast %98 : vector<2x32xf32> to vector<1x1x2x32xf32>
    tpu.vector_store %arg4[%c0_49, %101, %c0_50, %c0_51], %104 {strides = array<i32>} : memref<1x8x2x32xf32, #tpu.memory_space<vmem>>, vector<1x1x2x32xf32>,
    %c2_i32_52 = arith.constant 2 : i32
    %c2_i32_53 = arith.constant 2 : i32
    %105 = arith.muli %c2_i32_53, %c2_i32_52 : i32
    %c7_i32_54 = arith.constant 7 : i32
    %106 = arith.subi %c7_i32_54, %105 : i32
    %107 = arith.muli %arg0, %106 : i32
    %108 = arith.addi %c2_i32_52, %107 : i32
    %c0_55 = arith.constant 0 : index
    %c0_56 = arith.constant 0 : index
    %109 = vector.load %arg5[%c0_55, %c0_56] : memref<2x32xf32, #tpu.memory_space<vmem>>, vector<2x32xf32>
    %c0_57 = arith.constant 0 : index
    %c0_58 = arith.constant 0 : index
    %110 = vector.load %arg6[%c0_57, %c0_58] : memref<2x32xf32, #tpu.memory_space<vmem>>, vector<2x32xf32>
    %111 = arith.index_cast %108 : i32 to index
    %c0_59 = arith.constant 0 : index
    %c0_60 = arith.constant 0 : index
    %112 = vector.load %arg2[%111, %c0_59, %c0_60] : memref<8x2x128xf32, #tpu.memory_space<vmem>>, vector<1x2x128xf32>
    %113 = vector.shape_cast %112 : vector<1x2x128xf32> to vector<2x128xf32>
    %114 = arith.index_cast %arg0 : i32 to index
    %c0_61 = arith.constant 0 : index
    %c0_62 = arith.constant 0 : index
    %115 = vector.load %arg3[%114, %c0_61, %c0_62] : memref<2x32x128xf32, #tpu.memory_space<vmem>>, vector<1x32x128xf32>
    %116 = vector.shape_cast %115 : vector<1x32x128xf32> to vector<32x128xf32>
    %cst_63 = arith.constant dense<0.000000e+00> : vector<2x128xf32>
    %117 = tpu.matmul %109, %116, %cst_63 {dimension_numbers = #tpu.dot_dimension_numbers<[1], [0], [0], [1], [0, 0, 1, 1], [], []>} : vector<2x32xf32>, vector<32x128xf32>, vector<2x128xf32> -> vector<2x128xf32>
    %118 = arith.addf %113, %117 : vector<2x128xf32>
    %119 = vector.extract_strided_slice %118 {offsets = [0, 0], sizes = [2, 32], strides = [1, 1]} : vector<2x128xf32> to vector<2x32xf32>
    %cst_64 = arith.constant 5.000000e-01 : f32
    %120 = vector.broadcast %cst_64 : f32 to vector<2x32xf32>
    %121 = arith.mulf %120, %119 : vector<2x32xf32>
    %122 = math.tanh %121 : vector<2x32xf32>
    %cst_65 = arith.constant 5.000000e-01 : f32
    %123 = vector.broadcast %cst_65 : f32 to vector<2x32xf32>
    %124 = arith.mulf %123, %122 : vector<2x32xf32>
    %cst_66 = arith.constant 5.000000e-01 : f32
    %125 = vector.broadcast %cst_66 : f32 to vector<2x32xf32>
    %126 = arith.addf %124, %125 : vector<2x32xf32>
    %127 = vector.extract_strided_slice %118 {offsets = [0, 32], sizes = [2, 32], strides = [1, 1]} : vector<2x128xf32> to vector<2x32xf32>
    %cst_67 = arith.constant 5.000000e-01 : f32
    %128 = vector.broadcast %cst_67 : f32 to vector<2x32xf32>
    %129 = arith.mulf %128, %127 : vector<2x32xf32>
    %130 = math.tanh %129 : vector<2x32xf32>
    %cst_68 = arith.constant 5.000000e-01 : f32
    %131 = vector.broadcast %cst_68 : f32 to vector<2x32xf32>
    %132 = arith.mulf %131, %130 : vector<2x32xf32>
    %cst_69 = arith.constant 5.000000e-01 : f32
    %133 = vector.broadcast %cst_69 : f32 to vector<2x32xf32>
    %134 = arith.addf %132, %133 : vector<2x32xf32>
    %135 = vector.extract_strided_slice %118 {offsets = [0, 64], sizes = [2, 32], strides = [1, 1]} : vector<2x128xf32> to vector<2x32xf32>
    %136 = math.tanh %135 : vector<2x32xf32>
    %137 = vector.extract_strided_slice %118 {offsets = [0, 96], sizes = [2, 32], strides = [1, 1]} : vector<2x128xf32> to vector<2x32xf32>
    %cst_70 = arith.constant 5.000000e-01 : f32
    %138 = vector.broadcast %cst_70 : f32 to vector<2x32xf32>
    %139 = arith.mulf %138, %137 : vector<2x32xf32>
    %140 = math.tanh %139 : vector<2x32xf32>
    %cst_71 = arith.constant 5.000000e-01 : f32
    %141 = vector.broadcast %cst_71 : f32 to vector<2x32xf32>
    %142 = arith.mulf %141, %140 : vector<2x32xf32>
    %cst_72 = arith.constant 5.000000e-01 : f32
    %143 = vector.broadcast %cst_72 : f32 to vector<2x32xf32>
    %144 = arith.addf %142, %143 : vector<2x32xf32>
    %145 = arith.mulf %134, %110 : vector<2x32xf32>
    %146 = arith.mulf %126, %136 : vector<2x32xf32>
    %147 = arith.addf %145, %146 : vector<2x32xf32>
    %148 = math.tanh %147 : vector<2x32xf32>
    %149 = arith.mulf %144, %148 : vector<2x32xf32>
    %c0_73 = arith.constant 0 : index
    %c0_74 = arith.constant 0 : index
    %150 = vector.load %arg5[%c0_73, %c0_74] : memref<2x32xf32, #tpu.memory_space<vmem>>, vector<2x32xf32>
    tpu.vector_store %arg5[%c0_73, %c0_74], %149 {strides = array<i32>} : memref<2x32xf32, #tpu.memory_space<vmem>>, vector<2x32xf32>,
    %c0_75 = arith.constant 0 : index
    %c0_76 = arith.constant 0 : index
    %151 = vector.load %arg6[%c0_75, %c0_76] : memref<2x32xf32, #tpu.memory_space<vmem>>, vector<2x32xf32>
    tpu.vector_store %arg6[%c0_75, %c0_76], %147 {strides = array<i32>} : memref<2x32xf32, #tpu.memory_space<vmem>>, vector<2x32xf32>,
    %c0_77 = arith.constant 0 : index
    %152 = arith.index_cast %108 : i32 to index
    %c0_78 = arith.constant 0 : index
    %c0_79 = arith.constant 0 : index
    %153 = vector.load %arg4[%c0_77, %152, %c0_78, %c0_79] : memref<1x8x2x32xf32, #tpu.memory_space<vmem>>, vector<1x1x2x32xf32>
    %154 = vector.shape_cast %153 : vector<1x1x2x32xf32> to vector<2x32xf32>
    %155 = vector.shape_cast %149 : vector<2x32xf32> to vector<1x1x2x32xf32>
    tpu.vector_store %arg4[%c0_77, %152, %c0_78, %c0_79], %155 {strides = array<i32>} : memref<1x8x2x32xf32, #tpu.memory_space<vmem>>, vector<1x1x2x32xf32>,
    %c3_i32 = arith.constant 3 : i32
    %c2_i32_80 = arith.constant 2 : i32
    %156 = arith.muli %c2_i32_80, %c3_i32 : i32
    %c7_i32_81 = arith.constant 7 : i32
    %157 = arith.subi %c7_i32_81, %156 : i32
    %158 = arith.muli %arg0, %157 : i32
    %159 = arith.addi %c3_i32, %158 : i32
    %c0_82 = arith.constant 0 : index
    %c0_83 = arith.constant 0 : index
    %160 = vector.load %arg5[%c0_82, %c0_83] : memref<2x32xf32, #tpu.memory_space<vmem>>, vector<2x32xf32>
    %c0_84 = arith.constant 0 : index
    %c0_85 = arith.constant 0 : index
    %161 = vector.load %arg6[%c0_84, %c0_85] : memref<2x32xf32, #tpu.memory_space<vmem>>, vector<2x32xf32>
    %162 = arith.index_cast %159 : i32 to index
    %c0_86 = arith.constant 0 : index
    %c0_87 = arith.constant 0 : index
    %163 = vector.load %arg2[%162, %c0_86, %c0_87] : memref<8x2x128xf32, #tpu.memory_space<vmem>>, vector<1x2x128xf32>
    %164 = vector.shape_cast %163 : vector<1x2x128xf32> to vector<2x128xf32>
    %165 = arith.index_cast %arg0 : i32 to index
    %c0_88 = arith.constant 0 : index
    %c0_89 = arith.constant 0 : index
    %166 = vector.load %arg3[%165, %c0_88, %c0_89] : memref<2x32x128xf32, #tpu.memory_space<vmem>>, vector<1x32x128xf32>
    %167 = vector.shape_cast %166 : vector<1x32x128xf32> to vector<32x128xf32>
    %cst_90 = arith.constant dense<0.000000e+00> : vector<2x128xf32>
    %168 = tpu.matmul %160, %167, %cst_90 {dimension_numbers = #tpu.dot_dimension_numbers<[1], [0], [0], [1], [0, 0, 1, 1], [], []>} : vector<2x32xf32>, vector<32x128xf32>, vector<2x128xf32> -> vector<2x128xf32>
    %169 = arith.addf %164, %168 : vector<2x128xf32>
    %170 = vector.extract_strided_slice %169 {offsets = [0, 0], sizes = [2, 32], strides = [1, 1]} : vector<2x128xf32> to vector<2x32xf32>
    %cst_91 = arith.constant 5.000000e-01 : f32
    %171 = vector.broadcast %cst_91 : f32 to vector<2x32xf32>
    %172 = arith.mulf %171, %170 : vector<2x32xf32>
    %173 = math.tanh %172 : vector<2x32xf32>
    %cst_92 = arith.constant 5.000000e-01 : f32
    %174 = vector.broadcast %cst_92 : f32 to vector<2x32xf32>
    %175 = arith.mulf %174, %173 : vector<2x32xf32>
    %cst_93 = arith.constant 5.000000e-01 : f32
    %176 = vector.broadcast %cst_93 : f32 to vector<2x32xf32>
    %177 = arith.addf %175, %176 : vector<2x32xf32>
    %178 = vector.extract_strided_slice %169 {offsets = [0, 32], sizes = [2, 32], strides = [1, 1]} : vector<2x128xf32> to vector<2x32xf32>
    %cst_94 = arith.constant 5.000000e-01 : f32
    %179 = vector.broadcast %cst_94 : f32 to vector<2x32xf32>
    %180 = arith.mulf %179, %178 : vector<2x32xf32>
    %181 = math.tanh %180 : vector<2x32xf32>
    %cst_95 = arith.constant 5.000000e-01 : f32
    %182 = vector.broadcast %cst_95 : f32 to vector<2x32xf32>
    %183 = arith.mulf %182, %181 : vector<2x32xf32>
    %cst_96 = arith.constant 5.000000e-01 : f32
    %184 = vector.broadcast %cst_96 : f32 to vector<2x32xf32>
    %185 = arith.addf %183, %184 : vector<2x32xf32>
    %186 = vector.extract_strided_slice %169 {offsets = [0, 64], sizes = [2, 32], strides = [1, 1]} : vector<2x128xf32> to vector<2x32xf32>
    %187 = math.tanh %186 : vector<2x32xf32>
    %188 = vector.extract_strided_slice %169 {offsets = [0, 96], sizes = [2, 32], strides = [1, 1]} : vector<2x128xf32> to vector<2x32xf32>
    %cst_97 = arith.constant 5.000000e-01 : f32
    %189 = vector.broadcast %cst_97 : f32 to vector<2x32xf32>
    %190 = arith.mulf %189, %188 : vector<2x32xf32>
    %191 = math.tanh %190 : vector<2x32xf32>
    %cst_98 = arith.constant 5.000000e-01 : f32
    %192 = vector.broadcast %cst_98 : f32 to vector<2x32xf32>
    %193 = arith.mulf %192, %191 : vector<2x32xf32>
    %cst_99 = arith.constant 5.000000e-01 : f32
    %194 = vector.broadcast %cst_99 : f32 to vector<2x32xf32>
    %195 = arith.addf %193, %194 : vector<2x32xf32>
    %196 = arith.mulf %185, %161 : vector<2x32xf32>
    %197 = arith.mulf %177, %187 : vector<2x32xf32>
    %198 = arith.addf %196, %197 : vector<2x32xf32>
    %199 = math.tanh %198 : vector<2x32xf32>
    %200 = arith.mulf %195, %199 : vector<2x32xf32>
    %c0_100 = arith.constant 0 : index
    %c0_101 = arith.constant 0 : index
    %201 = vector.load %arg5[%c0_100, %c0_101] : memref<2x32xf32, #tpu.memory_space<vmem>>, vector<2x32xf32>
    tpu.vector_store %arg5[%c0_100, %c0_101], %200 {strides = array<i32>} : memref<2x32xf32, #tpu.memory_space<vmem>>, vector<2x32xf32>,
    %c0_102 = arith.constant 0 : index
    %c0_103 = arith.constant 0 : index
    %202 = vector.load %arg6[%c0_102, %c0_103] : memref<2x32xf32, #tpu.memory_space<vmem>>, vector<2x32xf32>
    tpu.vector_store %arg6[%c0_102, %c0_103], %198 {strides = array<i32>} : memref<2x32xf32, #tpu.memory_space<vmem>>, vector<2x32xf32>,
    %c0_104 = arith.constant 0 : index
    %203 = arith.index_cast %159 : i32 to index
    %c0_105 = arith.constant 0 : index
    %c0_106 = arith.constant 0 : index
    %204 = vector.load %arg4[%c0_104, %203, %c0_105, %c0_106] : memref<1x8x2x32xf32, #tpu.memory_space<vmem>>, vector<1x1x2x32xf32>
    %205 = vector.shape_cast %204 : vector<1x1x2x32xf32> to vector<2x32xf32>
    %206 = vector.shape_cast %200 : vector<2x32xf32> to vector<1x1x2x32xf32>
    tpu.vector_store %arg4[%c0_104, %203, %c0_105, %c0_106], %206 {strides = array<i32>} : memref<1x8x2x32xf32, #tpu.memory_space<vmem>>, vector<1x1x2x32xf32>,
    %c4_i32 = arith.constant 4 : i32
    %c2_i32_107 = arith.constant 2 : i32
    %207 = arith.muli %c2_i32_107, %c4_i32 : i32
    %c7_i32_108 = arith.constant 7 : i32
    %208 = arith.subi %c7_i32_108, %207 : i32
    %209 = arith.muli %arg0, %208 : i32
    %210 = arith.addi %c4_i32, %209 : i32
    %c0_109 = arith.constant 0 : index
    %c0_110 = arith.constant 0 : index
    %211 = vector.load %arg5[%c0_109, %c0_110] : memref<2x32xf32, #tpu.memory_space<vmem>>, vector<2x32xf32>
    %c0_111 = arith.constant 0 : index
    %c0_112 = arith.constant 0 : index
    %212 = vector.load %arg6[%c0_111, %c0_112] : memref<2x32xf32, #tpu.memory_space<vmem>>, vector<2x32xf32>
    %213 = arith.index_cast %210 : i32 to index
    %c0_113 = arith.constant 0 : index
    %c0_114 = arith.constant 0 : index
    %214 = vector.load %arg2[%213, %c0_113, %c0_114] : memref<8x2x128xf32, #tpu.memory_space<vmem>>, vector<1x2x128xf32>
    %215 = vector.shape_cast %214 : vector<1x2x128xf32> to vector<2x128xf32>
    %216 = arith.index_cast %arg0 : i32 to index
    %c0_115 = arith.constant 0 : index
    %c0_116 = arith.constant 0 : index
    %217 = vector.load %arg3[%216, %c0_115, %c0_116] : memref<2x32x128xf32, #tpu.memory_space<vmem>>, vector<1x32x128xf32>
    %218 = vector.shape_cast %217 : vector<1x32x128xf32> to vector<32x128xf32>
    %cst_117 = arith.constant dense<0.000000e+00> : vector<2x128xf32>
    %219 = tpu.matmul %211, %218, %cst_117 {dimension_numbers = #tpu.dot_dimension_numbers<[1], [0], [0], [1], [0, 0, 1, 1], [], []>} : vector<2x32xf32>, vector<32x128xf32>, vector<2x128xf32> -> vector<2x128xf32>
    %220 = arith.addf %215, %219 : vector<2x128xf32>
    %221 = vector.extract_strided_slice %220 {offsets = [0, 0], sizes = [2, 32], strides = [1, 1]} : vector<2x128xf32> to vector<2x32xf32>
    %cst_118 = arith.constant 5.000000e-01 : f32
    %222 = vector.broadcast %cst_118 : f32 to vector<2x32xf32>
    %223 = arith.mulf %222, %221 : vector<2x32xf32>
    %224 = math.tanh %223 : vector<2x32xf32>
    %cst_119 = arith.constant 5.000000e-01 : f32
    %225 = vector.broadcast %cst_119 : f32 to vector<2x32xf32>
    %226 = arith.mulf %225, %224 : vector<2x32xf32>
    %cst_120 = arith.constant 5.000000e-01 : f32
    %227 = vector.broadcast %cst_120 : f32 to vector<2x32xf32>
    %228 = arith.addf %226, %227 : vector<2x32xf32>
    %229 = vector.extract_strided_slice %220 {offsets = [0, 32], sizes = [2, 32], strides = [1, 1]} : vector<2x128xf32> to vector<2x32xf32>
    %cst_121 = arith.constant 5.000000e-01 : f32
    %230 = vector.broadcast %cst_121 : f32 to vector<2x32xf32>
    %231 = arith.mulf %230, %229 : vector<2x32xf32>
    %232 = math.tanh %231 : vector<2x32xf32>
    %cst_122 = arith.constant 5.000000e-01 : f32
    %233 = vector.broadcast %cst_122 : f32 to vector<2x32xf32>
    %234 = arith.mulf %233, %232 : vector<2x32xf32>
    %cst_123 = arith.constant 5.000000e-01 : f32
    %235 = vector.broadcast %cst_123 : f32 to vector<2x32xf32>
    %236 = arith.addf %234, %235 : vector<2x32xf32>
    %237 = vector.extract_strided_slice %220 {offsets = [0, 64], sizes = [2, 32], strides = [1, 1]} : vector<2x128xf32> to vector<2x32xf32>
    %238 = math.tanh %237 : vector<2x32xf32>
    %239 = vector.extract_strided_slice %220 {offsets = [0, 96], sizes = [2, 32], strides = [1, 1]} : vector<2x128xf32> to vector<2x32xf32>
    %cst_124 = arith.constant 5.000000e-01 : f32
    %240 = vector.broadcast %cst_124 : f32 to vector<2x32xf32>
    %241 = arith.mulf %240, %239 : vector<2x32xf32>
    %242 = math.tanh %241 : vector<2x32xf32>
    %cst_125 = arith.constant 5.000000e-01 : f32
    %243 = vector.broadcast %cst_125 : f32 to vector<2x32xf32>
    %244 = arith.mulf %243, %242 : vector<2x32xf32>
    %cst_126 = arith.constant 5.000000e-01 : f32
    %245 = vector.broadcast %cst_126 : f32 to vector<2x32xf32>
    %246 = arith.addf %244, %245 : vector<2x32xf32>
    %247 = arith.mulf %236, %212 : vector<2x32xf32>
    %248 = arith.mulf %228, %238 : vector<2x32xf32>
    %249 = arith.addf %247, %248 : vector<2x32xf32>
    %250 = math.tanh %249 : vector<2x32xf32>
    %251 = arith.mulf %246, %250 : vector<2x32xf32>
    %c0_127 = arith.constant 0 : index
    %c0_128 = arith.constant 0 : index
    %252 = vector.load %arg5[%c0_127, %c0_128] : memref<2x32xf32, #tpu.memory_space<vmem>>, vector<2x32xf32>
    tpu.vector_store %arg5[%c0_127, %c0_128], %251 {strides = array<i32>} : memref<2x32xf32, #tpu.memory_space<vmem>>, vector<2x32xf32>,
    %c0_129 = arith.constant 0 : index
    %c0_130 = arith.constant 0 : index
    %253 = vector.load %arg6[%c0_129, %c0_130] : memref<2x32xf32, #tpu.memory_space<vmem>>, vector<2x32xf32>
    tpu.vector_store %arg6[%c0_129, %c0_130], %249 {strides = array<i32>} : memref<2x32xf32, #tpu.memory_space<vmem>>, vector<2x32xf32>,
    %c0_131 = arith.constant 0 : index
    %254 = arith.index_cast %210 : i32 to index
    %c0_132 = arith.constant 0 : index
    %c0_133 = arith.constant 0 : index
    %255 = vector.load %arg4[%c0_131, %254, %c0_132, %c0_133] : memref<1x8x2x32xf32, #tpu.memory_space<vmem>>, vector<1x1x2x32xf32>
    %256 = vector.shape_cast %255 : vector<1x1x2x32xf32> to vector<2x32xf32>
    %257 = vector.shape_cast %251 : vector<2x32xf32> to vector<1x1x2x32xf32>
    tpu.vector_store %arg4[%c0_131, %254, %c0_132, %c0_133], %257 {strides = array<i32>} : memref<1x8x2x32xf32, #tpu.memory_space<vmem>>, vector<1x1x2x32xf32>,
    %c5_i32 = arith.constant 5 : i32
    %c2_i32_134 = arith.constant 2 : i32
    %258 = arith.muli %c2_i32_134, %c5_i32 : i32
    %c7_i32_135 = arith.constant 7 : i32
    %259 = arith.subi %c7_i32_135, %258 : i32
    %260 = arith.muli %arg0, %259 : i32
    %261 = arith.addi %c5_i32, %260 : i32
    %c0_136 = arith.constant 0 : index
    %c0_137 = arith.constant 0 : index
    %262 = vector.load %arg5[%c0_136, %c0_137] : memref<2x32xf32, #tpu.memory_space<vmem>>, vector<2x32xf32>
    %c0_138 = arith.constant 0 : index
    %c0_139 = arith.constant 0 : index
    %263 = vector.load %arg6[%c0_138, %c0_139] : memref<2x32xf32, #tpu.memory_space<vmem>>, vector<2x32xf32>
    %264 = arith.index_cast %261 : i32 to index
    %c0_140 = arith.constant 0 : index
    %c0_141 = arith.constant 0 : index
    %265 = vector.load %arg2[%264, %c0_140, %c0_141] : memref<8x2x128xf32, #tpu.memory_space<vmem>>, vector<1x2x128xf32>
    %266 = vector.shape_cast %265 : vector<1x2x128xf32> to vector<2x128xf32>
    %267 = arith.index_cast %arg0 : i32 to index
    %c0_142 = arith.constant 0 : index
    %c0_143 = arith.constant 0 : index
    %268 = vector.load %arg3[%267, %c0_142, %c0_143] : memref<2x32x128xf32, #tpu.memory_space<vmem>>, vector<1x32x128xf32>
    %269 = vector.shape_cast %268 : vector<1x32x128xf32> to vector<32x128xf32>
    %cst_144 = arith.constant dense<0.000000e+00> : vector<2x128xf32>
    %270 = tpu.matmul %262, %269, %cst_144 {dimension_numbers = #tpu.dot_dimension_numbers<[1], [0], [0], [1], [0, 0, 1, 1], [], []>} : vector<2x32xf32>, vector<32x128xf32>, vector<2x128xf32> -> vector<2x128xf32>
    %271 = arith.addf %266, %270 : vector<2x128xf32>
    %272 = vector.extract_strided_slice %271 {offsets = [0, 0], sizes = [2, 32], strides = [1, 1]} : vector<2x128xf32> to vector<2x32xf32>
    %cst_145 = arith.constant 5.000000e-01 : f32
    %273 = vector.broadcast %cst_145 : f32 to vector<2x32xf32>
    %274 = arith.mulf %273, %272 : vector<2x32xf32>
    %275 = math.tanh %274 : vector<2x32xf32>
    %cst_146 = arith.constant 5.000000e-01 : f32
    %276 = vector.broadcast %cst_146 : f32 to vector<2x32xf32>
    %277 = arith.mulf %276, %275 : vector<2x32xf32>
    %cst_147 = arith.constant 5.000000e-01 : f32
    %278 = vector.broadcast %cst_147 : f32 to vector<2x32xf32>
    %279 = arith.addf %277, %278 : vector<2x32xf32>
    %280 = vector.extract_strided_slice %271 {offsets = [0, 32], sizes = [2, 32], strides = [1, 1]} : vector<2x128xf32> to vector<2x32xf32>
    %cst_148 = arith.constant 5.000000e-01 : f32
    %281 = vector.broadcast %cst_148 : f32 to vector<2x32xf32>
    %282 = arith.mulf %281, %280 : vector<2x32xf32>
    %283 = math.tanh %282 : vector<2x32xf32>
    %cst_149 = arith.constant 5.000000e-01 : f32
    %284 = vector.broadcast %cst_149 : f32 to vector<2x32xf32>
    %285 = arith.mulf %284, %283 : vector<2x32xf32>
    %cst_150 = arith.constant 5.000000e-01 : f32
    %286 = vector.broadcast %cst_150 : f32 to vector<2x32xf32>
    %287 = arith.addf %285, %286 : vector<2x32xf32>
    %288 = vector.extract_strided_slice %271 {offsets = [0, 64], sizes = [2, 32], strides = [1, 1]} : vector<2x128xf32> to vector<2x32xf32>
    %289 = math.tanh %288 : vector<2x32xf32>
    %290 = vector.extract_strided_slice %271 {offsets = [0, 96], sizes = [2, 32], strides = [1, 1]} : vector<2x128xf32> to vector<2x32xf32>
    %cst_151 = arith.constant 5.000000e-01 : f32
    %291 = vector.broadcast %cst_151 : f32 to vector<2x32xf32>
    %292 = arith.mulf %291, %290 : vector<2x32xf32>
    %293 = math.tanh %292 : vector<2x32xf32>
    %cst_152 = arith.constant 5.000000e-01 : f32
    %294 = vector.broadcast %cst_152 : f32 to vector<2x32xf32>
    %295 = arith.mulf %294, %293 : vector<2x32xf32>
    %cst_153 = arith.constant 5.000000e-01 : f32
    %296 = vector.broadcast %cst_153 : f32 to vector<2x32xf32>
    %297 = arith.addf %295, %296 : vector<2x32xf32>
    %298 = arith.mulf %287, %263 : vector<2x32xf32>
    %299 = arith.mulf %279, %289 : vector<2x32xf32>
    %300 = arith.addf %298, %299 : vector<2x32xf32>
    %301 = math.tanh %300 : vector<2x32xf32>
    %302 = arith.mulf %297, %301 : vector<2x32xf32>
    %c0_154 = arith.constant 0 : index
    %c0_155 = arith.constant 0 : index
    %303 = vector.load %arg5[%c0_154, %c0_155] : memref<2x32xf32, #tpu.memory_space<vmem>>, vector<2x32xf32>
    tpu.vector_store %arg5[%c0_154, %c0_155], %302 {strides = array<i32>} : memref<2x32xf32, #tpu.memory_space<vmem>>, vector<2x32xf32>,
    %c0_156 = arith.constant 0 : index
    %c0_157 = arith.constant 0 : index
    %304 = vector.load %arg6[%c0_156, %c0_157] : memref<2x32xf32, #tpu.memory_space<vmem>>, vector<2x32xf32>
    tpu.vector_store %arg6[%c0_156, %c0_157], %300 {strides = array<i32>} : memref<2x32xf32, #tpu.memory_space<vmem>>, vector<2x32xf32>,
    %c0_158 = arith.constant 0 : index
    %305 = arith.index_cast %261 : i32 to index
    %c0_159 = arith.constant 0 : index
    %c0_160 = arith.constant 0 : index
    %306 = vector.load %arg4[%c0_158, %305, %c0_159, %c0_160] : memref<1x8x2x32xf32, #tpu.memory_space<vmem>>, vector<1x1x2x32xf32>
    %307 = vector.shape_cast %306 : vector<1x1x2x32xf32> to vector<2x32xf32>
    %308 = vector.shape_cast %302 : vector<2x32xf32> to vector<1x1x2x32xf32>
    tpu.vector_store %arg4[%c0_158, %305, %c0_159, %c0_160], %308 {strides = array<i32>} : memref<1x8x2x32xf32, #tpu.memory_space<vmem>>, vector<1x1x2x32xf32>,
    %c6_i32 = arith.constant 6 : i32
    %c2_i32_161 = arith.constant 2 : i32
    %309 = arith.muli %c2_i32_161, %c6_i32 : i32
    %c7_i32_162 = arith.constant 7 : i32
    %310 = arith.subi %c7_i32_162, %309 : i32
    %311 = arith.muli %arg0, %310 : i32
    %312 = arith.addi %c6_i32, %311 : i32
    %c0_163 = arith.constant 0 : index
    %c0_164 = arith.constant 0 : index
    %313 = vector.load %arg5[%c0_163, %c0_164] : memref<2x32xf32, #tpu.memory_space<vmem>>, vector<2x32xf32>
    %c0_165 = arith.constant 0 : index
    %c0_166 = arith.constant 0 : index
    %314 = vector.load %arg6[%c0_165, %c0_166] : memref<2x32xf32, #tpu.memory_space<vmem>>, vector<2x32xf32>
    %315 = arith.index_cast %312 : i32 to index
    %c0_167 = arith.constant 0 : index
    %c0_168 = arith.constant 0 : index
    %316 = vector.load %arg2[%315, %c0_167, %c0_168] : memref<8x2x128xf32, #tpu.memory_space<vmem>>, vector<1x2x128xf32>
    %317 = vector.shape_cast %316 : vector<1x2x128xf32> to vector<2x128xf32>
    %318 = arith.index_cast %arg0 : i32 to index
    %c0_169 = arith.constant 0 : index
    %c0_170 = arith.constant 0 : index
    %319 = vector.load %arg3[%318, %c0_169, %c0_170] : memref<2x32x128xf32, #tpu.memory_space<vmem>>, vector<1x32x128xf32>
    %320 = vector.shape_cast %319 : vector<1x32x128xf32> to vector<32x128xf32>
    %cst_171 = arith.constant dense<0.000000e+00> : vector<2x128xf32>
    %321 = tpu.matmul %313, %320, %cst_171 {dimension_numbers = #tpu.dot_dimension_numbers<[1], [0], [0], [1], [0, 0, 1, 1], [], []>} : vector<2x32xf32>, vector<32x128xf32>, vector<2x128xf32> -> vector<2x128xf32>
    %322 = arith.addf %317, %321 : vector<2x128xf32>
    %323 = vector.extract_strided_slice %322 {offsets = [0, 0], sizes = [2, 32], strides = [1, 1]} : vector<2x128xf32> to vector<2x32xf32>
    %cst_172 = arith.constant 5.000000e-01 : f32
    %324 = vector.broadcast %cst_172 : f32 to vector<2x32xf32>
    %325 = arith.mulf %324, %323 : vector<2x32xf32>
    %326 = math.tanh %325 : vector<2x32xf32>
    %cst_173 = arith.constant 5.000000e-01 : f32
    %327 = vector.broadcast %cst_173 : f32 to vector<2x32xf32>
    %328 = arith.mulf %327, %326 : vector<2x32xf32>
    %cst_174 = arith.constant 5.000000e-01 : f32
    %329 = vector.broadcast %cst_174 : f32 to vector<2x32xf32>
    %330 = arith.addf %328, %329 : vector<2x32xf32>
    %331 = vector.extract_strided_slice %322 {offsets = [0, 32], sizes = [2, 32], strides = [1, 1]} : vector<2x128xf32> to vector<2x32xf32>
    %cst_175 = arith.constant 5.000000e-01 : f32
    %332 = vector.broadcast %cst_175 : f32 to vector<2x32xf32>
    %333 = arith.mulf %332, %331 : vector<2x32xf32>
    %334 = math.tanh %333 : vector<2x32xf32>
    %cst_176 = arith.constant 5.000000e-01 : f32
    %335 = vector.broadcast %cst_176 : f32 to vector<2x32xf32>
    %336 = arith.mulf %335, %334 : vector<2x32xf32>
    %cst_177 = arith.constant 5.000000e-01 : f32
    %337 = vector.broadcast %cst_177 : f32 to vector<2x32xf32>
    %338 = arith.addf %336, %337 : vector<2x32xf32>
    %339 = vector.extract_strided_slice %322 {offsets = [0, 64], sizes = [2, 32], strides = [1, 1]} : vector<2x128xf32> to vector<2x32xf32>
    %340 = math.tanh %339 : vector<2x32xf32>
    %341 = vector.extract_strided_slice %322 {offsets = [0, 96], sizes = [2, 32], strides = [1, 1]} : vector<2x128xf32> to vector<2x32xf32>
    %cst_178 = arith.constant 5.000000e-01 : f32
    %342 = vector.broadcast %cst_178 : f32 to vector<2x32xf32>
    %343 = arith.mulf %342, %341 : vector<2x32xf32>
    %344 = math.tanh %343 : vector<2x32xf32>
    %cst_179 = arith.constant 5.000000e-01 : f32
    %345 = vector.broadcast %cst_179 : f32 to vector<2x32xf32>
    %346 = arith.mulf %345, %344 : vector<2x32xf32>
    %cst_180 = arith.constant 5.000000e-01 : f32
    %347 = vector.broadcast %cst_180 : f32 to vector<2x32xf32>
    %348 = arith.addf %346, %347 : vector<2x32xf32>
    %349 = arith.mulf %338, %314 : vector<2x32xf32>
    %350 = arith.mulf %330, %340 : vector<2x32xf32>
    %351 = arith.addf %349, %350 : vector<2x32xf32>
    %352 = math.tanh %351 : vector<2x32xf32>
    %353 = arith.mulf %348, %352 : vector<2x32xf32>
    %c0_181 = arith.constant 0 : index
    %c0_182 = arith.constant 0 : index
    %354 = vector.load %arg5[%c0_181, %c0_182] : memref<2x32xf32, #tpu.memory_space<vmem>>, vector<2x32xf32>
    tpu.vector_store %arg5[%c0_181, %c0_182], %353 {strides = array<i32>} : memref<2x32xf32, #tpu.memory_space<vmem>>, vector<2x32xf32>,
    %c0_183 = arith.constant 0 : index
    %c0_184 = arith.constant 0 : index
    %355 = vector.load %arg6[%c0_183, %c0_184] : memref<2x32xf32, #tpu.memory_space<vmem>>, vector<2x32xf32>
    tpu.vector_store %arg6[%c0_183, %c0_184], %351 {strides = array<i32>} : memref<2x32xf32, #tpu.memory_space<vmem>>, vector<2x32xf32>,
    %c0_185 = arith.constant 0 : index
    %356 = arith.index_cast %312 : i32 to index
    %c0_186 = arith.constant 0 : index
    %c0_187 = arith.constant 0 : index
    %357 = vector.load %arg4[%c0_185, %356, %c0_186, %c0_187] : memref<1x8x2x32xf32, #tpu.memory_space<vmem>>, vector<1x1x2x32xf32>
    %358 = vector.shape_cast %357 : vector<1x1x2x32xf32> to vector<2x32xf32>
    %359 = vector.shape_cast %353 : vector<2x32xf32> to vector<1x1x2x32xf32>
    tpu.vector_store %arg4[%c0_185, %356, %c0_186, %c0_187], %359 {strides = array<i32>} : memref<1x8x2x32xf32, #tpu.memory_space<vmem>>, vector<1x1x2x32xf32>,
    %c7_i32_188 = arith.constant 7 : i32
    %c2_i32_189 = arith.constant 2 : i32
    %360 = arith.muli %c2_i32_189, %c7_i32_188 : i32
    %c7_i32_190 = arith.constant 7 : i32
    %361 = arith.subi %c7_i32_190, %360 : i32
    %362 = arith.muli %arg0, %361 : i32
    %363 = arith.addi %c7_i32_188, %362 : i32
    %c0_191 = arith.constant 0 : index
    %c0_192 = arith.constant 0 : index
    %364 = vector.load %arg5[%c0_191, %c0_192] : memref<2x32xf32, #tpu.memory_space<vmem>>, vector<2x32xf32>
    %c0_193 = arith.constant 0 : index
    %c0_194 = arith.constant 0 : index
    %365 = vector.load %arg6[%c0_193, %c0_194] : memref<2x32xf32, #tpu.memory_space<vmem>>, vector<2x32xf32>
    %366 = arith.index_cast %363 : i32 to index
    %c0_195 = arith.constant 0 : index
    %c0_196 = arith.constant 0 : index
    %367 = vector.load %arg2[%366, %c0_195, %c0_196] : memref<8x2x128xf32, #tpu.memory_space<vmem>>, vector<1x2x128xf32>
    %368 = vector.shape_cast %367 : vector<1x2x128xf32> to vector<2x128xf32>
    %369 = arith.index_cast %arg0 : i32 to index
    %c0_197 = arith.constant 0 : index
    %c0_198 = arith.constant 0 : index
    %370 = vector.load %arg3[%369, %c0_197, %c0_198] : memref<2x32x128xf32, #tpu.memory_space<vmem>>, vector<1x32x128xf32>
    %371 = vector.shape_cast %370 : vector<1x32x128xf32> to vector<32x128xf32>
    %cst_199 = arith.constant dense<0.000000e+00> : vector<2x128xf32>
    %372 = tpu.matmul %364, %371, %cst_199 {dimension_numbers = #tpu.dot_dimension_numbers<[1], [0], [0], [1], [0, 0, 1, 1], [], []>} : vector<2x32xf32>, vector<32x128xf32>, vector<2x128xf32> -> vector<2x128xf32>
    %373 = arith.addf %368, %372 : vector<2x128xf32>
    %374 = vector.extract_strided_slice %373 {offsets = [0, 0], sizes = [2, 32], strides = [1, 1]} : vector<2x128xf32> to vector<2x32xf32>
    %cst_200 = arith.constant 5.000000e-01 : f32
    %375 = vector.broadcast %cst_200 : f32 to vector<2x32xf32>
    %376 = arith.mulf %375, %374 : vector<2x32xf32>
    %377 = math.tanh %376 : vector<2x32xf32>
    %cst_201 = arith.constant 5.000000e-01 : f32
    %378 = vector.broadcast %cst_201 : f32 to vector<2x32xf32>
    %379 = arith.mulf %378, %377 : vector<2x32xf32>
    %cst_202 = arith.constant 5.000000e-01 : f32
    %380 = vector.broadcast %cst_202 : f32 to vector<2x32xf32>
    %381 = arith.addf %379, %380 : vector<2x32xf32>
    %382 = vector.extract_strided_slice %373 {offsets = [0, 32], sizes = [2, 32], strides = [1, 1]} : vector<2x128xf32> to vector<2x32xf32>
    %cst_203 = arith.constant 5.000000e-01 : f32
    %383 = vector.broadcast %cst_203 : f32 to vector<2x32xf32>
    %384 = arith.mulf %383, %382 : vector<2x32xf32>
    %385 = math.tanh %384 : vector<2x32xf32>
    %cst_204 = arith.constant 5.000000e-01 : f32
    %386 = vector.broadcast %cst_204 : f32 to vector<2x32xf32>
    %387 = arith.mulf %386, %385 : vector<2x32xf32>
    %cst_205 = arith.constant 5.000000e-01 : f32
    %388 = vector.broadcast %cst_205 : f32 to vector<2x32xf32>
    %389 = arith.addf %387, %388 : vector<2x32xf32>
    %390 = vector.extract_strided_slice %373 {offsets = [0, 64], sizes = [2, 32], strides = [1, 1]} : vector<2x128xf32> to vector<2x32xf32>
    %391 = math.tanh %390 : vector<2x32xf32>
    %392 = vector.extract_strided_slice %373 {offsets = [0, 96], sizes = [2, 32], strides = [1, 1]} : vector<2x128xf32> to vector<2x32xf32>
    %cst_206 = arith.constant 5.000000e-01 : f32
    %393 = vector.broadcast %cst_206 : f32 to vector<2x32xf32>
    %394 = arith.mulf %393, %392 : vector<2x32xf32>
    %395 = math.tanh %394 : vector<2x32xf32>
    %cst_207 = arith.constant 5.000000e-01 : f32
    %396 = vector.broadcast %cst_207 : f32 to vector<2x32xf32>
    %397 = arith.mulf %396, %395 : vector<2x32xf32>
    %cst_208 = arith.constant 5.000000e-01 : f32
    %398 = vector.broadcast %cst_208 : f32 to vector<2x32xf32>
    %399 = arith.addf %397, %398 : vector<2x32xf32>
    %400 = arith.mulf %389, %365 : vector<2x32xf32>
    %401 = arith.mulf %381, %391 : vector<2x32xf32>
    %402 = arith.addf %400, %401 : vector<2x32xf32>
    %403 = math.tanh %402 : vector<2x32xf32>
    %404 = arith.mulf %399, %403 : vector<2x32xf32>
    %c0_209 = arith.constant 0 : index
    %c0_210 = arith.constant 0 : index
    %405 = vector.load %arg5[%c0_209, %c0_210] : memref<2x32xf32, #tpu.memory_space<vmem>>, vector<2x32xf32>
    tpu.vector_store %arg5[%c0_209, %c0_210], %404 {strides = array<i32>} : memref<2x32xf32, #tpu.memory_space<vmem>>, vector<2x32xf32>,
    %c0_211 = arith.constant 0 : index
    %c0_212 = arith.constant 0 : index
    %406 = vector.load %arg6[%c0_211, %c0_212] : memref<2x32xf32, #tpu.memory_space<vmem>>, vector<2x32xf32>
    tpu.vector_store %arg6[%c0_211, %c0_212], %402 {strides = array<i32>} : memref<2x32xf32, #tpu.memory_space<vmem>>, vector<2x32xf32>,
    %c0_213 = arith.constant 0 : index
    %407 = arith.index_cast %363 : i32 to index
    %c0_214 = arith.constant 0 : index
    %c0_215 = arith.constant 0 : index
    %408 = vector.load %arg4[%c0_213, %407, %c0_214, %c0_215] : memref<1x8x2x32xf32, #tpu.memory_space<vmem>>, vector<1x1x2x32xf32>
    %409 = vector.shape_cast %408 : vector<1x1x2x32xf32> to vector<2x32xf32>
    %410 = vector.shape_cast %404 : vector<2x32xf32> to vector<1x1x2x32xf32>
    tpu.vector_store %arg4[%c0_213, %407, %c0_214, %c0_215], %410 {strides = array<i32>} : memref<1x8x2x32xf32, #tpu.memory_space<vmem>>, vector<1x1x2x32xf32>,
    %c8_i32 = arith.constant 8 : i32
    return
  }
  func.func @transform_0(%arg0: i32, %arg1: i32) -> (i32, i32, i32) {
    %c2_i32 = arith.constant 2 : i32
    %0 = arith.muli %c2_i32, %arg1 : i32
    %c0_i32 = arith.constant 0 : i32
    %1 = arith.subi %c0_i32, %0 : i32
    %2 = arith.muli %arg0, %1 : i32
    %3 = arith.addi %arg1, %2 : i32
    %c0_i32_0 = arith.constant 0 : i32
    %c0_i32_1 = arith.constant 0 : i32
    return %3, %c0_i32_0, %arg0 : i32, i32, i32
  }
  func.func @transform_1(%arg0: i32, %arg1: i32) -> (i32, i32, i32) {
    %c0_i32 = arith.constant 0 : i32
    %c0_i32_0 = arith.constant 0 : i32
    %c0_i32_1 = arith.constant 0 : i32
    %c0_i32_2 = arith.constant 0 : i32
    return %c0_i32, %c0_i32_0, %c0_i32_1 : i32, i32, i32
  }
  func.func @transform_2(%arg0: i32, %arg1: i32) -> (i32, i32, i32, i32) {
    %c2_i32 = arith.constant 2 : i32
    %0 = arith.muli %c2_i32, %arg1 : i32
    %c0_i32 = arith.constant 0 : i32
    %1 = arith.subi %c0_i32, %0 : i32
    %2 = arith.muli %arg0, %1 : i32
    %3 = arith.addi %arg1, %2 : i32
    %c0_i32_0 = arith.constant 0 : i32
    %c0_i32_1 = arith.constant 0 : i32
    %c0_i32_2 = arith.constant 0 : i32
    return %arg0, %3, %c0_i32_0, %c0_i32_1 : i32, i32, i32, i32
  }
}

module attributes {stable_mosaic.version = 11 : i64} {
  func.func @kernel(%arg0: i32, %arg1: memref<16x32xf32, #tpu.memory_space<vmem>>, %arg2: memref<16x32xf32, #tpu.memory_space<vmem>>, %arg3: memref<32x256xf32, #tpu.memory_space<vmem>>, %arg4: memref<32x256xf32, #tpu.memory_space<vmem>>, %arg5: memref<1x256xf32, #tpu.memory_space<vmem>>, %arg6: memref<16x256xf32, #tpu.memory_space<vmem>>) attributes {dimension_semantics = [#tpu.dimension_semantics<parallel>], iteration_bounds = array<i64: 1>, scalar_prefetch = 0 : i64, scratch_operands = 0 : i64, tpu.core_type = #tpu.core_type<tc>, window_params = [{transform_indices = @transform_0, window_bounds = array<i64: 16, 32>}, {transform_indices = @transform_1, window_bounds = array<i64: 16, 32>}, {pipeline_mode = #tpu.pipeline_mode<synchronous>, transform_indices = @transform_2, window_bounds = array<i64: 32, 256>}, {pipeline_mode = #tpu.pipeline_mode<synchronous>, transform_indices = @transform_3, window_bounds = array<i64: 32, 256>}, {pipeline_mode = #tpu.pipeline_mode<synchronous>, transform_indices = @transform_4, window_bounds = array<i64: 1, 256>}, {transform_indices = @transform_5, window_bounds = array<i64: 16, 256>}]} {
    %c0 = arith.constant 0 : index
    %c0_0 = arith.constant 0 : index
    %0 = vector.load %arg1[%c0, %c0_0] : memref<16x32xf32, #tpu.memory_space<vmem>>, vector<16x32xf32>
    %c0_1 = arith.constant 0 : index
    %c0_2 = arith.constant 0 : index
    %1 = vector.load %arg3[%c0_1, %c0_2] : memref<32x256xf32, #tpu.memory_space<vmem>>, vector<32x256xf32>
    %cst = arith.constant dense<0.000000e+00> : vector<16x256xf32>
    %2 = tpu.matmul %0, %1, %cst {dimension_numbers = #tpu.dot_dimension_numbers<[1], [0], [0], [1], [0, 0, 1, 1], [], []>} : vector<16x32xf32>, vector<32x256xf32>, vector<16x256xf32> -> vector<16x256xf32>
    %c0_3 = arith.constant 0 : index
    %c0_4 = arith.constant 0 : index
    %3 = vector.load %arg2[%c0_3, %c0_4] : memref<16x32xf32, #tpu.memory_space<vmem>>, vector<16x32xf32>
    %c0_5 = arith.constant 0 : index
    %c0_6 = arith.constant 0 : index
    %4 = vector.load %arg4[%c0_5, %c0_6] : memref<32x256xf32, #tpu.memory_space<vmem>>, vector<32x256xf32>
    %cst_7 = arith.constant dense<0.000000e+00> : vector<16x256xf32>
    %5 = tpu.matmul %3, %4, %cst_7 {dimension_numbers = #tpu.dot_dimension_numbers<[1], [0], [0], [1], [0, 0, 1, 1], [], []>} : vector<16x32xf32>, vector<32x256xf32>, vector<16x256xf32> -> vector<16x256xf32>
    %6 = arith.addf %2, %5 : vector<16x256xf32>
    %c0_8 = arith.constant 0 : index
    %c0_9 = arith.constant 0 : index
    %7 = vector.load %arg5[%c0_8, %c0_9] : memref<1x256xf32, #tpu.memory_space<vmem>>, vector<1x256xf32>
    %8 = vector.broadcast %7 : vector<1x256xf32> to vector<16x256xf32>
    %9 = arith.addf %6, %8 : vector<16x256xf32>
    %c0_10 = arith.constant 0 : index
    %c0_11 = arith.constant 0 : index
    %10 = vector.load %arg6[%c0_10, %c0_11] : memref<16x256xf32, #tpu.memory_space<vmem>>, vector<16x256xf32>
    tpu.vector_store %arg6[%c0_10, %c0_11], %9 {strides = array<i32>} : memref<16x256xf32, #tpu.memory_space<vmem>>, vector<16x256xf32>,
    return
  }
  func.func @transform_0(%arg0: i32) -> (i32, i32) {
    %c0_i32 = arith.constant 0 : i32
    %c0_i32_0 = arith.constant 0 : i32
    return %arg0, %c0_i32 : i32, i32
  }
  func.func @transform_1(%arg0: i32) -> (i32, i32) {
    %c0_i32 = arith.constant 0 : i32
    %c0_i32_0 = arith.constant 0 : i32
    return %arg0, %c0_i32 : i32, i32
  }
  func.func @transform_2(%arg0: i32) -> (i32, i32) {
    %c0_i32 = arith.constant 0 : i32
    %c0_i32_0 = arith.constant 0 : i32
    %c0_i32_1 = arith.constant 0 : i32
    return %c0_i32, %c0_i32_0 : i32, i32
  }
  func.func @transform_3(%arg0: i32) -> (i32, i32) {
    %c0_i32 = arith.constant 0 : i32
    %c0_i32_0 = arith.constant 0 : i32
    %c0_i32_1 = arith.constant 0 : i32
    return %c0_i32, %c0_i32_0 : i32, i32
  }
  func.func @transform_4(%arg0: i32) -> (i32, i32) {
    %c0_i32 = arith.constant 0 : i32
    %c0_i32_0 = arith.constant 0 : i32
    %c0_i32_1 = arith.constant 0 : i32
    return %c0_i32, %c0_i32_0 : i32, i32
  }
  func.func @transform_5(%arg0: i32) -> (i32, i32) {
    %c0_i32 = arith.constant 0 : i32
    %c0_i32_0 = arith.constant 0 : i32
    return %arg0, %c0_i32 : i32, i32
  }
}

module attributes {stable_mosaic.version = 11 : i64} {
  func.func @_lstm_rec_kernel(%arg0: i32, %arg1: i32, %arg2: memref<8x2x128xf32, #tpu.memory_space<vmem>>, %arg3: memref<2x32x128xf32, #tpu.memory_space<vmem>>, %arg4: memref<2x32x128xf32, #tpu.memory_space<vmem>>, %arg5: memref<1x8x2x128xf32, #tpu.memory_space<vmem>>, %arg6: memref<2x32xf32, #tpu.memory_space<vmem>>, %arg7: memref<2x32xf32, #tpu.memory_space<vmem>>) attributes {dimension_semantics = [#tpu.dimension_semantics<parallel>, #tpu.dimension_semantics<arbitrary>], iteration_bounds = array<i64: 2, 1>, scalar_prefetch = 0 : i64, scratch_operands = 2 : i64, tpu.core_type = #tpu.core_type<tc>, window_params = [{transform_indices = @transform_0, window_bounds = array<i64: 8, 2, 128>}, {pipeline_mode = #tpu.pipeline_mode<synchronous>, transform_indices = @transform_1, window_bounds = array<i64: 2, 32, 128>}, {pipeline_mode = #tpu.pipeline_mode<synchronous>, transform_indices = @transform_2, window_bounds = array<i64: 2, 32, 128>}, {transform_indices = @transform_3, window_bounds = array<i64: 1, 8, 2, 128>}]} {
    %c0_i32 = arith.constant 0 : i32
    %0 = arith.cmpi eq, %arg1, %c0_i32 : i32
    %1 = arith.extui %0 : i1 to i32
    %c0_i32_0 = arith.constant 0 : i32
    %2 = arith.cmpi ne, %1, %c0_i32_0 : i32
    scf.if %2 {
      %cst_240 = arith.constant 0.000000e+00 : f32
      %443 = vector.broadcast %cst_240 : f32 to vector<2x32xf32>
      %c0_241 = arith.constant 0 : index
      %c0_242 = arith.constant 0 : index
      %444 = vector.load %arg6[%c0_241, %c0_242] : memref<2x32xf32, #tpu.memory_space<vmem>>, vector<2x32xf32>
      tpu.vector_store %arg6[%c0_241, %c0_242], %443 {strides = array<i32>} : memref<2x32xf32, #tpu.memory_space<vmem>>, vector<2x32xf32>,
      %cst_243 = arith.constant 0.000000e+00 : f32
      %445 = vector.broadcast %cst_243 : f32 to vector<2x32xf32>
      %c0_244 = arith.constant 0 : index
      %c0_245 = arith.constant 0 : index
      %446 = vector.load %arg7[%c0_244, %c0_245] : memref<2x32xf32, #tpu.memory_space<vmem>>, vector<2x32xf32>
      tpu.vector_store %arg7[%c0_244, %c0_245], %445 {strides = array<i32>} : memref<2x32xf32, #tpu.memory_space<vmem>>, vector<2x32xf32>,
    } else {
    }
    %c0_i32_1 = arith.constant 0 : i32
    %c2_i32 = arith.constant 2 : i32
    %3 = arith.muli %c2_i32, %c0_i32_1 : i32
    %c7_i32 = arith.constant 7 : i32
    %4 = arith.subi %c7_i32, %3 : i32
    %5 = arith.muli %arg0, %4 : i32
    %6 = arith.addi %c0_i32_1, %5 : i32
    %c0 = arith.constant 0 : index
    %c0_2 = arith.constant 0 : index
    %7 = vector.load %arg6[%c0, %c0_2] : memref<2x32xf32, #tpu.memory_space<vmem>>, vector<2x32xf32>
    %c0_3 = arith.constant 0 : index
    %c0_4 = arith.constant 0 : index
    %8 = vector.load %arg7[%c0_3, %c0_4] : memref<2x32xf32, #tpu.memory_space<vmem>>, vector<2x32xf32>
    %9 = arith.index_cast %6 : i32 to index
    %c0_5 = arith.constant 0 : index
    %c0_6 = arith.constant 0 : index
    %10 = vector.load %arg2[%9, %c0_5, %c0_6] : memref<8x2x128xf32, #tpu.memory_space<vmem>>, vector<1x2x128xf32>
    %11 = vector.shape_cast %10 : vector<1x2x128xf32> to vector<2x128xf32>
    %12 = arith.index_cast %arg0 : i32 to index
    %c0_7 = arith.constant 0 : index
    %c0_8 = arith.constant 0 : index
    %13 = vector.load %arg3[%12, %c0_7, %c0_8] : memref<2x32x128xf32, #tpu.memory_space<vmem>>, vector<1x32x128xf32>
    %14 = vector.shape_cast %13 : vector<1x32x128xf32> to vector<32x128xf32>
    %cst = arith.constant dense<0.000000e+00> : vector<2x128xf32>
    %15 = tpu.matmul %7, %14, %cst {dimension_numbers = #tpu.dot_dimension_numbers<[1], [0], [0], [1], [0, 0, 1, 1], [], []>} : vector<2x32xf32>, vector<32x128xf32>, vector<2x128xf32> -> vector<2x128xf32>
    %16 = arith.addf %11, %15 : vector<2x128xf32>
    %17 = vector.extract_strided_slice %16 {offsets = [0, 0], sizes = [2, 32], strides = [1, 1]} : vector<2x128xf32> to vector<2x32xf32>
    %cst_9 = arith.constant 5.000000e-01 : f32
    %18 = vector.broadcast %cst_9 : f32 to vector<2x32xf32>
    %19 = arith.mulf %18, %17 : vector<2x32xf32>
    %20 = math.tanh %19 : vector<2x32xf32>
    %cst_10 = arith.constant 5.000000e-01 : f32
    %21 = vector.broadcast %cst_10 : f32 to vector<2x32xf32>
    %22 = arith.mulf %21, %20 : vector<2x32xf32>
    %cst_11 = arith.constant 5.000000e-01 : f32
    %23 = vector.broadcast %cst_11 : f32 to vector<2x32xf32>
    %24 = arith.addf %22, %23 : vector<2x32xf32>
    %25 = vector.extract_strided_slice %16 {offsets = [0, 32], sizes = [2, 32], strides = [1, 1]} : vector<2x128xf32> to vector<2x32xf32>
    %cst_12 = arith.constant 5.000000e-01 : f32
    %26 = vector.broadcast %cst_12 : f32 to vector<2x32xf32>
    %27 = arith.mulf %26, %25 : vector<2x32xf32>
    %28 = math.tanh %27 : vector<2x32xf32>
    %cst_13 = arith.constant 5.000000e-01 : f32
    %29 = vector.broadcast %cst_13 : f32 to vector<2x32xf32>
    %30 = arith.mulf %29, %28 : vector<2x32xf32>
    %cst_14 = arith.constant 5.000000e-01 : f32
    %31 = vector.broadcast %cst_14 : f32 to vector<2x32xf32>
    %32 = arith.addf %30, %31 : vector<2x32xf32>
    %33 = vector.extract_strided_slice %16 {offsets = [0, 64], sizes = [2, 32], strides = [1, 1]} : vector<2x128xf32> to vector<2x32xf32>
    %34 = math.tanh %33 : vector<2x32xf32>
    %35 = vector.extract_strided_slice %16 {offsets = [0, 96], sizes = [2, 32], strides = [1, 1]} : vector<2x128xf32> to vector<2x32xf32>
    %cst_15 = arith.constant 5.000000e-01 : f32
    %36 = vector.broadcast %cst_15 : f32 to vector<2x32xf32>
    %37 = arith.mulf %36, %35 : vector<2x32xf32>
    %38 = math.tanh %37 : vector<2x32xf32>
    %cst_16 = arith.constant 5.000000e-01 : f32
    %39 = vector.broadcast %cst_16 : f32 to vector<2x32xf32>
    %40 = arith.mulf %39, %38 : vector<2x32xf32>
    %cst_17 = arith.constant 5.000000e-01 : f32
    %41 = vector.broadcast %cst_17 : f32 to vector<2x32xf32>
    %42 = arith.addf %40, %41 : vector<2x32xf32>
    %43 = arith.mulf %32, %8 : vector<2x32xf32>
    %44 = arith.mulf %24, %34 : vector<2x32xf32>
    %45 = arith.addf %43, %44 : vector<2x32xf32>
    %46 = math.tanh %45 : vector<2x32xf32>
    %47 = arith.mulf %42, %46 : vector<2x32xf32>
    %c0_18 = arith.constant 0 : index
    %c0_19 = arith.constant 0 : index
    %48 = vector.load %arg6[%c0_18, %c0_19] : memref<2x32xf32, #tpu.memory_space<vmem>>, vector<2x32xf32>
    tpu.vector_store %arg6[%c0_18, %c0_19], %47 {strides = array<i32>} : memref<2x32xf32, #tpu.memory_space<vmem>>, vector<2x32xf32>,
    %c0_20 = arith.constant 0 : index
    %c0_21 = arith.constant 0 : index
    %49 = vector.load %arg7[%c0_20, %c0_21] : memref<2x32xf32, #tpu.memory_space<vmem>>, vector<2x32xf32>
    tpu.vector_store %arg7[%c0_20, %c0_21], %45 {strides = array<i32>} : memref<2x32xf32, #tpu.memory_space<vmem>>, vector<2x32xf32>,
    %50 = arith.index_cast %arg0 : i32 to index
    %c0_22 = arith.constant 0 : index
    %c0_23 = arith.constant 0 : index
    %51 = vector.load %arg4[%50, %c0_22, %c0_23] : memref<2x32x128xf32, #tpu.memory_space<vmem>>, vector<1x32x128xf32>
    %52 = vector.shape_cast %51 : vector<1x32x128xf32> to vector<32x128xf32>
    %cst_24 = arith.constant dense<0.000000e+00> : vector<2x128xf32>
    %53 = tpu.matmul %47, %52, %cst_24 {dimension_numbers = #tpu.dot_dimension_numbers<[1], [0], [0], [1], [0, 0, 1, 1], [], []>} : vector<2x32xf32>, vector<32x128xf32>, vector<2x128xf32> -> vector<2x128xf32>
    %c0_25 = arith.constant 0 : index
    %54 = arith.index_cast %6 : i32 to index
    %c0_26 = arith.constant 0 : index
    %c0_27 = arith.constant 0 : index
    %55 = vector.load %arg5[%c0_25, %54, %c0_26, %c0_27] : memref<1x8x2x128xf32, #tpu.memory_space<vmem>>, vector<1x1x2x128xf32>
    %56 = vector.shape_cast %55 : vector<1x1x2x128xf32> to vector<2x128xf32>
    %57 = vector.shape_cast %53 : vector<2x128xf32> to vector<1x1x2x128xf32>
    tpu.vector_store %arg5[%c0_25, %54, %c0_26, %c0_27], %57 {strides = array<i32>} : memref<1x8x2x128xf32, #tpu.memory_space<vmem>>, vector<1x1x2x128xf32>,
    %c1_i32 = arith.constant 1 : i32
    %c2_i32_28 = arith.constant 2 : i32
    %58 = arith.muli %c2_i32_28, %c1_i32 : i32
    %c7_i32_29 = arith.constant 7 : i32
    %59 = arith.subi %c7_i32_29, %58 : i32
    %60 = arith.muli %arg0, %59 : i32
    %61 = arith.addi %c1_i32, %60 : i32
    %c0_30 = arith.constant 0 : index
    %c0_31 = arith.constant 0 : index
    %62 = vector.load %arg6[%c0_30, %c0_31] : memref<2x32xf32, #tpu.memory_space<vmem>>, vector<2x32xf32>
    %c0_32 = arith.constant 0 : index
    %c0_33 = arith.constant 0 : index
    %63 = vector.load %arg7[%c0_32, %c0_33] : memref<2x32xf32, #tpu.memory_space<vmem>>, vector<2x32xf32>
    %64 = arith.index_cast %61 : i32 to index
    %c0_34 = arith.constant 0 : index
    %c0_35 = arith.constant 0 : index
    %65 = vector.load %arg2[%64, %c0_34, %c0_35] : memref<8x2x128xf32, #tpu.memory_space<vmem>>, vector<1x2x128xf32>
    %66 = vector.shape_cast %65 : vector<1x2x128xf32> to vector<2x128xf32>
    %67 = arith.index_cast %arg0 : i32 to index
    %c0_36 = arith.constant 0 : index
    %c0_37 = arith.constant 0 : index
    %68 = vector.load %arg3[%67, %c0_36, %c0_37] : memref<2x32x128xf32, #tpu.memory_space<vmem>>, vector<1x32x128xf32>
    %69 = vector.shape_cast %68 : vector<1x32x128xf32> to vector<32x128xf32>
    %cst_38 = arith.constant dense<0.000000e+00> : vector<2x128xf32>
    %70 = tpu.matmul %62, %69, %cst_38 {dimension_numbers = #tpu.dot_dimension_numbers<[1], [0], [0], [1], [0, 0, 1, 1], [], []>} : vector<2x32xf32>, vector<32x128xf32>, vector<2x128xf32> -> vector<2x128xf32>
    %71 = arith.addf %66, %70 : vector<2x128xf32>
    %72 = vector.extract_strided_slice %71 {offsets = [0, 0], sizes = [2, 32], strides = [1, 1]} : vector<2x128xf32> to vector<2x32xf32>
    %cst_39 = arith.constant 5.000000e-01 : f32
    %73 = vector.broadcast %cst_39 : f32 to vector<2x32xf32>
    %74 = arith.mulf %73, %72 : vector<2x32xf32>
    %75 = math.tanh %74 : vector<2x32xf32>
    %cst_40 = arith.constant 5.000000e-01 : f32
    %76 = vector.broadcast %cst_40 : f32 to vector<2x32xf32>
    %77 = arith.mulf %76, %75 : vector<2x32xf32>
    %cst_41 = arith.constant 5.000000e-01 : f32
    %78 = vector.broadcast %cst_41 : f32 to vector<2x32xf32>
    %79 = arith.addf %77, %78 : vector<2x32xf32>
    %80 = vector.extract_strided_slice %71 {offsets = [0, 32], sizes = [2, 32], strides = [1, 1]} : vector<2x128xf32> to vector<2x32xf32>
    %cst_42 = arith.constant 5.000000e-01 : f32
    %81 = vector.broadcast %cst_42 : f32 to vector<2x32xf32>
    %82 = arith.mulf %81, %80 : vector<2x32xf32>
    %83 = math.tanh %82 : vector<2x32xf32>
    %cst_43 = arith.constant 5.000000e-01 : f32
    %84 = vector.broadcast %cst_43 : f32 to vector<2x32xf32>
    %85 = arith.mulf %84, %83 : vector<2x32xf32>
    %cst_44 = arith.constant 5.000000e-01 : f32
    %86 = vector.broadcast %cst_44 : f32 to vector<2x32xf32>
    %87 = arith.addf %85, %86 : vector<2x32xf32>
    %88 = vector.extract_strided_slice %71 {offsets = [0, 64], sizes = [2, 32], strides = [1, 1]} : vector<2x128xf32> to vector<2x32xf32>
    %89 = math.tanh %88 : vector<2x32xf32>
    %90 = vector.extract_strided_slice %71 {offsets = [0, 96], sizes = [2, 32], strides = [1, 1]} : vector<2x128xf32> to vector<2x32xf32>
    %cst_45 = arith.constant 5.000000e-01 : f32
    %91 = vector.broadcast %cst_45 : f32 to vector<2x32xf32>
    %92 = arith.mulf %91, %90 : vector<2x32xf32>
    %93 = math.tanh %92 : vector<2x32xf32>
    %cst_46 = arith.constant 5.000000e-01 : f32
    %94 = vector.broadcast %cst_46 : f32 to vector<2x32xf32>
    %95 = arith.mulf %94, %93 : vector<2x32xf32>
    %cst_47 = arith.constant 5.000000e-01 : f32
    %96 = vector.broadcast %cst_47 : f32 to vector<2x32xf32>
    %97 = arith.addf %95, %96 : vector<2x32xf32>
    %98 = arith.mulf %87, %63 : vector<2x32xf32>
    %99 = arith.mulf %79, %89 : vector<2x32xf32>
    %100 = arith.addf %98, %99 : vector<2x32xf32>
    %101 = math.tanh %100 : vector<2x32xf32>
    %102 = arith.mulf %97, %101 : vector<2x32xf32>
    %c0_48 = arith.constant 0 : index
    %c0_49 = arith.constant 0 : index
    %103 = vector.load %arg6[%c0_48, %c0_49] : memref<2x32xf32, #tpu.memory_space<vmem>>, vector<2x32xf32>
    tpu.vector_store %arg6[%c0_48, %c0_49], %102 {strides = array<i32>} : memref<2x32xf32, #tpu.memory_space<vmem>>, vector<2x32xf32>,
    %c0_50 = arith.constant 0 : index
    %c0_51 = arith.constant 0 : index
    %104 = vector.load %arg7[%c0_50, %c0_51] : memref<2x32xf32, #tpu.memory_space<vmem>>, vector<2x32xf32>
    tpu.vector_store %arg7[%c0_50, %c0_51], %100 {strides = array<i32>} : memref<2x32xf32, #tpu.memory_space<vmem>>, vector<2x32xf32>,
    %105 = arith.index_cast %arg0 : i32 to index
    %c0_52 = arith.constant 0 : index
    %c0_53 = arith.constant 0 : index
    %106 = vector.load %arg4[%105, %c0_52, %c0_53] : memref<2x32x128xf32, #tpu.memory_space<vmem>>, vector<1x32x128xf32>
    %107 = vector.shape_cast %106 : vector<1x32x128xf32> to vector<32x128xf32>
    %cst_54 = arith.constant dense<0.000000e+00> : vector<2x128xf32>
    %108 = tpu.matmul %102, %107, %cst_54 {dimension_numbers = #tpu.dot_dimension_numbers<[1], [0], [0], [1], [0, 0, 1, 1], [], []>} : vector<2x32xf32>, vector<32x128xf32>, vector<2x128xf32> -> vector<2x128xf32>
    %c0_55 = arith.constant 0 : index
    %109 = arith.index_cast %61 : i32 to index
    %c0_56 = arith.constant 0 : index
    %c0_57 = arith.constant 0 : index
    %110 = vector.load %arg5[%c0_55, %109, %c0_56, %c0_57] : memref<1x8x2x128xf32, #tpu.memory_space<vmem>>, vector<1x1x2x128xf32>
    %111 = vector.shape_cast %110 : vector<1x1x2x128xf32> to vector<2x128xf32>
    %112 = vector.shape_cast %108 : vector<2x128xf32> to vector<1x1x2x128xf32>
    tpu.vector_store %arg5[%c0_55, %109, %c0_56, %c0_57], %112 {strides = array<i32>} : memref<1x8x2x128xf32, #tpu.memory_space<vmem>>, vector<1x1x2x128xf32>,
    %c2_i32_58 = arith.constant 2 : i32
    %c2_i32_59 = arith.constant 2 : i32
    %113 = arith.muli %c2_i32_59, %c2_i32_58 : i32
    %c7_i32_60 = arith.constant 7 : i32
    %114 = arith.subi %c7_i32_60, %113 : i32
    %115 = arith.muli %arg0, %114 : i32
    %116 = arith.addi %c2_i32_58, %115 : i32
    %c0_61 = arith.constant 0 : index
    %c0_62 = arith.constant 0 : index
    %117 = vector.load %arg6[%c0_61, %c0_62] : memref<2x32xf32, #tpu.memory_space<vmem>>, vector<2x32xf32>
    %c0_63 = arith.constant 0 : index
    %c0_64 = arith.constant 0 : index
    %118 = vector.load %arg7[%c0_63, %c0_64] : memref<2x32xf32, #tpu.memory_space<vmem>>, vector<2x32xf32>
    %119 = arith.index_cast %116 : i32 to index
    %c0_65 = arith.constant 0 : index
    %c0_66 = arith.constant 0 : index
    %120 = vector.load %arg2[%119, %c0_65, %c0_66] : memref<8x2x128xf32, #tpu.memory_space<vmem>>, vector<1x2x128xf32>
    %121 = vector.shape_cast %120 : vector<1x2x128xf32> to vector<2x128xf32>
    %122 = arith.index_cast %arg0 : i32 to index
    %c0_67 = arith.constant 0 : index
    %c0_68 = arith.constant 0 : index
    %123 = vector.load %arg3[%122, %c0_67, %c0_68] : memref<2x32x128xf32, #tpu.memory_space<vmem>>, vector<1x32x128xf32>
    %124 = vector.shape_cast %123 : vector<1x32x128xf32> to vector<32x128xf32>
    %cst_69 = arith.constant dense<0.000000e+00> : vector<2x128xf32>
    %125 = tpu.matmul %117, %124, %cst_69 {dimension_numbers = #tpu.dot_dimension_numbers<[1], [0], [0], [1], [0, 0, 1, 1], [], []>} : vector<2x32xf32>, vector<32x128xf32>, vector<2x128xf32> -> vector<2x128xf32>
    %126 = arith.addf %121, %125 : vector<2x128xf32>
    %127 = vector.extract_strided_slice %126 {offsets = [0, 0], sizes = [2, 32], strides = [1, 1]} : vector<2x128xf32> to vector<2x32xf32>
    %cst_70 = arith.constant 5.000000e-01 : f32
    %128 = vector.broadcast %cst_70 : f32 to vector<2x32xf32>
    %129 = arith.mulf %128, %127 : vector<2x32xf32>
    %130 = math.tanh %129 : vector<2x32xf32>
    %cst_71 = arith.constant 5.000000e-01 : f32
    %131 = vector.broadcast %cst_71 : f32 to vector<2x32xf32>
    %132 = arith.mulf %131, %130 : vector<2x32xf32>
    %cst_72 = arith.constant 5.000000e-01 : f32
    %133 = vector.broadcast %cst_72 : f32 to vector<2x32xf32>
    %134 = arith.addf %132, %133 : vector<2x32xf32>
    %135 = vector.extract_strided_slice %126 {offsets = [0, 32], sizes = [2, 32], strides = [1, 1]} : vector<2x128xf32> to vector<2x32xf32>
    %cst_73 = arith.constant 5.000000e-01 : f32
    %136 = vector.broadcast %cst_73 : f32 to vector<2x32xf32>
    %137 = arith.mulf %136, %135 : vector<2x32xf32>
    %138 = math.tanh %137 : vector<2x32xf32>
    %cst_74 = arith.constant 5.000000e-01 : f32
    %139 = vector.broadcast %cst_74 : f32 to vector<2x32xf32>
    %140 = arith.mulf %139, %138 : vector<2x32xf32>
    %cst_75 = arith.constant 5.000000e-01 : f32
    %141 = vector.broadcast %cst_75 : f32 to vector<2x32xf32>
    %142 = arith.addf %140, %141 : vector<2x32xf32>
    %143 = vector.extract_strided_slice %126 {offsets = [0, 64], sizes = [2, 32], strides = [1, 1]} : vector<2x128xf32> to vector<2x32xf32>
    %144 = math.tanh %143 : vector<2x32xf32>
    %145 = vector.extract_strided_slice %126 {offsets = [0, 96], sizes = [2, 32], strides = [1, 1]} : vector<2x128xf32> to vector<2x32xf32>
    %cst_76 = arith.constant 5.000000e-01 : f32
    %146 = vector.broadcast %cst_76 : f32 to vector<2x32xf32>
    %147 = arith.mulf %146, %145 : vector<2x32xf32>
    %148 = math.tanh %147 : vector<2x32xf32>
    %cst_77 = arith.constant 5.000000e-01 : f32
    %149 = vector.broadcast %cst_77 : f32 to vector<2x32xf32>
    %150 = arith.mulf %149, %148 : vector<2x32xf32>
    %cst_78 = arith.constant 5.000000e-01 : f32
    %151 = vector.broadcast %cst_78 : f32 to vector<2x32xf32>
    %152 = arith.addf %150, %151 : vector<2x32xf32>
    %153 = arith.mulf %142, %118 : vector<2x32xf32>
    %154 = arith.mulf %134, %144 : vector<2x32xf32>
    %155 = arith.addf %153, %154 : vector<2x32xf32>
    %156 = math.tanh %155 : vector<2x32xf32>
    %157 = arith.mulf %152, %156 : vector<2x32xf32>
    %c0_79 = arith.constant 0 : index
    %c0_80 = arith.constant 0 : index
    %158 = vector.load %arg6[%c0_79, %c0_80] : memref<2x32xf32, #tpu.memory_space<vmem>>, vector<2x32xf32>
    tpu.vector_store %arg6[%c0_79, %c0_80], %157 {strides = array<i32>} : memref<2x32xf32, #tpu.memory_space<vmem>>, vector<2x32xf32>,
    %c0_81 = arith.constant 0 : index
    %c0_82 = arith.constant 0 : index
    %159 = vector.load %arg7[%c0_81, %c0_82] : memref<2x32xf32, #tpu.memory_space<vmem>>, vector<2x32xf32>
    tpu.vector_store %arg7[%c0_81, %c0_82], %155 {strides = array<i32>} : memref<2x32xf32, #tpu.memory_space<vmem>>, vector<2x32xf32>,
    %160 = arith.index_cast %arg0 : i32 to index
    %c0_83 = arith.constant 0 : index
    %c0_84 = arith.constant 0 : index
    %161 = vector.load %arg4[%160, %c0_83, %c0_84] : memref<2x32x128xf32, #tpu.memory_space<vmem>>, vector<1x32x128xf32>
    %162 = vector.shape_cast %161 : vector<1x32x128xf32> to vector<32x128xf32>
    %cst_85 = arith.constant dense<0.000000e+00> : vector<2x128xf32>
    %163 = tpu.matmul %157, %162, %cst_85 {dimension_numbers = #tpu.dot_dimension_numbers<[1], [0], [0], [1], [0, 0, 1, 1], [], []>} : vector<2x32xf32>, vector<32x128xf32>, vector<2x128xf32> -> vector<2x128xf32>
    %c0_86 = arith.constant 0 : index
    %164 = arith.index_cast %116 : i32 to index
    %c0_87 = arith.constant 0 : index
    %c0_88 = arith.constant 0 : index
    %165 = vector.load %arg5[%c0_86, %164, %c0_87, %c0_88] : memref<1x8x2x128xf32, #tpu.memory_space<vmem>>, vector<1x1x2x128xf32>
    %166 = vector.shape_cast %165 : vector<1x1x2x128xf32> to vector<2x128xf32>
    %167 = vector.shape_cast %163 : vector<2x128xf32> to vector<1x1x2x128xf32>
    tpu.vector_store %arg5[%c0_86, %164, %c0_87, %c0_88], %167 {strides = array<i32>} : memref<1x8x2x128xf32, #tpu.memory_space<vmem>>, vector<1x1x2x128xf32>,
    %c3_i32 = arith.constant 3 : i32
    %c2_i32_89 = arith.constant 2 : i32
    %168 = arith.muli %c2_i32_89, %c3_i32 : i32
    %c7_i32_90 = arith.constant 7 : i32
    %169 = arith.subi %c7_i32_90, %168 : i32
    %170 = arith.muli %arg0, %169 : i32
    %171 = arith.addi %c3_i32, %170 : i32
    %c0_91 = arith.constant 0 : index
    %c0_92 = arith.constant 0 : index
    %172 = vector.load %arg6[%c0_91, %c0_92] : memref<2x32xf32, #tpu.memory_space<vmem>>, vector<2x32xf32>
    %c0_93 = arith.constant 0 : index
    %c0_94 = arith.constant 0 : index
    %173 = vector.load %arg7[%c0_93, %c0_94] : memref<2x32xf32, #tpu.memory_space<vmem>>, vector<2x32xf32>
    %174 = arith.index_cast %171 : i32 to index
    %c0_95 = arith.constant 0 : index
    %c0_96 = arith.constant 0 : index
    %175 = vector.load %arg2[%174, %c0_95, %c0_96] : memref<8x2x128xf32, #tpu.memory_space<vmem>>, vector<1x2x128xf32>
    %176 = vector.shape_cast %175 : vector<1x2x128xf32> to vector<2x128xf32>
    %177 = arith.index_cast %arg0 : i32 to index
    %c0_97 = arith.constant 0 : index
    %c0_98 = arith.constant 0 : index
    %178 = vector.load %arg3[%177, %c0_97, %c0_98] : memref<2x32x128xf32, #tpu.memory_space<vmem>>, vector<1x32x128xf32>
    %179 = vector.shape_cast %178 : vector<1x32x128xf32> to vector<32x128xf32>
    %cst_99 = arith.constant dense<0.000000e+00> : vector<2x128xf32>
    %180 = tpu.matmul %172, %179, %cst_99 {dimension_numbers = #tpu.dot_dimension_numbers<[1], [0], [0], [1], [0, 0, 1, 1], [], []>} : vector<2x32xf32>, vector<32x128xf32>, vector<2x128xf32> -> vector<2x128xf32>
    %181 = arith.addf %176, %180 : vector<2x128xf32>
    %182 = vector.extract_strided_slice %181 {offsets = [0, 0], sizes = [2, 32], strides = [1, 1]} : vector<2x128xf32> to vector<2x32xf32>
    %cst_100 = arith.constant 5.000000e-01 : f32
    %183 = vector.broadcast %cst_100 : f32 to vector<2x32xf32>
    %184 = arith.mulf %183, %182 : vector<2x32xf32>
    %185 = math.tanh %184 : vector<2x32xf32>
    %cst_101 = arith.constant 5.000000e-01 : f32
    %186 = vector.broadcast %cst_101 : f32 to vector<2x32xf32>
    %187 = arith.mulf %186, %185 : vector<2x32xf32>
    %cst_102 = arith.constant 5.000000e-01 : f32
    %188 = vector.broadcast %cst_102 : f32 to vector<2x32xf32>
    %189 = arith.addf %187, %188 : vector<2x32xf32>
    %190 = vector.extract_strided_slice %181 {offsets = [0, 32], sizes = [2, 32], strides = [1, 1]} : vector<2x128xf32> to vector<2x32xf32>
    %cst_103 = arith.constant 5.000000e-01 : f32
    %191 = vector.broadcast %cst_103 : f32 to vector<2x32xf32>
    %192 = arith.mulf %191, %190 : vector<2x32xf32>
    %193 = math.tanh %192 : vector<2x32xf32>
    %cst_104 = arith.constant 5.000000e-01 : f32
    %194 = vector.broadcast %cst_104 : f32 to vector<2x32xf32>
    %195 = arith.mulf %194, %193 : vector<2x32xf32>
    %cst_105 = arith.constant 5.000000e-01 : f32
    %196 = vector.broadcast %cst_105 : f32 to vector<2x32xf32>
    %197 = arith.addf %195, %196 : vector<2x32xf32>
    %198 = vector.extract_strided_slice %181 {offsets = [0, 64], sizes = [2, 32], strides = [1, 1]} : vector<2x128xf32> to vector<2x32xf32>
    %199 = math.tanh %198 : vector<2x32xf32>
    %200 = vector.extract_strided_slice %181 {offsets = [0, 96], sizes = [2, 32], strides = [1, 1]} : vector<2x128xf32> to vector<2x32xf32>
    %cst_106 = arith.constant 5.000000e-01 : f32
    %201 = vector.broadcast %cst_106 : f32 to vector<2x32xf32>
    %202 = arith.mulf %201, %200 : vector<2x32xf32>
    %203 = math.tanh %202 : vector<2x32xf32>
    %cst_107 = arith.constant 5.000000e-01 : f32
    %204 = vector.broadcast %cst_107 : f32 to vector<2x32xf32>
    %205 = arith.mulf %204, %203 : vector<2x32xf32>
    %cst_108 = arith.constant 5.000000e-01 : f32
    %206 = vector.broadcast %cst_108 : f32 to vector<2x32xf32>
    %207 = arith.addf %205, %206 : vector<2x32xf32>
    %208 = arith.mulf %197, %173 : vector<2x32xf32>
    %209 = arith.mulf %189, %199 : vector<2x32xf32>
    %210 = arith.addf %208, %209 : vector<2x32xf32>
    %211 = math.tanh %210 : vector<2x32xf32>
    %212 = arith.mulf %207, %211 : vector<2x32xf32>
    %c0_109 = arith.constant 0 : index
    %c0_110 = arith.constant 0 : index
    %213 = vector.load %arg6[%c0_109, %c0_110] : memref<2x32xf32, #tpu.memory_space<vmem>>, vector<2x32xf32>
    tpu.vector_store %arg6[%c0_109, %c0_110], %212 {strides = array<i32>} : memref<2x32xf32, #tpu.memory_space<vmem>>, vector<2x32xf32>,
    %c0_111 = arith.constant 0 : index
    %c0_112 = arith.constant 0 : index
    %214 = vector.load %arg7[%c0_111, %c0_112] : memref<2x32xf32, #tpu.memory_space<vmem>>, vector<2x32xf32>
    tpu.vector_store %arg7[%c0_111, %c0_112], %210 {strides = array<i32>} : memref<2x32xf32, #tpu.memory_space<vmem>>, vector<2x32xf32>,
    %215 = arith.index_cast %arg0 : i32 to index
    %c0_113 = arith.constant 0 : index
    %c0_114 = arith.constant 0 : index
    %216 = vector.load %arg4[%215, %c0_113, %c0_114] : memref<2x32x128xf32, #tpu.memory_space<vmem>>, vector<1x32x128xf32>
    %217 = vector.shape_cast %216 : vector<1x32x128xf32> to vector<32x128xf32>
    %cst_115 = arith.constant dense<0.000000e+00> : vector<2x128xf32>
    %218 = tpu.matmul %212, %217, %cst_115 {dimension_numbers = #tpu.dot_dimension_numbers<[1], [0], [0], [1], [0, 0, 1, 1], [], []>} : vector<2x32xf32>, vector<32x128xf32>, vector<2x128xf32> -> vector<2x128xf32>
    %c0_116 = arith.constant 0 : index
    %219 = arith.index_cast %171 : i32 to index
    %c0_117 = arith.constant 0 : index
    %c0_118 = arith.constant 0 : index
    %220 = vector.load %arg5[%c0_116, %219, %c0_117, %c0_118] : memref<1x8x2x128xf32, #tpu.memory_space<vmem>>, vector<1x1x2x128xf32>
    %221 = vector.shape_cast %220 : vector<1x1x2x128xf32> to vector<2x128xf32>
    %222 = vector.shape_cast %218 : vector<2x128xf32> to vector<1x1x2x128xf32>
    tpu.vector_store %arg5[%c0_116, %219, %c0_117, %c0_118], %222 {strides = array<i32>} : memref<1x8x2x128xf32, #tpu.memory_space<vmem>>, vector<1x1x2x128xf32>,
    %c4_i32 = arith.constant 4 : i32
    %c2_i32_119 = arith.constant 2 : i32
    %223 = arith.muli %c2_i32_119, %c4_i32 : i32
    %c7_i32_120 = arith.constant 7 : i32
    %224 = arith.subi %c7_i32_120, %223 : i32
    %225 = arith.muli %arg0, %224 : i32
    %226 = arith.addi %c4_i32, %225 : i32
    %c0_121 = arith.constant 0 : index
    %c0_122 = arith.constant 0 : index
    %227 = vector.load %arg6[%c0_121, %c0_122] : memref<2x32xf32, #tpu.memory_space<vmem>>, vector<2x32xf32>
    %c0_123 = arith.constant 0 : index
    %c0_124 = arith.constant 0 : index
    %228 = vector.load %arg7[%c0_123, %c0_124] : memref<2x32xf32, #tpu.memory_space<vmem>>, vector<2x32xf32>
    %229 = arith.index_cast %226 : i32 to index
    %c0_125 = arith.constant 0 : index
    %c0_126 = arith.constant 0 : index
    %230 = vector.load %arg2[%229, %c0_125, %c0_126] : memref<8x2x128xf32, #tpu.memory_space<vmem>>, vector<1x2x128xf32>
    %231 = vector.shape_cast %230 : vector<1x2x128xf32> to vector<2x128xf32>
    %232 = arith.index_cast %arg0 : i32 to index
    %c0_127 = arith.constant 0 : index
    %c0_128 = arith.constant 0 : index
    %233 = vector.load %arg3[%232, %c0_127, %c0_128] : memref<2x32x128xf32, #tpu.memory_space<vmem>>, vector<1x32x128xf32>
    %234 = vector.shape_cast %233 : vector<1x32x128xf32> to vector<32x128xf32>
    %cst_129 = arith.constant dense<0.000000e+00> : vector<2x128xf32>
    %235 = tpu.matmul %227, %234, %cst_129 {dimension_numbers = #tpu.dot_dimension_numbers<[1], [0], [0], [1], [0, 0, 1, 1], [], []>} : vector<2x32xf32>, vector<32x128xf32>, vector<2x128xf32> -> vector<2x128xf32>
    %236 = arith.addf %231, %235 : vector<2x128xf32>
    %237 = vector.extract_strided_slice %236 {offsets = [0, 0], sizes = [2, 32], strides = [1, 1]} : vector<2x128xf32> to vector<2x32xf32>
    %cst_130 = arith.constant 5.000000e-01 : f32
    %238 = vector.broadcast %cst_130 : f32 to vector<2x32xf32>
    %239 = arith.mulf %238, %237 : vector<2x32xf32>
    %240 = math.tanh %239 : vector<2x32xf32>
    %cst_131 = arith.constant 5.000000e-01 : f32
    %241 = vector.broadcast %cst_131 : f32 to vector<2x32xf32>
    %242 = arith.mulf %241, %240 : vector<2x32xf32>
    %cst_132 = arith.constant 5.000000e-01 : f32
    %243 = vector.broadcast %cst_132 : f32 to vector<2x32xf32>
    %244 = arith.addf %242, %243 : vector<2x32xf32>
    %245 = vector.extract_strided_slice %236 {offsets = [0, 32], sizes = [2, 32], strides = [1, 1]} : vector<2x128xf32> to vector<2x32xf32>
    %cst_133 = arith.constant 5.000000e-01 : f32
    %246 = vector.broadcast %cst_133 : f32 to vector<2x32xf32>
    %247 = arith.mulf %246, %245 : vector<2x32xf32>
    %248 = math.tanh %247 : vector<2x32xf32>
    %cst_134 = arith.constant 5.000000e-01 : f32
    %249 = vector.broadcast %cst_134 : f32 to vector<2x32xf32>
    %250 = arith.mulf %249, %248 : vector<2x32xf32>
    %cst_135 = arith.constant 5.000000e-01 : f32
    %251 = vector.broadcast %cst_135 : f32 to vector<2x32xf32>
    %252 = arith.addf %250, %251 : vector<2x32xf32>
    %253 = vector.extract_strided_slice %236 {offsets = [0, 64], sizes = [2, 32], strides = [1, 1]} : vector<2x128xf32> to vector<2x32xf32>
    %254 = math.tanh %253 : vector<2x32xf32>
    %255 = vector.extract_strided_slice %236 {offsets = [0, 96], sizes = [2, 32], strides = [1, 1]} : vector<2x128xf32> to vector<2x32xf32>
    %cst_136 = arith.constant 5.000000e-01 : f32
    %256 = vector.broadcast %cst_136 : f32 to vector<2x32xf32>
    %257 = arith.mulf %256, %255 : vector<2x32xf32>
    %258 = math.tanh %257 : vector<2x32xf32>
    %cst_137 = arith.constant 5.000000e-01 : f32
    %259 = vector.broadcast %cst_137 : f32 to vector<2x32xf32>
    %260 = arith.mulf %259, %258 : vector<2x32xf32>
    %cst_138 = arith.constant 5.000000e-01 : f32
    %261 = vector.broadcast %cst_138 : f32 to vector<2x32xf32>
    %262 = arith.addf %260, %261 : vector<2x32xf32>
    %263 = arith.mulf %252, %228 : vector<2x32xf32>
    %264 = arith.mulf %244, %254 : vector<2x32xf32>
    %265 = arith.addf %263, %264 : vector<2x32xf32>
    %266 = math.tanh %265 : vector<2x32xf32>
    %267 = arith.mulf %262, %266 : vector<2x32xf32>
    %c0_139 = arith.constant 0 : index
    %c0_140 = arith.constant 0 : index
    %268 = vector.load %arg6[%c0_139, %c0_140] : memref<2x32xf32, #tpu.memory_space<vmem>>, vector<2x32xf32>
    tpu.vector_store %arg6[%c0_139, %c0_140], %267 {strides = array<i32>} : memref<2x32xf32, #tpu.memory_space<vmem>>, vector<2x32xf32>,
    %c0_141 = arith.constant 0 : index
    %c0_142 = arith.constant 0 : index
    %269 = vector.load %arg7[%c0_141, %c0_142] : memref<2x32xf32, #tpu.memory_space<vmem>>, vector<2x32xf32>
    tpu.vector_store %arg7[%c0_141, %c0_142], %265 {strides = array<i32>} : memref<2x32xf32, #tpu.memory_space<vmem>>, vector<2x32xf32>,
    %270 = arith.index_cast %arg0 : i32 to index
    %c0_143 = arith.constant 0 : index
    %c0_144 = arith.constant 0 : index
    %271 = vector.load %arg4[%270, %c0_143, %c0_144] : memref<2x32x128xf32, #tpu.memory_space<vmem>>, vector<1x32x128xf32>
    %272 = vector.shape_cast %271 : vector<1x32x128xf32> to vector<32x128xf32>
    %cst_145 = arith.constant dense<0.000000e+00> : vector<2x128xf32>
    %273 = tpu.matmul %267, %272, %cst_145 {dimension_numbers = #tpu.dot_dimension_numbers<[1], [0], [0], [1], [0, 0, 1, 1], [], []>} : vector<2x32xf32>, vector<32x128xf32>, vector<2x128xf32> -> vector<2x128xf32>
    %c0_146 = arith.constant 0 : index
    %274 = arith.index_cast %226 : i32 to index
    %c0_147 = arith.constant 0 : index
    %c0_148 = arith.constant 0 : index
    %275 = vector.load %arg5[%c0_146, %274, %c0_147, %c0_148] : memref<1x8x2x128xf32, #tpu.memory_space<vmem>>, vector<1x1x2x128xf32>
    %276 = vector.shape_cast %275 : vector<1x1x2x128xf32> to vector<2x128xf32>
    %277 = vector.shape_cast %273 : vector<2x128xf32> to vector<1x1x2x128xf32>
    tpu.vector_store %arg5[%c0_146, %274, %c0_147, %c0_148], %277 {strides = array<i32>} : memref<1x8x2x128xf32, #tpu.memory_space<vmem>>, vector<1x1x2x128xf32>,
    %c5_i32 = arith.constant 5 : i32
    %c2_i32_149 = arith.constant 2 : i32
    %278 = arith.muli %c2_i32_149, %c5_i32 : i32
    %c7_i32_150 = arith.constant 7 : i32
    %279 = arith.subi %c7_i32_150, %278 : i32
    %280 = arith.muli %arg0, %279 : i32
    %281 = arith.addi %c5_i32, %280 : i32
    %c0_151 = arith.constant 0 : index
    %c0_152 = arith.constant 0 : index
    %282 = vector.load %arg6[%c0_151, %c0_152] : memref<2x32xf32, #tpu.memory_space<vmem>>, vector<2x32xf32>
    %c0_153 = arith.constant 0 : index
    %c0_154 = arith.constant 0 : index
    %283 = vector.load %arg7[%c0_153, %c0_154] : memref<2x32xf32, #tpu.memory_space<vmem>>, vector<2x32xf32>
    %284 = arith.index_cast %281 : i32 to index
    %c0_155 = arith.constant 0 : index
    %c0_156 = arith.constant 0 : index
    %285 = vector.load %arg2[%284, %c0_155, %c0_156] : memref<8x2x128xf32, #tpu.memory_space<vmem>>, vector<1x2x128xf32>
    %286 = vector.shape_cast %285 : vector<1x2x128xf32> to vector<2x128xf32>
    %287 = arith.index_cast %arg0 : i32 to index
    %c0_157 = arith.constant 0 : index
    %c0_158 = arith.constant 0 : index
    %288 = vector.load %arg3[%287, %c0_157, %c0_158] : memref<2x32x128xf32, #tpu.memory_space<vmem>>, vector<1x32x128xf32>
    %289 = vector.shape_cast %288 : vector<1x32x128xf32> to vector<32x128xf32>
    %cst_159 = arith.constant dense<0.000000e+00> : vector<2x128xf32>
    %290 = tpu.matmul %282, %289, %cst_159 {dimension_numbers = #tpu.dot_dimension_numbers<[1], [0], [0], [1], [0, 0, 1, 1], [], []>} : vector<2x32xf32>, vector<32x128xf32>, vector<2x128xf32> -> vector<2x128xf32>
    %291 = arith.addf %286, %290 : vector<2x128xf32>
    %292 = vector.extract_strided_slice %291 {offsets = [0, 0], sizes = [2, 32], strides = [1, 1]} : vector<2x128xf32> to vector<2x32xf32>
    %cst_160 = arith.constant 5.000000e-01 : f32
    %293 = vector.broadcast %cst_160 : f32 to vector<2x32xf32>
    %294 = arith.mulf %293, %292 : vector<2x32xf32>
    %295 = math.tanh %294 : vector<2x32xf32>
    %cst_161 = arith.constant 5.000000e-01 : f32
    %296 = vector.broadcast %cst_161 : f32 to vector<2x32xf32>
    %297 = arith.mulf %296, %295 : vector<2x32xf32>
    %cst_162 = arith.constant 5.000000e-01 : f32
    %298 = vector.broadcast %cst_162 : f32 to vector<2x32xf32>
    %299 = arith.addf %297, %298 : vector<2x32xf32>
    %300 = vector.extract_strided_slice %291 {offsets = [0, 32], sizes = [2, 32], strides = [1, 1]} : vector<2x128xf32> to vector<2x32xf32>
    %cst_163 = arith.constant 5.000000e-01 : f32
    %301 = vector.broadcast %cst_163 : f32 to vector<2x32xf32>
    %302 = arith.mulf %301, %300 : vector<2x32xf32>
    %303 = math.tanh %302 : vector<2x32xf32>
    %cst_164 = arith.constant 5.000000e-01 : f32
    %304 = vector.broadcast %cst_164 : f32 to vector<2x32xf32>
    %305 = arith.mulf %304, %303 : vector<2x32xf32>
    %cst_165 = arith.constant 5.000000e-01 : f32
    %306 = vector.broadcast %cst_165 : f32 to vector<2x32xf32>
    %307 = arith.addf %305, %306 : vector<2x32xf32>
    %308 = vector.extract_strided_slice %291 {offsets = [0, 64], sizes = [2, 32], strides = [1, 1]} : vector<2x128xf32> to vector<2x32xf32>
    %309 = math.tanh %308 : vector<2x32xf32>
    %310 = vector.extract_strided_slice %291 {offsets = [0, 96], sizes = [2, 32], strides = [1, 1]} : vector<2x128xf32> to vector<2x32xf32>
    %cst_166 = arith.constant 5.000000e-01 : f32
    %311 = vector.broadcast %cst_166 : f32 to vector<2x32xf32>
    %312 = arith.mulf %311, %310 : vector<2x32xf32>
    %313 = math.tanh %312 : vector<2x32xf32>
    %cst_167 = arith.constant 5.000000e-01 : f32
    %314 = vector.broadcast %cst_167 : f32 to vector<2x32xf32>
    %315 = arith.mulf %314, %313 : vector<2x32xf32>
    %cst_168 = arith.constant 5.000000e-01 : f32
    %316 = vector.broadcast %cst_168 : f32 to vector<2x32xf32>
    %317 = arith.addf %315, %316 : vector<2x32xf32>
    %318 = arith.mulf %307, %283 : vector<2x32xf32>
    %319 = arith.mulf %299, %309 : vector<2x32xf32>
    %320 = arith.addf %318, %319 : vector<2x32xf32>
    %321 = math.tanh %320 : vector<2x32xf32>
    %322 = arith.mulf %317, %321 : vector<2x32xf32>
    %c0_169 = arith.constant 0 : index
    %c0_170 = arith.constant 0 : index
    %323 = vector.load %arg6[%c0_169, %c0_170] : memref<2x32xf32, #tpu.memory_space<vmem>>, vector<2x32xf32>
    tpu.vector_store %arg6[%c0_169, %c0_170], %322 {strides = array<i32>} : memref<2x32xf32, #tpu.memory_space<vmem>>, vector<2x32xf32>,
    %c0_171 = arith.constant 0 : index
    %c0_172 = arith.constant 0 : index
    %324 = vector.load %arg7[%c0_171, %c0_172] : memref<2x32xf32, #tpu.memory_space<vmem>>, vector<2x32xf32>
    tpu.vector_store %arg7[%c0_171, %c0_172], %320 {strides = array<i32>} : memref<2x32xf32, #tpu.memory_space<vmem>>, vector<2x32xf32>,
    %325 = arith.index_cast %arg0 : i32 to index
    %c0_173 = arith.constant 0 : index
    %c0_174 = arith.constant 0 : index
    %326 = vector.load %arg4[%325, %c0_173, %c0_174] : memref<2x32x128xf32, #tpu.memory_space<vmem>>, vector<1x32x128xf32>
    %327 = vector.shape_cast %326 : vector<1x32x128xf32> to vector<32x128xf32>
    %cst_175 = arith.constant dense<0.000000e+00> : vector<2x128xf32>
    %328 = tpu.matmul %322, %327, %cst_175 {dimension_numbers = #tpu.dot_dimension_numbers<[1], [0], [0], [1], [0, 0, 1, 1], [], []>} : vector<2x32xf32>, vector<32x128xf32>, vector<2x128xf32> -> vector<2x128xf32>
    %c0_176 = arith.constant 0 : index
    %329 = arith.index_cast %281 : i32 to index
    %c0_177 = arith.constant 0 : index
    %c0_178 = arith.constant 0 : index
    %330 = vector.load %arg5[%c0_176, %329, %c0_177, %c0_178] : memref<1x8x2x128xf32, #tpu.memory_space<vmem>>, vector<1x1x2x128xf32>
    %331 = vector.shape_cast %330 : vector<1x1x2x128xf32> to vector<2x128xf32>
    %332 = vector.shape_cast %328 : vector<2x128xf32> to vector<1x1x2x128xf32>
    tpu.vector_store %arg5[%c0_176, %329, %c0_177, %c0_178], %332 {strides = array<i32>} : memref<1x8x2x128xf32, #tpu.memory_space<vmem>>, vector<1x1x2x128xf32>,
    %c6_i32 = arith.constant 6 : i32
    %c2_i32_179 = arith.constant 2 : i32
    %333 = arith.muli %c2_i32_179, %c6_i32 : i32
    %c7_i32_180 = arith.constant 7 : i32
    %334 = arith.subi %c7_i32_180, %333 : i32
    %335 = arith.muli %arg0, %334 : i32
    %336 = arith.addi %c6_i32, %335 : i32
    %c0_181 = arith.constant 0 : index
    %c0_182 = arith.constant 0 : index
    %337 = vector.load %arg6[%c0_181, %c0_182] : memref<2x32xf32, #tpu.memory_space<vmem>>, vector<2x32xf32>
    %c0_183 = arith.constant 0 : index
    %c0_184 = arith.constant 0 : index
    %338 = vector.load %arg7[%c0_183, %c0_184] : memref<2x32xf32, #tpu.memory_space<vmem>>, vector<2x32xf32>
    %339 = arith.index_cast %336 : i32 to index
    %c0_185 = arith.constant 0 : index
    %c0_186 = arith.constant 0 : index
    %340 = vector.load %arg2[%339, %c0_185, %c0_186] : memref<8x2x128xf32, #tpu.memory_space<vmem>>, vector<1x2x128xf32>
    %341 = vector.shape_cast %340 : vector<1x2x128xf32> to vector<2x128xf32>
    %342 = arith.index_cast %arg0 : i32 to index
    %c0_187 = arith.constant 0 : index
    %c0_188 = arith.constant 0 : index
    %343 = vector.load %arg3[%342, %c0_187, %c0_188] : memref<2x32x128xf32, #tpu.memory_space<vmem>>, vector<1x32x128xf32>
    %344 = vector.shape_cast %343 : vector<1x32x128xf32> to vector<32x128xf32>
    %cst_189 = arith.constant dense<0.000000e+00> : vector<2x128xf32>
    %345 = tpu.matmul %337, %344, %cst_189 {dimension_numbers = #tpu.dot_dimension_numbers<[1], [0], [0], [1], [0, 0, 1, 1], [], []>} : vector<2x32xf32>, vector<32x128xf32>, vector<2x128xf32> -> vector<2x128xf32>
    %346 = arith.addf %341, %345 : vector<2x128xf32>
    %347 = vector.extract_strided_slice %346 {offsets = [0, 0], sizes = [2, 32], strides = [1, 1]} : vector<2x128xf32> to vector<2x32xf32>
    %cst_190 = arith.constant 5.000000e-01 : f32
    %348 = vector.broadcast %cst_190 : f32 to vector<2x32xf32>
    %349 = arith.mulf %348, %347 : vector<2x32xf32>
    %350 = math.tanh %349 : vector<2x32xf32>
    %cst_191 = arith.constant 5.000000e-01 : f32
    %351 = vector.broadcast %cst_191 : f32 to vector<2x32xf32>
    %352 = arith.mulf %351, %350 : vector<2x32xf32>
    %cst_192 = arith.constant 5.000000e-01 : f32
    %353 = vector.broadcast %cst_192 : f32 to vector<2x32xf32>
    %354 = arith.addf %352, %353 : vector<2x32xf32>
    %355 = vector.extract_strided_slice %346 {offsets = [0, 32], sizes = [2, 32], strides = [1, 1]} : vector<2x128xf32> to vector<2x32xf32>
    %cst_193 = arith.constant 5.000000e-01 : f32
    %356 = vector.broadcast %cst_193 : f32 to vector<2x32xf32>
    %357 = arith.mulf %356, %355 : vector<2x32xf32>
    %358 = math.tanh %357 : vector<2x32xf32>
    %cst_194 = arith.constant 5.000000e-01 : f32
    %359 = vector.broadcast %cst_194 : f32 to vector<2x32xf32>
    %360 = arith.mulf %359, %358 : vector<2x32xf32>
    %cst_195 = arith.constant 5.000000e-01 : f32
    %361 = vector.broadcast %cst_195 : f32 to vector<2x32xf32>
    %362 = arith.addf %360, %361 : vector<2x32xf32>
    %363 = vector.extract_strided_slice %346 {offsets = [0, 64], sizes = [2, 32], strides = [1, 1]} : vector<2x128xf32> to vector<2x32xf32>
    %364 = math.tanh %363 : vector<2x32xf32>
    %365 = vector.extract_strided_slice %346 {offsets = [0, 96], sizes = [2, 32], strides = [1, 1]} : vector<2x128xf32> to vector<2x32xf32>
    %cst_196 = arith.constant 5.000000e-01 : f32
    %366 = vector.broadcast %cst_196 : f32 to vector<2x32xf32>
    %367 = arith.mulf %366, %365 : vector<2x32xf32>
    %368 = math.tanh %367 : vector<2x32xf32>
    %cst_197 = arith.constant 5.000000e-01 : f32
    %369 = vector.broadcast %cst_197 : f32 to vector<2x32xf32>
    %370 = arith.mulf %369, %368 : vector<2x32xf32>
    %cst_198 = arith.constant 5.000000e-01 : f32
    %371 = vector.broadcast %cst_198 : f32 to vector<2x32xf32>
    %372 = arith.addf %370, %371 : vector<2x32xf32>
    %373 = arith.mulf %362, %338 : vector<2x32xf32>
    %374 = arith.mulf %354, %364 : vector<2x32xf32>
    %375 = arith.addf %373, %374 : vector<2x32xf32>
    %376 = math.tanh %375 : vector<2x32xf32>
    %377 = arith.mulf %372, %376 : vector<2x32xf32>
    %c0_199 = arith.constant 0 : index
    %c0_200 = arith.constant 0 : index
    %378 = vector.load %arg6[%c0_199, %c0_200] : memref<2x32xf32, #tpu.memory_space<vmem>>, vector<2x32xf32>
    tpu.vector_store %arg6[%c0_199, %c0_200], %377 {strides = array<i32>} : memref<2x32xf32, #tpu.memory_space<vmem>>, vector<2x32xf32>,
    %c0_201 = arith.constant 0 : index
    %c0_202 = arith.constant 0 : index
    %379 = vector.load %arg7[%c0_201, %c0_202] : memref<2x32xf32, #tpu.memory_space<vmem>>, vector<2x32xf32>
    tpu.vector_store %arg7[%c0_201, %c0_202], %375 {strides = array<i32>} : memref<2x32xf32, #tpu.memory_space<vmem>>, vector<2x32xf32>,
    %380 = arith.index_cast %arg0 : i32 to index
    %c0_203 = arith.constant 0 : index
    %c0_204 = arith.constant 0 : index
    %381 = vector.load %arg4[%380, %c0_203, %c0_204] : memref<2x32x128xf32, #tpu.memory_space<vmem>>, vector<1x32x128xf32>
    %382 = vector.shape_cast %381 : vector<1x32x128xf32> to vector<32x128xf32>
    %cst_205 = arith.constant dense<0.000000e+00> : vector<2x128xf32>
    %383 = tpu.matmul %377, %382, %cst_205 {dimension_numbers = #tpu.dot_dimension_numbers<[1], [0], [0], [1], [0, 0, 1, 1], [], []>} : vector<2x32xf32>, vector<32x128xf32>, vector<2x128xf32> -> vector<2x128xf32>
    %c0_206 = arith.constant 0 : index
    %384 = arith.index_cast %336 : i32 to index
    %c0_207 = arith.constant 0 : index
    %c0_208 = arith.constant 0 : index
    %385 = vector.load %arg5[%c0_206, %384, %c0_207, %c0_208] : memref<1x8x2x128xf32, #tpu.memory_space<vmem>>, vector<1x1x2x128xf32>
    %386 = vector.shape_cast %385 : vector<1x1x2x128xf32> to vector<2x128xf32>
    %387 = vector.shape_cast %383 : vector<2x128xf32> to vector<1x1x2x128xf32>
    tpu.vector_store %arg5[%c0_206, %384, %c0_207, %c0_208], %387 {strides = array<i32>} : memref<1x8x2x128xf32, #tpu.memory_space<vmem>>, vector<1x1x2x128xf32>,
    %c7_i32_209 = arith.constant 7 : i32
    %c2_i32_210 = arith.constant 2 : i32
    %388 = arith.muli %c2_i32_210, %c7_i32_209 : i32
    %c7_i32_211 = arith.constant 7 : i32
    %389 = arith.subi %c7_i32_211, %388 : i32
    %390 = arith.muli %arg0, %389 : i32
    %391 = arith.addi %c7_i32_209, %390 : i32
    %c0_212 = arith.constant 0 : index
    %c0_213 = arith.constant 0 : index
    %392 = vector.load %arg6[%c0_212, %c0_213] : memref<2x32xf32, #tpu.memory_space<vmem>>, vector<2x32xf32>
    %c0_214 = arith.constant 0 : index
    %c0_215 = arith.constant 0 : index
    %393 = vector.load %arg7[%c0_214, %c0_215] : memref<2x32xf32, #tpu.memory_space<vmem>>, vector<2x32xf32>
    %394 = arith.index_cast %391 : i32 to index
    %c0_216 = arith.constant 0 : index
    %c0_217 = arith.constant 0 : index
    %395 = vector.load %arg2[%394, %c0_216, %c0_217] : memref<8x2x128xf32, #tpu.memory_space<vmem>>, vector<1x2x128xf32>
    %396 = vector.shape_cast %395 : vector<1x2x128xf32> to vector<2x128xf32>
    %397 = arith.index_cast %arg0 : i32 to index
    %c0_218 = arith.constant 0 : index
    %c0_219 = arith.constant 0 : index
    %398 = vector.load %arg3[%397, %c0_218, %c0_219] : memref<2x32x128xf32, #tpu.memory_space<vmem>>, vector<1x32x128xf32>
    %399 = vector.shape_cast %398 : vector<1x32x128xf32> to vector<32x128xf32>
    %cst_220 = arith.constant dense<0.000000e+00> : vector<2x128xf32>
    %400 = tpu.matmul %392, %399, %cst_220 {dimension_numbers = #tpu.dot_dimension_numbers<[1], [0], [0], [1], [0, 0, 1, 1], [], []>} : vector<2x32xf32>, vector<32x128xf32>, vector<2x128xf32> -> vector<2x128xf32>
    %401 = arith.addf %396, %400 : vector<2x128xf32>
    %402 = vector.extract_strided_slice %401 {offsets = [0, 0], sizes = [2, 32], strides = [1, 1]} : vector<2x128xf32> to vector<2x32xf32>
    %cst_221 = arith.constant 5.000000e-01 : f32
    %403 = vector.broadcast %cst_221 : f32 to vector<2x32xf32>
    %404 = arith.mulf %403, %402 : vector<2x32xf32>
    %405 = math.tanh %404 : vector<2x32xf32>
    %cst_222 = arith.constant 5.000000e-01 : f32
    %406 = vector.broadcast %cst_222 : f32 to vector<2x32xf32>
    %407 = arith.mulf %406, %405 : vector<2x32xf32>
    %cst_223 = arith.constant 5.000000e-01 : f32
    %408 = vector.broadcast %cst_223 : f32 to vector<2x32xf32>
    %409 = arith.addf %407, %408 : vector<2x32xf32>
    %410 = vector.extract_strided_slice %401 {offsets = [0, 32], sizes = [2, 32], strides = [1, 1]} : vector<2x128xf32> to vector<2x32xf32>
    %cst_224 = arith.constant 5.000000e-01 : f32
    %411 = vector.broadcast %cst_224 : f32 to vector<2x32xf32>
    %412 = arith.mulf %411, %410 : vector<2x32xf32>
    %413 = math.tanh %412 : vector<2x32xf32>
    %cst_225 = arith.constant 5.000000e-01 : f32
    %414 = vector.broadcast %cst_225 : f32 to vector<2x32xf32>
    %415 = arith.mulf %414, %413 : vector<2x32xf32>
    %cst_226 = arith.constant 5.000000e-01 : f32
    %416 = vector.broadcast %cst_226 : f32 to vector<2x32xf32>
    %417 = arith.addf %415, %416 : vector<2x32xf32>
    %418 = vector.extract_strided_slice %401 {offsets = [0, 64], sizes = [2, 32], strides = [1, 1]} : vector<2x128xf32> to vector<2x32xf32>
    %419 = math.tanh %418 : vector<2x32xf32>
    %420 = vector.extract_strided_slice %401 {offsets = [0, 96], sizes = [2, 32], strides = [1, 1]} : vector<2x128xf32> to vector<2x32xf32>
    %cst_227 = arith.constant 5.000000e-01 : f32
    %421 = vector.broadcast %cst_227 : f32 to vector<2x32xf32>
    %422 = arith.mulf %421, %420 : vector<2x32xf32>
    %423 = math.tanh %422 : vector<2x32xf32>
    %cst_228 = arith.constant 5.000000e-01 : f32
    %424 = vector.broadcast %cst_228 : f32 to vector<2x32xf32>
    %425 = arith.mulf %424, %423 : vector<2x32xf32>
    %cst_229 = arith.constant 5.000000e-01 : f32
    %426 = vector.broadcast %cst_229 : f32 to vector<2x32xf32>
    %427 = arith.addf %425, %426 : vector<2x32xf32>
    %428 = arith.mulf %417, %393 : vector<2x32xf32>
    %429 = arith.mulf %409, %419 : vector<2x32xf32>
    %430 = arith.addf %428, %429 : vector<2x32xf32>
    %431 = math.tanh %430 : vector<2x32xf32>
    %432 = arith.mulf %427, %431 : vector<2x32xf32>
    %c0_230 = arith.constant 0 : index
    %c0_231 = arith.constant 0 : index
    %433 = vector.load %arg6[%c0_230, %c0_231] : memref<2x32xf32, #tpu.memory_space<vmem>>, vector<2x32xf32>
    tpu.vector_store %arg6[%c0_230, %c0_231], %432 {strides = array<i32>} : memref<2x32xf32, #tpu.memory_space<vmem>>, vector<2x32xf32>,
    %c0_232 = arith.constant 0 : index
    %c0_233 = arith.constant 0 : index
    %434 = vector.load %arg7[%c0_232, %c0_233] : memref<2x32xf32, #tpu.memory_space<vmem>>, vector<2x32xf32>
    tpu.vector_store %arg7[%c0_232, %c0_233], %430 {strides = array<i32>} : memref<2x32xf32, #tpu.memory_space<vmem>>, vector<2x32xf32>,
    %435 = arith.index_cast %arg0 : i32 to index
    %c0_234 = arith.constant 0 : index
    %c0_235 = arith.constant 0 : index
    %436 = vector.load %arg4[%435, %c0_234, %c0_235] : memref<2x32x128xf32, #tpu.memory_space<vmem>>, vector<1x32x128xf32>
    %437 = vector.shape_cast %436 : vector<1x32x128xf32> to vector<32x128xf32>
    %cst_236 = arith.constant dense<0.000000e+00> : vector<2x128xf32>
    %438 = tpu.matmul %432, %437, %cst_236 {dimension_numbers = #tpu.dot_dimension_numbers<[1], [0], [0], [1], [0, 0, 1, 1], [], []>} : vector<2x32xf32>, vector<32x128xf32>, vector<2x128xf32> -> vector<2x128xf32>
    %c0_237 = arith.constant 0 : index
    %439 = arith.index_cast %391 : i32 to index
    %c0_238 = arith.constant 0 : index
    %c0_239 = arith.constant 0 : index
    %440 = vector.load %arg5[%c0_237, %439, %c0_238, %c0_239] : memref<1x8x2x128xf32, #tpu.memory_space<vmem>>, vector<1x1x2x128xf32>
    %441 = vector.shape_cast %440 : vector<1x1x2x128xf32> to vector<2x128xf32>
    %442 = vector.shape_cast %438 : vector<2x128xf32> to vector<1x1x2x128xf32>
    tpu.vector_store %arg5[%c0_237, %439, %c0_238, %c0_239], %442 {strides = array<i32>} : memref<1x8x2x128xf32, #tpu.memory_space<vmem>>, vector<1x1x2x128xf32>,
    %c8_i32 = arith.constant 8 : i32
    return
  }
  func.func @transform_0(%arg0: i32, %arg1: i32) -> (i32, i32, i32) {
    %c2_i32 = arith.constant 2 : i32
    %0 = arith.muli %c2_i32, %arg1 : i32
    %c0_i32 = arith.constant 0 : i32
    %1 = arith.subi %c0_i32, %0 : i32
    %2 = arith.muli %arg0, %1 : i32
    %3 = arith.addi %arg1, %2 : i32
    %c0_i32_0 = arith.constant 0 : i32
    %c0_i32_1 = arith.constant 0 : i32
    return %3, %c0_i32_0, %arg0 : i32, i32, i32
  }
  func.func @transform_1(%arg0: i32, %arg1: i32) -> (i32, i32, i32) {
    %c0_i32 = arith.constant 0 : i32
    %c0_i32_0 = arith.constant 0 : i32
    %c0_i32_1 = arith.constant 0 : i32
    %c0_i32_2 = arith.constant 0 : i32
    return %c0_i32, %c0_i32_0, %c0_i32_1 : i32, i32, i32
  }
  func.func @transform_2(%arg0: i32, %arg1: i32) -> (i32, i32, i32) {
    %c0_i32 = arith.constant 0 : i32
    %c0_i32_0 = arith.constant 0 : i32
    %c0_i32_1 = arith.constant 0 : i32
    %c0_i32_2 = arith.constant 0 : i32
    return %c0_i32, %c0_i32_0, %c0_i32_1 : i32, i32, i32
  }
  func.func @transform_3(%arg0: i32, %arg1: i32) -> (i32, i32, i32, i32) {
    %c2_i32 = arith.constant 2 : i32
    %0 = arith.muli %c2_i32, %arg1 : i32
    %c0_i32 = arith.constant 0 : i32
    %1 = arith.subi %c0_i32, %0 : i32
    %2 = arith.muli %arg0, %1 : i32
    %3 = arith.addi %arg1, %2 : i32
    %c0_i32_0 = arith.constant 0 : i32
    %c0_i32_1 = arith.constant 0 : i32
    %c0_i32_2 = arith.constant 0 : i32
    return %arg0, %3, %c0_i32_0, %c0_i32_1 : i32, i32, i32, i32
  }
}

</mosaic_0001>

<bundles_post_ra>
// kernel: lstm_model_forward.4
= control target key start
LH: loop header
LB: loop body
LE: loop exit
PB: predicated region body
PF: predicated region fallthrough
CT: control target
= control target key end

     0   :  { %v131_v3 = vmov 0.0   ;;  %vm32_vm0 = vcmask 130048   ;;  %v22_v7 = vlaneseq  ;;  %s185_s1 = inlined_call_operand.vmem [shape: f32[16,256], index: 1, kind: input, shape index: {}]   ;;  %s186_s0 = inlined_call_operand.vmem [shape: f32[16,16], index: 0, kind: input, shape index: {}]   ;;  %s187_s2 = inlined_call_operand.vmem [shape: f32[1,256], index: 2, kind: input, shape index: {}]   ;;  %s188_s3 = inlined_call_operand.vmem [shape: f32[16,256], index: 3, kind: output, shape index: {}]  }
   0x1   :  { %v19_v0 = vld [vmem:[%s185_s1 + $0x18] sm:$0xff]  ;;  %v18_v1 = vld [vmem:[%s185_s1 + $0x10] sm:$0xff]  ;;  %v17_v2 = vld [vmem:[%s185_s1 + $0x8] sm:$0xff]  ;;  %103 = vmatprep.mubr.f32.mxu0 %v131_v3  ;;  %109 = vmatprep.mubr.f32.mxu1 %v131_v3 }
   0x2   :  { %67 = vmatprep.subr.mxu0 %v19_v0  ;;  %126 = vmatprep.subr.mxu1 %v19_v0  ;;  %v16_v4 = vld [vmem:[%s185_s1] sm:$0xff]  ;;  %v15_v6 = vld [vmem:[%s186_s0 + $0x8] sm:$0xff]  ;;  %v23_v8 = vshrl.u32 %v22_v7, 7 }
   0x3   :  { %68 = vmatpush1.msra.mxu0 %v18_v1  ;;  %128 = vmatpush1.msra.mxu1 %v18_v1  ;;  %v14_v5 = vld [vmem:[%s186_s0] sm:$0xff] }
   0x4   :  { %69 = vmatprep.subr.mxu0 %v17_v2  ;;  %127 = vmatprep.subr.mxu1 %v17_v2  ;;  %v24_v9 = vsub.s32 0, %v23_v8  ;;  %v20_v10 = vld [vmem:[%s187_s2] sm:$0x3]  ;;  %v28_v11 = vsub.s32 1, %v23_v8 }
   0x5   :  { %70 = vmatpush1.msra.mxu0 %v16_v4  ;;  %129 = vmatpush1.msra.mxu1 %v16_v4 }
   0x6   :  { %124 = vmatmul.mubr.msk.f32.vlgmr.msra.gmra.mxu0 %vm32_vm0, %v14_v5  ;;  %125 = vmatmul.mubr.msk.f32.vlgmr.msra.gmra.mxu1 %vm32_vm0, %v15_v6  ;;  %v25_v12 = vrot.slane %v20_v10, %v24_v9  ;;  %v29_v13 = vrot.slane %v20_v10, %v28_v11 }
  0xc6   :  { %v105_v14 = vpop.f32.mrf.mxu0  ;;  %v111_v15 = vpop.f32.mrf.mxu1 }
  0xc7   :  { %v106_v16 = vadd.f32 %v105_v14, %v25_v12  ;;  %v112_v17 = vadd.f32 %v111_v15, %v25_v12 }
  0xc8   :  { %v107_v18 = vpop.f32.mrf.mxu0  ;;  %v113_v19 = vpop.f32.mrf.mxu1 }
  0xc9   :  { %116 = vst [vmem:[%s188_s3] sm:$0xff] %v106_v16  ;;  %118 = vst [vmem:[%s188_s3 + $0x10] sm:$0xff] %v112_v17  ;;  %v108_v20 = vadd.f32 %v107_v18, %v29_v13  ;;  %v114_v21 = vadd.f32 %v113_v19, %v29_v13 }
  0xcb   :  { %117 = vst [vmem:[%s188_s3 + $0x8] sm:$0xff] %v108_v20  ;;  %119 = vst [vmem:[%s188_s3 + $0x18] sm:$0xff] %v114_v21 }

// kernel: lstm_model_forward.6
= control target key start
LH: loop header
LB: loop body
LE: loop exit
PB: predicated region body
PF: predicated region fallthrough
CT: control target
= control target key end

     0   :  { %v236_v3 = vmov 0.0   ;;  %vm40_vm0 = vcmask 261120   ;;  %v209_v21 = vlaneseq  ;;  %s342_s3 = inlined_call_operand.vmem [shape: f32[32,256], index: 3, kind: input, shape index: {}]   ;;  %s343_s2 = inlined_call_operand.vmem [shape: f32[32,256], index: 2, kind: input, shape index: {}]   ;;  %s344_s1 = inlined_call_operand.vmem [shape: f32[16,32], index: 1, kind: input, shape index: {}]   ;;  %s345_s0 = inlined_call_operand.vmem [shape: f32[16,32], index: 0, kind: input, shape index: {}]   ;;  %s346_s4 = inlined_call_operand.vmem [shape: f32[1,256], index: 4, kind: input, shape index: {}]   ;;  %s347_s5 = inlined_call_operand.vmem [shape: f32[16,256], index: 5, kind: output, shape index: {}]  }
   0x1   :  { %v39_v0 = vld [vmem:[%s342_s3 + $0x38] sm:$0xff]  ;;  %v38_v2 = vld [vmem:[%s342_s3 + $0x30] sm:$0xff]  ;;  %111 = vmatprep.mubr.f32.mxu0 %v236_v3  ;;  %194 = vmatprep.mubr.f32.mxu1 %v236_v3  ;;  %v37_v5 = vld [vmem:[%s342_s3 + $0x28] sm:$0xff] }
   0x2   :  { %v29_v1 = vld [vmem:[%s343_s2 + $0x38] sm:$0xff]  ;;  %71 = vmatprep.subr.mxu0 %v39_v0  ;;  %v28_v4 = vld [vmem:[%s343_s2 + $0x30] sm:$0xff]  ;;  %v27_v6 = vld [vmem:[%s343_s2 + $0x28] sm:$0xff]  ;;  %v210_v22 = vshrl.u32 %v209_v21, 7 }
   0x3   :  { %154 = vmatprep.subr.mxu1 %v29_v1  ;;  %72 = vmatpush1.msra.mxu0 %v38_v2  ;;  %v36_v7 = vld [vmem:[%s342_s3 + $0x20] sm:$0xff]  ;;  %v35_v9 = vld [vmem:[%s342_s3 + $0x18] sm:$0xff]  ;;  %v34_v11 = vld [vmem:[%s342_s3 + $0x10] sm:$0xff] }
   0x4   :  { %155 = vmatpush1.msra.mxu1 %v28_v4  ;;  %v26_v8 = vld [vmem:[%s343_s2 + $0x20] sm:$0xff]  ;;  %73 = vmatprep.subr.mxu0 %v37_v5  ;;  %v25_v10 = vld [vmem:[%s343_s2 + $0x18] sm:$0xff]  ;;  %v24_v12 = vld [vmem:[%s343_s2 + $0x10] sm:$0xff]  ;;  %v211_v23 = vsub.s32 0, %v210_v22  ;;  %v215_v25 = vsub.s32 1, %v210_v22 }
   0x5   :  { %156 = vmatprep.subr.mxu1 %v27_v6  ;;  %74 = vmatpush1.msra.mxu0 %v36_v7  ;;  %v33_v13 = vld [vmem:[%s342_s3 + $0x8] sm:$0xff]  ;;  %v32_v15 = vld [vmem:[%s342_s3] sm:$0xff] }
   0x6   :  { %157 = vmatpush1.msra.mxu1 %v26_v8  ;;  %v23_v14 = vld [vmem:[%s343_s2 + $0x8] sm:$0xff]  ;;  %75 = vmatprep.subr.mxu0 %v35_v9  ;;  %v22_v16 = vld [vmem:[%s343_s2] sm:$0xff] }
   0x7   :  { %158 = vmatprep.subr.mxu1 %v25_v10  ;;  %76 = vmatpush1.msra.mxu0 %v34_v11  ;;  %v30_v17 = vld [vmem:[%s344_s1] sm:$0xff]  ;;  %v31_v19 = vld [vmem:[%s344_s1 + $0x8] sm:$0xff] }
   0x8   :  { %159 = vmatpush1.msra.mxu1 %v24_v12  ;;  %v20_v18 = vld [vmem:[%s345_s0] sm:$0xff]  ;;  %77 = vmatprep.subr.mxu0 %v33_v13  ;;  %v21_v20 = vld [vmem:[%s345_s0 + $0x8] sm:$0xff] }
   0x9   :  { %160 = vmatprep.subr.mxu1 %v23_v14  ;;  %78 = vmatpush1.msra.mxu0 %v32_v15  ;;  %v207_v24 = vld [vmem:[%s346_s4] sm:$0x3] }
   0xa   :  { %161 = vmatpush1.msra.mxu1 %v22_v16  ;;  %231 = vmatmul.mubr.msk.f32.vlgmr.msra.gmra.mxu0 %vm40_vm0, %v30_v17  ;;  %v212_v26 = vrot.slane %v207_v24, %v211_v23  ;;  %v216_v30 = vrot.slane %v207_v24, %v215_v25 }
   0xb   :  { %233 = vmatmul.mubr.msk.f32.vlgmr.msra.gmra.mxu1 %vm40_vm0, %v20_v18  ;;  %117 = vmatprep.mubr.f32.mxu0 %v236_v3 }
   0xc   :  { %200 = vmatprep.mubr.f32.mxu1 %v236_v3 }
   0xe   :  { %232 = vmatmul.mubr.msk.f32.gmra.mxu0 %vm40_vm0, %v31_v19 }
   0xf   :  { %234 = vmatmul.mubr.msk.f32.gmra.mxu1 %vm40_vm0, %v21_v20 }
  0xca   :  { %v113_v27 = vpop.f32.mrf.mxu0 }
  0xcb   :  { %v196_v28 = vpop.f32.mrf.mxu1 }
  0xcc   :  { %v197_v29 = vadd.f32 %v196_v28, %v113_v27  ;;  %v115_v31 = vpop.f32.mrf.mxu0 }
  0xcd   :  { %v198_v32 = vpop.f32.mrf.mxu1 }
  0xce   :  { %v219_v33 = vadd.f32 %v212_v26, %v197_v29  ;;  %v199_v34 = vadd.f32 %v198_v32, %v115_v31  ;;  %v119_v35 = vpop.f32.mrf.mxu0 }
  0xcf   :  { %v202_v36 = vpop.f32.mrf.mxu1 }
  0xd0   :  { %223 = vst [vmem:[%s347_s5] sm:$0xff] %v219_v33  ;;  %v220_v37 = vadd.f32 %v216_v30, %v199_v34  ;;  %v203_v38 = vadd.f32 %v202_v36, %v119_v35  ;;  %v121_v39 = vpop.f32.mrf.mxu0 }
  0xd1   :  { %v204_v40 = vpop.f32.mrf.mxu1 }
  0xd2   :  { %224 = vst [vmem:[%s347_s5 + $0x8] sm:$0xff] %v220_v37  ;;  %v221_v41 = vadd.f32 %v212_v26, %v203_v38  ;;  %v205_v42 = vadd.f32 %v204_v40, %v121_v39 }
  0xd4   :  { %225 = vst [vmem:[%s347_s5 + $0x10] sm:$0xff] %v221_v41  ;;  %v222_v43 = vadd.f32 %v216_v30, %v205_v42 }
  0xd6   :  { %226 = vst [vmem:[%s347_s5 + $0x18] sm:$0xff] %v222_v43 }

// kernel: lstm_model_forward.5
= control target key start
LH: loop header
LB: loop body
LE: loop exit
PB: predicated region body
PF: predicated region fallthrough
CT: control target
= control target key end

     0   :  { %s1759_s9 = smov 0   ;;  %s1761_s10 = smov 0   ;;  %s2061_s0 = inlined_call_operand.vmem [shape: f32[8,2,256], index: 0, kind: input, shape index: {}]   ;;  %s2062_s1 = inlined_call_operand.vmem [shape: f32[2,32,128], index: 1, kind: input, shape index: {}]   ;;  %s2063_s2 = inlined_call_operand.vmem [shape: f32[2,8,2,32], index: 2, kind: output, shape index: {}]  }
   0x1   :  { %s1763_s11 = smov 0   ;;  %s1765_s12 = smov 0  }
   0x2   :  { %s1767_s13 = smov 0  }
   0x3 LB: > { %s24_s14 = sadd.s32 1, %s1733_s12  ;;  %p48_p1 = scmp.ne.s32.totalorder %s1725_s10, %s1721_s9  ;;  %s1737_s13 = sphi %s1767_s13, %s12_s13   ;;  %s1733_s12 = sphi %s1765_s12, %s2067_s12   ;;  %s1729_s11 = sphi %s1763_s11, %s2066_s11   ;;  %s1725_s10 = sphi %s1761_s10, %s2065_s10   ;;  %s1721_s9 = sphi %s1759_s9, %s2064_s9  }
   0x4   : > { %p26_p0 = scmp.ge.s32.totalorder %s24_s14, 2  ;;  %p49_p2 = scmp.eq.s32.totalorder %s1737_s13, 0 }
   0x5   : > { %s41_s16 = sadd.s32 1, %s1725_s10  ;;  %p1433_p5 = scmp.ge.s32.totalorder %s1737_s13, 2 }
   0x6   : > { %s2069_s14 = smov (%p26_p0, %s24_s14), 0  ;;  %p50_p3 = por %p49_p2, %p48_p1 }
   0x7   : > { %s37_s15 = ssub.s32 %s1733_s12, %s2069_s14  ;;  %134 = sbr.rel (%p1433_p5) target bundleno = 21 (0x15), region = 20 }
   0x8   : > { %p39_p4 = scmp.eq.s32.totalorder %s37_s15, 0 }
   0xa   : > { %s1794_s17 = scalar_select %p39_p4, %s1725_s10, %s41_s16  }
   0xc   : > { %137 = sbr.rel (!%p50_p3) target bundleno = 21 (0x15), region = 24  ;;  %s139_s18 = sand.u32 (%p50_p3), 1, %s1725_s10  }
   0xd   : > { %s1435_s19 = sshll.u32 (%p50_p3), %s1733_s12, 1  ;;  %s1434_s20 = sshll.u32 (%p50_p3), %s139_s18, 4 }
   0xe   : > { %s150_s23 = scalar_lea.vmem (%p50_p3), %s2061_s0, %s1435_s19  ;;  %s141_s24 = scalar_lea.vmem (%p50_p3), [#allocation4], %s1434_s20 }
   0xf   : > { %v167_v0 = vld [vmem:[%s150_s23] sm:$0x3] (%p50_p3)  ;;  %v169_v1 = vld [vmem:[%s150_s23 + $0x4] sm:$0x3] (%p50_p3)  ;;  %v171_v2 = vld [vmem:[%s150_s23 + $0x8] sm:$0x3] (%p50_p3) }
  0x10   : > { %168 = vst [vmem:[%s141_s24] sm:$0x3] (%p50_p3), %v167_v0  ;;  %170 = vst [vmem:[%s141_s24 + $0x2] sm:$0x3] (%p50_p3), %v169_v1  ;;  %v173_v3 = vld [vmem:[%s150_s23 + $0xc] sm:$0x3] (%p50_p3) }
  0x11   : > { %v175_v4 = vld [vmem:[%s150_s23 + $0x10] sm:$0x3]  ;;  %172 = vst [vmem:[%s141_s24 + $0x4] sm:$0x3] %v171_v2  ;;  %174 = vst [vmem:[%s141_s24 + $0x6] sm:$0x3] %v173_v3 }
  0x12   : > { %176 = vst [vmem:[%s141_s24 + $0x8] sm:$0x3] %v175_v4  ;;  %v177_v5 = vld [vmem:[%s150_s23 + $0x14] sm:$0x3]  ;;  %v179_v6 = vld [vmem:[%s150_s23 + $0x18] sm:$0x3] }
  0x13   : > { %v181_v7 = vld [vmem:[%s150_s23 + $0x1c] sm:$0x3]  ;;  %178 = vst [vmem:[%s141_s24 + $0xa] sm:$0x3] %v177_v5  ;;  %180 = vst [vmem:[%s141_s24 + $0xc] sm:$0x3] %v179_v6 }
  0x14   : > { %182 = vst [vmem:[%s141_s24 + $0xe] sm:$0x3] %v181_v7 }
  0x15 PF: > { %p1436_p6 = scmp.ge.s32.totalorder %s1737_s13, 1  ;;  %p221_p7 = scmp.lt.s32.totalorder %s1737_s13, 3 }
  0x17   : > { %p222_p8 = pnand %p1436_p6, %p221_p7 }
  0x18   : > { %s1441_s25 = sshll.u32 (!%p222_p8), %s1729_s11, 5  ;;  %s228_s29 = sand.u32 (!%p222_p8), 1, %s1721_s9  }
  0x19   : > { %225 = sbr.rel (%p222_p8) target bundleno = 5609 (0x15e9), region = 65  ;;  %s294_s28 = scalar_lea.vmem (!%p222_p8), %s2062_s1, %s1441_s25 }
  0x1a   : > { %s1437_s30 = sshll.u32 (!%p222_p8), %s228_s29, 4  ;;  %s1440_s3 = smul.u32 (!%p222_p8), 14, %s1729_s11 }
  0x1b   : > { %s1855_s4 = scalar_lea.vmem (!%p222_p8), [#allocation4], %s1437_s30  ;;  %s1741_s6 = smov (!%p222_p8), 64  }
  0x1c   : > { %s291_s5 = scalar_lea.vmem (!%p222_p8), %s1855_s4, %s1440_s3 [#allocation4]  ;;  %s1742_s7 = smov (!%p222_p8), 32  }
  0x1d   : > { %s1743_s8 = smov (!%p222_p8), 96   ;;  %p267_p9 = scmp.lt.s32.totalorder (!%p222_p8), %s1729_s11, 1 }
  0x1e   : > { %vm284_vm0 = vcmask 254976   ;;  %v1739_v8 = vmov 0.0   ;;  %vm1740_vm1 = vmmov 0   ;;  %v1815_v9 = vld [vmem:[%s294_s28 + $0x18] sm:$0xff]  ;;  %v1817_v10 = vld [vmem:[%s294_s28 + $0x10] sm:$0xff]  ;;  %v1825_v11 = vld [vmem:[%s294_s28 + $0x8] sm:$0xff] }
  0x1f   : > { %1518 = vmatprep.subr.mxu0 %v1739_v8  ;;  %1526 = vmatprep.mubr.msk.f32.mxu0 %vm1740_vm1, %v1739_v8  ;;  %285 = vst.msk [vmem:[#allocation2] sm:$0x3] %vm284_vm0, %v1739_v8  ;;  %286 = vst.msk [vmem:[#allocation3] sm:$0x3] %vm284_vm0, %v1739_v8  ;;  %v1831_v12 = vld [vmem:[%s294_s28] sm:$0xff]  ;;  %vm299_vm2 = vcmask 261120  }
  0x20   : > { %1529 = vmatprep.subr.mxu1 %v1739_v8  ;;  %1537 = vmatprep.mubr.msk.f32.mxu1 %vm1740_vm1, %v1739_v8  ;;  %v292_v14 = vld [vmem:[%s291_s5] sm:$0x3]  ;;  %s268_s9 = scalar_select %p267_p9, %s1729_s11, 1 }
  0x21   : > { %1519 = vmatpush3.msra.mxu0 %v1815_v9  ;;  %1530 = vmatpush3.msra.mxu1 %v1815_v9  ;;  %s1443_s21 = smul.u32 10, %s1729_s11  ;;  %s1453_s27 = sshll.u32 %s1729_s11, 1 }
  0x22   : > { %1520 = vmatprep.subr.mxu0 %v1739_v8  ;;  %1531 = vmatprep.subr.mxu1 %v1739_v8  ;;  %s1477_s15 = sshll.u32 %s268_s9, 4  ;;  %s1448_s24 = smul.u32 6, %s1729_s11 }
  0x23   : > { %1521 = vmatpush3.msra.mxu0 %v1817_v10  ;;  %1532 = vmatpush3.msra.mxu1 %v1817_v10  ;;  %s1873_s19 = scalar_lea.vmem %s2063_s2, %s1477_s15  ;;  %s1341_s22 = scalar_lea.vmem %s1855_s4, %s1443_s21 [#allocation4] }
  0x24   : > { %1522 = vmatprep.subr.mxu0 %v1739_v8  ;;  %1533 = vmatprep.subr.mxu1 %v1739_v8  ;;  %s411_s20 = scalar_lea.vmem %s1873_s19, %s1440_s3  ;;  %v1444_v37 = vld [vmem:[%s1341_s22 + $0x2] sm:$0x3]  ;;  %s1345_s23 = scalar_lea.vmem %s1873_s19, %s1443_s21 }
  0x25   : > { %1523 = vmatpush3.msra.mxu0 %v1825_v11  ;;  %1534 = vmatpush3.msra.mxu1 %v1825_v11  ;;  %s1349_s25 = scalar_lea.vmem %s1855_s4, %s1448_s24 [#allocation4]  ;;  %s1353_s26 = scalar_lea.vmem %s1873_s19, %s1448_s24 }
  0x26   : > { %1524 = vmatprep.subr.mxu0 %v1739_v8  ;;  %v288_v13 = vld [vmem:[#allocation2] sm:$0x3]  ;;  %1535 = vmatprep.subr.mxu1 %v1739_v8  ;;  %v289_v19 = vld [vmem:[#allocation3] sm:$0x3]  ;;  %v1449_v59 = vld [vmem:[%s1349_s25 + $0x4] sm:$0x3]  ;;  %s1356_s28 = scalar_lea.vmem %s1855_s4, %s1453_s27 [#allocation4]  ;;  %s1359_s29 = scalar_lea.vmem %s1873_s19, %s1453_s27 }
  0x27   : > { %1525 = vmatpush3.msra.mxu0 %v1831_v12  ;;  %1536 = vmatpush3.msra.mxu1 %v1831_v12  ;;  %s781_s30 = ssub.s32 4, %s1729_s11  ;;  %s1460_s15 = smul.u32 4294967290, %s1729_s11 }
  0x28   : > { %1527 = vmatmul.mubr.msk.f32.vlgmr.msra.gmra.mxu0 %vm299_vm2, %v288_v13  ;;  %1540 = vmatprep.subr.mxu0 %v1739_v8  ;;  %s1972_s3 = sshll.u32 %s781_s30, 1 }
  0x29   : > { %1541 = vmatpush3.msra.mxu0 %v1815_v9  ;;  %1548 = vmatprep.mubr.msk.f32.mxu0 %vm1740_vm1, %v1739_v8  ;;  %s785_s5 = scalar_lea.vmem %s1855_s4, %s1972_s3 [#allocation4]  ;;  %s901_s9 = scalar_lea.vmem %s1873_s19, %s1972_s3 }
  0x2a   : > { %1542 = vmatprep.subr.mxu0 %v1739_v8  ;;  %1551 = vmatprep.subr.mxu1 %v1739_v8  ;;  %s1367_s16 = scalar_lea.vmem %s1855_s4, %s1460_s15 [#allocation4]  ;;  %s1371_s18 = scalar_lea.vmem %s1873_s19, %s1460_s15 }
  0x2b   : > { %1543 = vmatpush3.msra.mxu0 %v1817_v10 }
  0x2c   : > { %1544 = vmatprep.subr.mxu0 %v1739_v8 }
  0x2d   : > { %1545 = vmatpush3.msra.mxu0 %v1825_v11 }
  0x2e   : > { %1546 = vmatprep.subr.mxu0 %v1739_v8 }
  0x2f   : > { %1547 = vmatpush3.msra.mxu0 %v1831_v12 }
  0x30   : > { %1562 = vmatprep.subr.mxu0 %v1739_v8 }
  0xe8   : > { %v369_v15 = vpop.f32.mrf.mxu0 }
  0xe9   : > { %v373_v16 = vadd.f32 %v369_v15, %v292_v14 }
  0xea   : > { %v1528_v17 = vpop.f32.mrf.mxu0 }
  0xeb   : > { %1651 = vtanh.f32 %v373_v16  ;;  %v374_v20 = vmul.f32 0.5, %v373_v16 }
  0xed   : > { %1653 = vtanh.f32 %v374_v20 }
  0xf8   : > { %v1652_v18 = vpop.eup %1651 }
  0xf9   : > { %385 = vrot.lane.b32.xlu0 %v1652_v18, %s1741_s6 }
  0xfa   : > { %v1654_v21 = vpop.eup %1653 }
  0xfb   : > { %v376_v22 = vmul.f32 0.5, %v1654_v21 }
  0xfd   : > { %380 = vrot.lane.b32.xlu0 %v289_v19, %s1742_s7  ;;  %v377_v23 = vadd.f32 0.5, %v376_v22  ;;  %v1454_v22 = vld [vmem:[%s1356_s28 + $0x6] sm:$0x3] }
 0x16b   : > { %v386_v24 = vpop.permute.xlu0 %385 }
 0x16c   : > { %v388_v25 = vmul.f32 %v386_v24, %v377_v23 }
 0x16e   : > { %390 = vrot.lane.b32.xlu1 %v388_v25, %s1742_s7 }
 0x16f   : > { %v381_v26 = vpop.permute.xlu0 %380 }
 0x170   : > { %v383_v27 = vmul.f32 %v381_v26, %v377_v23 }
 0x1e0   : > { %v391_v28 = vpop.permute.xlu1 %390 }
 0x1e1   : > { %v393_v29 = vadd.f32 %v391_v28, %v383_v27 }
 0x1e3   : > { %1655 = vtanh.f32 %v393_v29 }
 0x1f0   : > { %v1656_v30 = vpop.eup %1655 }
 0x1f1   : > { %396 = vrot.lane.b32.xlu1 %v1656_v30, %s1741_s6 }
 0x1f5   : > { %407 = vrot.lane.b32.xlu1 %v393_v29, %s1743_s8 }
 0x263   : > { %v397_v31 = vpop.permute.xlu1 %396 }
 0x264   : > { %v399_v32 = vmul.f32 %v397_v31, %v377_v23 }
 0x266   : > { %401 = vrot.lane.b32.xlu0 %v399_v32, %s1742_s7 }
 0x267   : > { %v408_v33 = vpop.permute.xlu1 %407 }
 0x268   : > { %410 = vst.msk [vmem:[#allocation3] sm:$0x3] %vm284_vm0, %v408_v33 }
 0x26f   : > { %v416_v34 = vld [vmem:[#allocation3] sm:$0x3] }
 0x270   : > { %504 = vrot.lane.b32.xlu1 %v416_v34, %s1742_s7 }
 0x2d8   : > { %v402_v35 = vpop.permute.xlu0 %401 }
 0x2d9   : > { %405 = vst.msk [vmem:[#allocation2] sm:$0x3] %vm284_vm0, %v402_v35  ;;  %412 = vst.msk [vmem:[%s411_s20] sm:$0x3] %vm284_vm0, %v402_v35  ;;  %s1465_s20 = smul.u32 4294967286, %s1729_s11 }
 0x2db   : > { %s1375_s21 = scalar_lea.vmem %s1855_s4, %s1465_s20 [#allocation4]  ;;  %s1379_s22 = scalar_lea.vmem %s1873_s19, %s1465_s20 }
 0x2e0   : > { %v415_v36 = vld [vmem:[#allocation2] sm:$0x3] }
 0x2e1   : > { %1538 = vmatmul.mubr.msk.f32.vlgmr.msra.gmra.mxu1 %vm299_vm2, %v415_v36 }
 0x2e2   : > { %1552 = vmatpush3.msra.mxu1 %v1815_v9  ;;  %1559 = vmatprep.mubr.msk.f32.mxu1 %vm1740_vm1, %v1739_v8  ;;  %v505_v48 = vpop.permute.xlu1 %504 }
 0x2e3   : > { %1553 = vmatprep.subr.mxu1 %v1739_v8 }
 0x2e4   : > { %1554 = vmatpush3.msra.mxu1 %v1817_v10 }
 0x2e5   : > { %1555 = vmatprep.subr.mxu1 %v1739_v8 }
 0x2e6   : > { %1556 = vmatpush3.msra.mxu1 %v1825_v11 }
 0x2e7   : > { %1557 = vmatprep.subr.mxu1 %v1739_v8 }
 0x2e8   : > { %1558 = vmatpush3.msra.mxu1 %v1831_v12 }
 0x2e9   : > { %1573 = vmatprep.subr.mxu1 %v1739_v8 }
 0x3a1   : > { %v493_v38 = vpop.f32.mrf.mxu1 }
 0x3a2   : > { %v497_v39 = vadd.f32 %v1444_v37, %v493_v38 }
 0x3a3   : > { %v1539_v40 = vpop.f32.mrf.mxu1 }
 0x3a4   : > { %1657 = vtanh.f32 %v497_v39  ;;  %v498_v42 = vmul.f32 0.5, %v497_v39 }
 0x3a6   : > { %1659 = vtanh.f32 %v498_v42 }
 0x3b1   : > { %v1658_v41 = vpop.eup %1657 }
 0x3b2   : > { %509 = vrot.lane.b32.xlu0 %v1658_v41, %s1741_s6 }
 0x3b3   : > { %v1660_v43 = vpop.eup %1659 }
 0x3b4   : > { %v500_v44 = vmul.f32 0.5, %v1660_v43 }
 0x3b6   : > { %v501_v45 = vadd.f32 0.5, %v500_v44  ;;  %v786_v44 = vld [vmem:[%s785_s5] sm:$0x3] }
 0x3b8   : > { %v507_v49 = vmul.f32 %v505_v48, %v501_v45 }
 0x424   : > { %v510_v46 = vpop.permute.xlu0 %509 }
 0x425   : > { %v512_v47 = vmul.f32 %v510_v46, %v501_v45 }
 0x427   : > { %514 = vrot.lane.b32.xlu0 %v512_v47, %s1742_s7 }
 0x499   : > { %v515_v50 = vpop.permute.xlu0 %514 }
 0x49a   : > { %v517_v51 = vadd.f32 %v515_v50, %v507_v49 }
 0x49c   : > { %1661 = vtanh.f32 %v517_v51 }
 0x4a9   : > { %v1662_v52 = vpop.eup %1661 }
 0x4aa   : > { %520 = vrot.lane.b32.xlu1 %v1662_v52, %s1741_s6 }
 0x4ae   : > { %530 = vrot.lane.b32.xlu1 %v517_v51, %s1743_s8 }
 0x51c   : > { %v521_v53 = vpop.permute.xlu1 %520 }
 0x51d   : > { %v523_v54 = vmul.f32 %v521_v53, %v501_v45 }
 0x51f   : > { %525 = vrot.lane.b32.xlu0 %v523_v54, %s1742_s7 }
 0x520   : > { %v531_v55 = vpop.permute.xlu1 %530 }
 0x521   : > { %533 = vst.msk [vmem:[#allocation3] sm:$0x3] %vm284_vm0, %v531_v55 }
 0x528   : > { %v539_v56 = vld [vmem:[#allocation3] sm:$0x3] }
 0x529   : > { %627 = vrot.lane.b32.xlu1 %v539_v56, %s1742_s7 }
 0x591   : > { %v526_v57 = vpop.permute.xlu0 %525 }
 0x592   : > { %528 = vst.msk [vmem:[#allocation2] sm:$0x3] %vm284_vm0, %v526_v57  ;;  %1447 = vst.msk [vmem:[%s1345_s23 + $0x2] sm:$0x3] %vm284_vm0, %v526_v57  ;;  %s1470_s23 = smul.u32 4294967282, %s1729_s11 }
 0x594   : > { %s1383_s24 = scalar_lea.vmem %s1855_s4, %s1470_s23 [#allocation4]  ;;  %s1387_s4 = scalar_lea.vmem %s1873_s19, %s1470_s23 }
 0x599   : > { %v538_v58 = vld [vmem:[#allocation2] sm:$0x3] }
 0x59a   : > { %1549 = vmatmul.mubr.msk.f32.vlgmr.msra.gmra.mxu0 %vm299_vm2, %v538_v58 }
 0x59b   : > { %1563 = vmatpush3.msra.mxu0 %v1815_v9  ;;  %1570 = vmatprep.mubr.msk.f32.mxu0 %vm1740_vm1, %v1739_v8  ;;  %v628_v6 = vpop.permute.xlu1 %627 }
 0x59c   : > { %1564 = vmatprep.subr.mxu0 %v1739_v8 }
 0x59d   : > { %1565 = vmatpush3.msra.mxu0 %v1817_v10 }
 0x59e   : > { %1566 = vmatprep.subr.mxu0 %v1739_v8 }
 0x59f   : > { %1567 = vmatpush3.msra.mxu0 %v1825_v11 }
 0x5a0   : > { %1568 = vmatprep.subr.mxu0 %v1739_v8 }
 0x5a1   : > { %1569 = vmatpush3.msra.mxu0 %v1831_v12 }
 0x5a2   : > { %1584 = vmatprep.subr.mxu0 %v1739_v8 }
 0x65a   : > { %v616_v60 = vpop.f32.mrf.mxu0 }
 0x65b   : > { %v620_v61 = vadd.f32 %v1449_v59, %v616_v60 }
 0x65c   : > { %v1550_v62 = vpop.f32.mrf.mxu0 }
 0x65d   : > { %1663 = vtanh.f32 %v620_v61  ;;  %v621_v0 = vmul.f32 0.5, %v620_v61 }
 0x65f   : > { %1665 = vtanh.f32 %v621_v0 }
 0x66a   : > { %v1664_v63 = vpop.eup %1663 }
 0x66b   : > { %632 = vrot.lane.b32.xlu0 %v1664_v63, %s1741_s6 }
 0x66c   : > { %v1666_v1 = vpop.eup %1665 }
 0x66d   : > { %v623_v2 = vmul.f32 0.5, %v1666_v1 }
 0x66f   : > { %v624_v3 = vadd.f32 0.5, %v623_v2  ;;  %v1461_v2 = vld [vmem:[%s1367_s16 + $0xa] sm:$0x3] }
 0x671   : > { %v630_v7 = vmul.f32 %v628_v6, %v624_v3 }
 0x6dd   : > { %v633_v4 = vpop.permute.xlu0 %632 }
 0x6de   : > { %v635_v5 = vmul.f32 %v633_v4, %v624_v3 }
 0x6e0   : > { %637 = vrot.lane.b32.xlu0 %v635_v5, %s1742_s7 }
 0x752   : > { %v638_v13 = vpop.permute.xlu0 %637 }
 0x753   : > { %v640_v14 = vadd.f32 %v638_v13, %v630_v7 }
 0x755   : > { %1667 = vtanh.f32 %v640_v14 }
 0x762   : > { %v1668_v15 = vpop.eup %1667 }
 0x763   : > { %643 = vrot.lane.b32.xlu1 %v1668_v15, %s1741_s6 }
 0x767   : > { %653 = vrot.lane.b32.xlu1 %v640_v14, %s1743_s8 }
 0x7d5   : > { %v644_v16 = vpop.permute.xlu1 %643 }
 0x7d6   : > { %v646_v17 = vmul.f32 %v644_v16, %v624_v3 }
 0x7d8   : > { %648 = vrot.lane.b32.xlu0 %v646_v17, %s1742_s7 }
 0x7d9   : > { %v654_v18 = vpop.permute.xlu1 %653 }
 0x7da   : > { %656 = vst.msk [vmem:[#allocation3] sm:$0x3] %vm284_vm0, %v654_v18 }
 0x7e1   : > { %v661_v19 = vld [vmem:[#allocation3] sm:$0x3] }
 0x7e2   : > { %749 = vrot.lane.b32.xlu1 %v661_v19, %s1742_s7 }
 0x84a   : > { %v649_v20 = vpop.permute.xlu0 %648 }
 0x84b   : > { %651 = vst.msk [vmem:[#allocation2] sm:$0x3] %vm284_vm0, %v649_v20  ;;  %1452 = vst.msk [vmem:[%s1353_s26 + $0x4] sm:$0x3] %vm284_vm0, %v649_v20 }
 0x852   : > { %v660_v21 = vld [vmem:[#allocation2] sm:$0x3] }
 0x853   : > { %1560 = vmatmul.mubr.msk.f32.vlgmr.msra.gmra.mxu1 %vm299_vm2, %v660_v21 }
 0x854   : > { %1574 = vmatpush3.msra.mxu1 %v1815_v9  ;;  %1581 = vmatprep.mubr.msk.f32.mxu1 %vm1740_vm1, %v1739_v8  ;;  %v750_v33 = vpop.permute.xlu1 %749 }
 0x855   : > { %1575 = vmatprep.subr.mxu1 %v1739_v8 }
 0x856   : > { %1576 = vmatpush3.msra.mxu1 %v1817_v10 }
 0x857   : > { %1577 = vmatprep.subr.mxu1 %v1739_v8 }
 0x858   : > { %1578 = vmatpush3.msra.mxu1 %v1825_v11 }
 0x859   : > { %1579 = vmatprep.subr.mxu1 %v1739_v8 }
 0x85a   : > { %1580 = vmatpush3.msra.mxu1 %v1831_v12 }
 0x85b   : > { %1595 = vmatprep.subr.mxu1 %v1739_v8 }
 0x913   : > { %v738_v23 = vpop.f32.mrf.mxu1 }
 0x914   : > { %v742_v24 = vadd.f32 %v1454_v22, %v738_v23 }
 0x915   : > { %v1561_v25 = vpop.f32.mrf.mxu1 }
 0x916   : > { %1669 = vtanh.f32 %v742_v24  ;;  %v743_v27 = vmul.f32 0.5, %v742_v24  ;;  %v1466_v24 = vld [vmem:[%s1375_s21 + $0xc] sm:$0x3] }
 0x918   : > { %1671 = vtanh.f32 %v743_v27 }
 0x923   : > { %v1670_v26 = vpop.eup %1669 }
 0x924   : > { %754 = vrot.lane.b32.xlu0 %v1670_v26, %s1741_s6 }
 0x925   : > { %v1672_v28 = vpop.eup %1671 }
 0x926   : > { %v745_v29 = vmul.f32 0.5, %v1672_v28 }
 0x928   : > { %v746_v30 = vadd.f32 0.5, %v745_v29 }
 0x92a   : > { %v752_v34 = vmul.f32 %v750_v33, %v746_v30 }
 0x996   : > { %v755_v31 = vpop.permute.xlu0 %754 }
 0x997   : > { %v757_v32 = vmul.f32 %v755_v31, %v746_v30 }
 0x999   : > { %759 = vrot.lane.b32.xlu0 %v757_v32, %s1742_s7 }
 0xa0b   : > { %v760_v35 = vpop.permute.xlu0 %759 }
 0xa0c   : > { %v762_v36 = vadd.f32 %v760_v35, %v752_v34 }
 0xa0e   : > { %1673 = vtanh.f32 %v762_v36 }
 0xa1b   : > { %v1674_v37 = vpop.eup %1673 }
 0xa1c   : > { %765 = vrot.lane.b32.xlu1 %v1674_v37, %s1741_s6 }
 0xa20   : > { %775 = vrot.lane.b32.xlu1 %v762_v36, %s1743_s8 }
 0xa8e   : > { %v766_v38 = vpop.permute.xlu1 %765 }
 0xa8f   : > { %v768_v39 = vmul.f32 %v766_v38, %v746_v30 }
 0xa91   : > { %770 = vrot.lane.b32.xlu0 %v768_v39, %s1742_s7 }
 0xa92   : > { %v776_v40 = vpop.permute.xlu1 %775 }
 0xa93   : > { %778 = vst.msk [vmem:[#allocation3] sm:$0x3] %vm284_vm0, %v776_v40 }
 0xa9a   : > { %v783_v41 = vld [vmem:[#allocation3] sm:$0x3] }
 0xa9b   : > { %871 = vrot.lane.b32.xlu1 %v783_v41, %s1742_s7 }
 0xb03   : > { %v771_v42 = vpop.permute.xlu0 %770 }
 0xb04   : > { %773 = vst.msk [vmem:[#allocation2] sm:$0x3] %vm284_vm0, %v771_v42  ;;  %1457 = vst.msk [vmem:[%s1359_s29 + $0x6] sm:$0x3] %vm284_vm0, %v771_v42 }
 0xb0b   : > { %v782_v43 = vld [vmem:[#allocation2] sm:$0x3] }
 0xb0c   : > { %1571 = vmatmul.mubr.msk.f32.vlgmr.msra.gmra.mxu0 %vm299_vm2, %v782_v43 }
 0xb0d   : > { %1585 = vmatpush3.msra.mxu0 %v1815_v9  ;;  %1592 = vmatprep.mubr.msk.f32.mxu0 %vm1740_vm1, %v1739_v8  ;;  %v872_v55 = vpop.permute.xlu1 %871 }
 0xb0e   : > { %1586 = vmatprep.subr.mxu0 %v1739_v8 }
 0xb0f   : > { %1587 = vmatpush3.msra.mxu0 %v1817_v10 }
 0xb10   : > { %1588 = vmatprep.subr.mxu0 %v1739_v8 }
 0xb11   : > { %1589 = vmatpush3.msra.mxu0 %v1825_v11 }
 0xb12   : > { %1590 = vmatprep.subr.mxu0 %v1739_v8 }
 0xb13   : > { %1591 = vmatpush3.msra.mxu0 %v1831_v12 }
 0xbcc   : > { %v860_v45 = vpop.f32.mrf.mxu0 }
 0xbcd   : > { %v864_v46 = vadd.f32 %v860_v45, %v786_v44 }
 0xbce   : > { %v1572_v47 = vpop.f32.mrf.mxu0 }
 0xbcf   : > { %1675 = vtanh.f32 %v864_v46  ;;  %v865_v49 = vmul.f32 0.5, %v864_v46  ;;  %v1471_v46 = vld [vmem:[%s1383_s24 + $0xe] sm:$0x3] }
 0xbd1   : > { %1677 = vtanh.f32 %v865_v49 }
 0xbdc   : > { %v1676_v48 = vpop.eup %1675 }
 0xbdd   : > { %876 = vrot.lane.b32.xlu0 %v1676_v48, %s1741_s6 }
 0xbde   : > { %v1678_v50 = vpop.eup %1677 }
 0xbdf   : > { %v867_v51 = vmul.f32 0.5, %v1678_v50 }
 0xbe1   : > { %v868_v52 = vadd.f32 0.5, %v867_v51 }
 0xbe3   : > { %v874_v56 = vmul.f32 %v872_v55, %v868_v52 }
 0xc4f   : > { %v877_v53 = vpop.permute.xlu0 %876 }
 0xc50   : > { %v879_v54 = vmul.f32 %v877_v53, %v868_v52 }
 0xc52   : > { %881 = vrot.lane.b32.xlu0 %v879_v54, %s1742_s7 }
 0xcc4   : > { %v882_v57 = vpop.permute.xlu0 %881 }
 0xcc5   : > { %v884_v58 = vadd.f32 %v882_v57, %v874_v56 }
 0xcc7   : > { %1679 = vtanh.f32 %v884_v58 }
 0xcd4   : > { %v1680_v59 = vpop.eup %1679 }
 0xcd5   : > { %887 = vrot.lane.b32.xlu1 %v1680_v59, %s1741_s6 }
 0xcd9   : > { %897 = vrot.lane.b32.xlu1 %v884_v58, %s1743_s8 }
 0xd47   : > { %v888_v60 = vpop.permute.xlu1 %887 }
 0xd48   : > { %v890_v61 = vmul.f32 %v888_v60, %v868_v52 }
 0xd4a   : > { %892 = vrot.lane.b32.xlu0 %v890_v61, %s1742_s7 }
 0xd4b   : > { %v898_v62 = vpop.permute.xlu1 %897 }
 0xd4c   : > { %900 = vst.msk [vmem:[#allocation3] sm:$0x3] %vm284_vm0, %v898_v62 }
 0xd53   : > { %v906_v63 = vld [vmem:[#allocation3] sm:$0x3] }
 0xd54   : > { %994 = vrot.lane.b32.xlu1 %v906_v63, %s1742_s7 }
 0xdbc   : > { %v893_v0 = vpop.permute.xlu0 %892 }
 0xdbd   : > { %895 = vst.msk [vmem:[#allocation2] sm:$0x3] %vm284_vm0, %v893_v0  ;;  %902 = vst.msk [vmem:[%s901_s9] sm:$0x3] %vm284_vm0, %v893_v0 }
 0xdc4   : > { %v905_v1 = vld [vmem:[#allocation2] sm:$0x3] }
 0xdc5   : > { %1582 = vmatmul.mubr.msk.f32.vlgmr.msra.gmra.mxu1 %vm299_vm2, %v905_v1 }
 0xdc6   : > { %1596 = vmatpush3.msra.mxu1 %v1815_v9  ;;  %1603 = vmatprep.mubr.msk.f32.mxu1 %vm1740_vm1, %v1739_v8 }
 0xdc7   : > { %1597 = vmatprep.subr.mxu1 %v1739_v8 }
 0xdc8   : > { %1598 = vmatpush3.msra.mxu1 %v1817_v10 }
 0xdc9   : > { %1599 = vmatprep.subr.mxu1 %v1739_v8 }
 0xdca   : > { %1600 = vmatpush3.msra.mxu1 %v1825_v11 }
 0xdcb   : > { %1601 = vmatprep.subr.mxu1 %v1739_v8 }
 0xdcc   : > { %1602 = vmatpush3.msra.mxu1 %v1831_v12  ;;  %v995_v12 = vpop.permute.xlu1 %994 }
 0xe85   : > { %v983_v9 = vpop.f32.mrf.mxu1 }
 0xe86   : > { %v987_v3 = vadd.f32 %v1461_v2, %v983_v9 }
 0xe87   : > { %v1583_v4 = vpop.f32.mrf.mxu1 }
 0xe88   : > { %1681 = vtanh.f32 %v987_v3  ;;  %v988_v10 = vmul.f32 0.5, %v987_v3 }
 0xe8a   : > { %1683 = vtanh.f32 %v988_v10 }
 0xe95   : > { %v1682_v5 = vpop.eup %1681 }
 0xe96   : > { %999 = vrot.lane.b32.xlu0 %v1682_v5, %s1741_s6 }
 0xe97   : > { %v1684_v6 = vpop.eup %1683 }
 0xe98   : > { %v990_v7 = vmul.f32 0.5, %v1684_v6 }
 0xe9a   : > { %v991_v11 = vadd.f32 0.5, %v990_v7 }
 0xe9c   : > { %v997_v14 = vmul.f32 %v995_v12, %v991_v11 }
 0xf08   : > { %v1000_v13 = vpop.permute.xlu0 %999 }
 0xf09   : > { %v1002_v8 = vmul.f32 %v1000_v13, %v991_v11 }
 0xf0b   : > { %1004 = vrot.lane.b32.xlu0 %v1002_v8, %s1742_s7 }
 0xf7d   : > { %v1005_v15 = vpop.permute.xlu0 %1004 }
 0xf7e   : > { %v1007_v16 = vadd.f32 %v1005_v15, %v997_v14 }
 0xf80   : > { %1685 = vtanh.f32 %v1007_v16 }
 0xf8d   : > { %v1686_v17 = vpop.eup %1685 }
 0xf8e   : > { %1010 = vrot.lane.b32.xlu1 %v1686_v17, %s1741_s6 }
 0xf92   : > { %1020 = vrot.lane.b32.xlu1 %v1007_v16, %s1743_s8 }
0x1000   : > { %v1011_v18 = vpop.permute.xlu1 %1010 }
0x1001   : > { %v1013_v19 = vmul.f32 %v1011_v18, %v991_v11 }
0x1003   : > { %1015 = vrot.lane.b32.xlu0 %v1013_v19, %s1742_s7 }
0x1004   : > { %v1021_v20 = vpop.permute.xlu1 %1020 }
0x1005   : > { %1023 = vst.msk [vmem:[#allocation3] sm:$0x3] %vm284_vm0, %v1021_v20 }
0x100c   : > { %v1029_v21 = vld [vmem:[#allocation3] sm:$0x3] }
0x100d   : > { %1117 = vrot.lane.b32.xlu1 %v1029_v21, %s1742_s7 }
0x1075   : > { %v1016_v22 = vpop.permute.xlu0 %1015 }
0x1076   : > { %1018 = vst.msk [vmem:[#allocation2] sm:$0x3] %vm284_vm0, %v1016_v22  ;;  %1464 = vst.msk [vmem:[%s1371_s18 + $0xa] sm:$0x3] %vm284_vm0, %v1016_v22 }
0x107d   : > { %v1028_v23 = vld [vmem:[#allocation2] sm:$0x3] }
0x107e   : > { %1593 = vmatmul.mubr.msk.f32.vlgmr.msra.gmra.mxu0 %vm299_vm2, %v1028_v23 }
0x107f   : > { %v1118_v35 = vpop.permute.xlu1 %1117 }
0x113e   : > { %v1106_v25 = vpop.f32.mrf.mxu0 }
0x113f   : > { %v1110_v26 = vadd.f32 %v1466_v24, %v1106_v25 }
0x1140   : > { %v1594_v27 = vpop.f32.mrf.mxu0 }
0x1141   : > { %1687 = vtanh.f32 %v1110_v26  ;;  %v1111_v29 = vmul.f32 0.5, %v1110_v26 }
0x1143   : > { %1689 = vtanh.f32 %v1111_v29 }
0x114e   : > { %v1688_v28 = vpop.eup %1687 }
0x114f   : > { %1122 = vrot.lane.b32.xlu0 %v1688_v28, %s1741_s6 }
0x1150   : > { %v1690_v30 = vpop.eup %1689 }
0x1151   : > { %v1113_v31 = vmul.f32 0.5, %v1690_v30 }
0x1153   : > { %v1114_v32 = vadd.f32 0.5, %v1113_v31 }
0x1155   : > { %v1120_v36 = vmul.f32 %v1118_v35, %v1114_v32 }
0x11c1   : > { %v1123_v33 = vpop.permute.xlu0 %1122 }
0x11c2   : > { %v1125_v34 = vmul.f32 %v1123_v33, %v1114_v32 }
0x11c4   : > { %1127 = vrot.lane.b32.xlu0 %v1125_v34, %s1742_s7 }
0x1236   : > { %v1128_v37 = vpop.permute.xlu0 %1127 }
0x1237   : > { %v1130_v38 = vadd.f32 %v1128_v37, %v1120_v36 }
0x1239   : > { %1691 = vtanh.f32 %v1130_v38 }
0x1246   : > { %v1692_v39 = vpop.eup %1691 }
0x1247   : > { %1133 = vrot.lane.b32.xlu1 %v1692_v39, %s1741_s6 }
0x124b   : > { %1143 = vrot.lane.b32.xlu1 %v1130_v38, %s1743_s8 }
0x12b9   : > { %v1134_v40 = vpop.permute.xlu1 %1133 }
0x12ba   : > { %v1136_v41 = vmul.f32 %v1134_v40, %v1114_v32 }
0x12bc   : > { %1138 = vrot.lane.b32.xlu0 %v1136_v41, %s1742_s7 }
0x12bd   : > { %v1144_v42 = vpop.permute.xlu1 %1143 }
0x12be   : > { %1146 = vst.msk [vmem:[#allocation3] sm:$0x3] %vm284_vm0, %v1144_v42 }
0x12c5   : > { %v1152_v43 = vld [vmem:[#allocation3] sm:$0x3] }
0x12c6   : > { %1240 = vrot.lane.b32.xlu1 %v1152_v43, %s1742_s7 }
0x132e   : > { %v1139_v44 = vpop.permute.xlu0 %1138 }
0x132f   : > { %1141 = vst.msk [vmem:[#allocation2] sm:$0x3] %vm284_vm0, %v1139_v44  ;;  %1469 = vst.msk [vmem:[%s1379_s22 + $0xc] sm:$0x3] %vm284_vm0, %v1139_v44 }
0x1336   : > { %v1151_v45 = vld [vmem:[#allocation2] sm:$0x3] }
0x1337   : > { %1604 = vmatmul.mubr.msk.f32.vlgmr.msra.gmra.mxu1 %vm299_vm2, %v1151_v45 }
0x1338   : > { %v1241_v57 = vpop.permute.xlu1 %1240 }
0x13f7   : > { %v1229_v47 = vpop.f32.mrf.mxu1 }
0x13f8   : > { %v1233_v48 = vadd.f32 %v1471_v46, %v1229_v47 }
0x13f9   : > { %v1605_v49 = vpop.f32.mrf.mxu1 }
0x13fa   : > { %1693 = vtanh.f32 %v1233_v48  ;;  %v1234_v51 = vmul.f32 0.5, %v1233_v48 }
0x13fc   : > { %1695 = vtanh.f32 %v1234_v51 }
0x1407   : > { %v1694_v50 = vpop.eup %1693 }
0x1408   : > { %1245 = vrot.lane.b32.xlu0 %v1694_v50, %s1741_s6 }
0x1409   : > { %v1696_v52 = vpop.eup %1695 }
0x140a   : > { %v1236_v53 = vmul.f32 0.5, %v1696_v52 }
0x140c   : > { %v1237_v54 = vadd.f32 0.5, %v1236_v53 }
0x140e   : > { %v1243_v58 = vmul.f32 %v1241_v57, %v1237_v54 }
0x147a   : > { %v1246_v55 = vpop.permute.xlu0 %1245 }
0x147b   : > { %v1248_v56 = vmul.f32 %v1246_v55, %v1237_v54 }
0x147d   : > { %1250 = vrot.lane.b32.xlu0 %v1248_v56, %s1742_s7 }
0x14ef   : > { %v1251_v59 = vpop.permute.xlu0 %1250 }
0x14f0   : > { %v1253_v60 = vadd.f32 %v1251_v59, %v1243_v58 }
0x14f2   : > { %1697 = vtanh.f32 %v1253_v60 }
0x14ff   : > { %v1698_v61 = vpop.eup %1697 }
0x1500   : > { %1256 = vrot.lane.b32.xlu1 %v1698_v61, %s1741_s6 }
0x1504   : > { %1266 = vrot.lane.b32.xlu1 %v1253_v60, %s1743_s8 }
0x1572   : > { %v1257_v62 = vpop.permute.xlu1 %1256 }
0x1573   : > { %v1259_v63 = vmul.f32 %v1257_v62, %v1237_v54 }
0x1575   : > { %1261 = vrot.lane.b32.xlu0 %v1259_v63, %s1742_s7 }
0x1576   : > { %v1267_v0 = vpop.permute.xlu1 %1266 }
0x1577   : > { %1269 = vst.msk [vmem:[#allocation3] sm:$0x3] %vm284_vm0, %v1267_v0 }
0x15e7   : > { %v1262_v1 = vpop.permute.xlu0 %1261 }
0x15e8   : > { %1264 = vst.msk [vmem:[#allocation2] sm:$0x3] %vm284_vm0, %v1262_v1  ;;  %1474 = vst.msk [vmem:[%s1387_s4 + $0xe] sm:$0x3] %vm284_vm0, %v1262_v1 }
0x15e9 PF: > { %s12_s13 = sadd.s32 1, %s1737_s13   ;;  %s2064_s9 = smov %s1725_s10 }
0x15ea   : > { %p9_p10 = scmp.ge.s32.totalorder %s12_s13, 4   ;;  %s2065_s10 = smov %s1794_s17 }
0x15eb   : > { %s2066_s11 = smov %s1733_s12  ;;  %s2067_s12 = smov %s2069_s14 }
0x15ec   :  { %11 = sbr.rel (!%p9_p10) target bundleno = 3 (0x3), region = 125 }

// kernel: lstm_model_forward.7
= control target key start
LH: loop header
LB: loop body
LE: loop exit
PB: predicated region body
PF: predicated region fallthrough
CT: control target
= control target key end

     0   :  { %s2538_s12 = smov 0   ;;  %s2540_s13 = smov 0   ;;  %s2935_s0 = inlined_call_operand.vmem [shape: f32[8,2,256], index: 0, kind: input, shape index: {}]   ;;  %s2936_s1 = inlined_call_operand.vmem [shape: f32[2,32,128], index: 1, kind: input, shape index: {}]   ;;  %s2937_s2 = inlined_call_operand.vmem [shape: f32[2,32,128], index: 2, kind: input, shape index: {}]   ;;  %s2938_s3 = inlined_call_operand.vmem [shape: f32[2,8,2,128], index: 3, kind: output, shape index: {}]  }
   0x1   :  { %s2542_s14 = smov 0   ;;  %s2544_s15 = smov 0  }
   0x2   :  { %s2546_s16 = smov 0  }
   0x3 LB: > { %s25_s17 = sadd.s32 1, %s2507_s15  ;;  %p49_p1 = scmp.ne.s32.totalorder %s2499_s13, %s2495_s12  ;;  %s2511_s16 = sphi %s2546_s16, %s13_s16   ;;  %s2507_s15 = sphi %s2544_s15, %s2942_s15   ;;  %s2503_s14 = sphi %s2542_s14, %s2941_s14   ;;  %s2499_s13 = sphi %s2540_s13, %s2940_s13   ;;  %s2495_s12 = sphi %s2538_s12, %s2939_s12  }
   0x4   : > { %p27_p0 = scmp.ge.s32.totalorder %s25_s17, 2  ;;  %p50_p2 = scmp.eq.s32.totalorder %s2511_s16, 0 }
   0x5   : > { %s42_s19 = sadd.s32 1, %s2499_s13  ;;  %p2071_p5 = scmp.ge.s32.totalorder %s2511_s16, 2 }
   0x6   : > { %s2944_s17 = smov (%p27_p0, %s25_s17), 0  ;;  %p51_p3 = por %p50_p2, %p49_p1 }
   0x7   : > { %s38_s18 = ssub.s32 %s2507_s15, %s2944_s17  ;;  %159 = sbr.rel (%p2071_p5) target bundleno = 21 (0x15), region = 24 }
   0x8   : > { %p40_p4 = scmp.eq.s32.totalorder %s38_s18, 0 }
   0xa   : > { %s2573_s20 = scalar_select %p40_p4, %s2499_s13, %s42_s19  }
   0xc   : > { %162 = sbr.rel (!%p51_p3) target bundleno = 21 (0x15), region = 28  ;;  %s164_s21 = sand.u32 (%p51_p3), 1, %s2499_s13  }
   0xd   : > { %s2073_s22 = sshll.u32 (%p51_p3), %s2507_s15, 1  ;;  %s2072_s23 = sshll.u32 (%p51_p3), %s164_s21, 4 }
   0xe   : > { %s175_s26 = scalar_lea.vmem (%p51_p3), %s2935_s0, %s2073_s22  ;;  %s166_s27 = scalar_lea.vmem (%p51_p3), [#allocation4], %s2072_s23 }
   0xf   : > { %v192_v0 = vld [vmem:[%s175_s26] sm:$0x3] (%p51_p3)  ;;  %v194_v1 = vld [vmem:[%s175_s26 + $0x4] sm:$0x3] (%p51_p3)  ;;  %v196_v2 = vld [vmem:[%s175_s26 + $0x8] sm:$0x3] (%p51_p3) }
  0x10   : > { %193 = vst [vmem:[%s166_s27] sm:$0x3] (%p51_p3), %v192_v0  ;;  %195 = vst [vmem:[%s166_s27 + $0x2] sm:$0x3] (%p51_p3), %v194_v1  ;;  %v198_v3 = vld [vmem:[%s175_s26 + $0xc] sm:$0x3] (%p51_p3) }
  0x11   : > { %v200_v4 = vld [vmem:[%s175_s26 + $0x10] sm:$0x3]  ;;  %197 = vst [vmem:[%s166_s27 + $0x4] sm:$0x3] %v196_v2  ;;  %199 = vst [vmem:[%s166_s27 + $0x6] sm:$0x3] %v198_v3 }
  0x12   : > { %201 = vst [vmem:[%s166_s27 + $0x8] sm:$0x3] %v200_v4  ;;  %v202_v5 = vld [vmem:[%s175_s26 + $0x14] sm:$0x3]  ;;  %v204_v6 = vld [vmem:[%s175_s26 + $0x18] sm:$0x3] }
  0x13   : > { %v206_v7 = vld [vmem:[%s175_s26 + $0x1c] sm:$0x3]  ;;  %203 = vst [vmem:[%s166_s27 + $0xa] sm:$0x3] %v202_v5  ;;  %205 = vst [vmem:[%s166_s27 + $0xc] sm:$0x3] %v204_v6 }
  0x14   : > { %207 = vst [vmem:[%s166_s27 + $0xe] sm:$0x3] %v206_v7 }
  0x15 PF: > { %p2074_p6 = scmp.ge.s32.totalorder %s2511_s16, 1  ;;  %p246_p7 = scmp.lt.s32.totalorder %s2511_s16, 3 }
  0x17   : > { %p247_p8 = pnand %p2074_p6, %p246_p7 }
  0x18   : > { %s2079_s28 = sshll.u32 (!%p247_p8), %s2503_s14, 5  ;;  %s253_s5 = sand.u32 (!%p247_p8), 1, %s2495_s12  }
  0x19   : > { %250 = sbr.rel (%p247_p8) target bundleno = 5803 (0x16ab), region = 69  ;;  %s321_s4 = scalar_lea.vmem (!%p247_p8), %s2936_s1, %s2079_s28 }
  0x1a   : > { %s2075_s6 = sshll.u32 (!%p247_p8), %s253_s5, 4  ;;  %s2078_s7 = smul.u32 (!%p247_p8), 14, %s2503_s14 }
  0x1b   : > { %s2628_s8 = scalar_lea.vmem (!%p247_p8), [#allocation4], %s2075_s6  ;;  %s2515_s10 = smov (!%p247_p8), 64  }
  0x1c   : > { %s318_s9 = scalar_lea.vmem (!%p247_p8), %s2628_s8, %s2078_s7 [#allocation4]  ;;  %s2516_s11 = smov (!%p247_p8), 32  }
  0x1d   : > { %s438_s19 = scalar_lea.vmem (!%p247_p8), %s2937_s2, %s2079_s28  ;;  %s2517_s21 = smov (!%p247_p8), 96  }
  0x1e   : > { %vm311_vm0 = vcmask 254976   ;;  %v2513_v8 = vmov 0.0   ;;  %vm2514_vm1 = vmmov 0   ;;  %v2596_v9 = vld [vmem:[%s321_s4 + $0x18] sm:$0xff]  ;;  %v2598_v10 = vld [vmem:[%s321_s4 + $0x10] sm:$0xff]  ;;  %v2605_v11 = vld [vmem:[%s321_s4 + $0x8] sm:$0xff] }
  0x1f   : > { %2204 = vmatprep.subr.mxu0 %v2513_v8  ;;  %2212 = vmatprep.mubr.msk.f32.mxu0 %vm2514_vm1, %v2513_v8  ;;  %312 = vst.msk [vmem:[#allocation2] sm:$0x3] %vm311_vm0, %v2513_v8  ;;  %313 = vst.msk [vmem:[#allocation3] sm:$0x3] %vm311_vm0, %v2513_v8  ;;  %v2609_v12 = vld [vmem:[%s321_s4] sm:$0xff]  ;;  %vm326_vm2 = vcmask 261120  }
  0x20   : > { %2215 = vmatprep.subr.mxu1 %v2513_v8  ;;  %2223 = vmatprep.mubr.msk.f32.mxu1 %vm2514_vm1, %v2513_v8  ;;  %v319_v14 = vld [vmem:[%s318_s9] sm:$0x3]  ;;  %v2642_v31 = vld [vmem:[%s438_s19 + $0x18] sm:$0xff]  ;;  %v2644_v32 = vld [vmem:[%s438_s19 + $0x10] sm:$0xff]  ;;  %p294_p9 = scmp.lt.s32.totalorder %s2503_s14, 1  ;;  %s2082_s28 = smul.u32 10, %s2503_s14 }
  0x21   : > { %2205 = vmatpush3.msra.mxu0 %v2596_v9  ;;  %2216 = vmatpush3.msra.mxu1 %v2642_v31  ;;  %v2648_v33 = vld [vmem:[%s438_s19 + $0x8] sm:$0xff]  ;;  %v2653_v34 = vld [vmem:[%s438_s19] sm:$0xff]  ;;  %s2088_s4 = smul.u32 6, %s2503_s14  ;;  %s1113_s12 = ssub.s32 4, %s2503_s14 }
  0x22   : > { %2206 = vmatprep.subr.mxu0 %v2513_v8  ;;  %2217 = vmatprep.subr.mxu1 %v2513_v8  ;;  %s295_s22 = scalar_select %p294_p9, %s2503_s14, 1 }
  0x23   : > { %2207 = vmatpush3.msra.mxu0 %v2598_v10  ;;  %2218 = vmatpush3.msra.mxu1 %v2644_v32  ;;  %s1979_s29 = scalar_lea.vmem %s2628_s8, %s2082_s28 [#allocation4]  ;;  %s1987_s5 = scalar_lea.vmem %s2628_s8, %s2088_s4 [#allocation4] }
  0x24   : > { %2208 = vmatprep.subr.mxu0 %v2513_v8  ;;  %2219 = vmatprep.subr.mxu1 %v2513_v8  ;;  %s2123_s23 = sshll.u32 %s295_s22, 4  ;;  %v2083_v43 = vld [vmem:[%s1979_s29 + $0x2] sm:$0x3]  ;;  %v2089_v3 = vld [vmem:[%s1987_s5 + $0x4] sm:$0x3]  ;;  %s2807_s19 = sshll.u32 %s1113_s12, 1 }
  0x25   : > { %2209 = vmatpush3.msra.mxu0 %v2605_v11  ;;  %2220 = vmatpush3.msra.mxu1 %v2648_v33  ;;  %s2690_s26 = scalar_lea.vmem %s2938_s3, %s2123_s23  ;;  %s1117_s22 = scalar_lea.vmem %s2628_s8, %s2807_s19 [#allocation4] }
  0x26   : > { %2210 = vmatprep.subr.mxu0 %v2513_v8  ;;  %v315_v13 = vld [vmem:[#allocation2] sm:$0x3]  ;;  %v316_v19 = vld [vmem:[#allocation3] sm:$0x3]  ;;  %2221 = vmatprep.subr.mxu1 %v2513_v8  ;;  %s515_s27 = scalar_lea.vmem %s2690_s26, %s2078_s7  ;;  %s1983_s30 = scalar_lea.vmem %s2690_s26, %s2082_s28 }
  0x27   : > { %2211 = vmatpush3.msra.mxu0 %v2609_v12  ;;  %2222 = vmatpush3.msra.mxu1 %v2653_v34  ;;  %s1991_s6 = scalar_lea.vmem %s2690_s26, %s2088_s4  ;;  %s2094_s7 = sshll.u32 %s2503_s14, 1 }
  0x28   : > { %2213 = vmatmul.mubr.msk.f32.vlgmr.msra.gmra.mxu0 %vm326_vm2, %v315_v13  ;;  %2226 = vmatprep.subr.mxu0 %v2513_v8  ;;  %s1994_s9 = scalar_lea.vmem %s2628_s8, %s2094_s7 [#allocation4]  ;;  %s1997_s18 = scalar_lea.vmem %s2690_s26, %s2094_s7 }
  0x29   : > { %2227 = vmatpush3.msra.mxu0 %v2596_v9  ;;  %2234 = vmatprep.mubr.msk.f32.mxu0 %vm2514_vm1, %v2513_v8  ;;  %s1309_s23 = scalar_lea.vmem %s2690_s26, %s2807_s19  ;;  %s2103_s24 = smul.u32 4294967290, %s2503_s14 }
  0x2a   : > { %2228 = vmatprep.subr.mxu0 %v2513_v8  ;;  %2237 = vmatprep.subr.mxu1 %v2513_v8  ;;  %s2109_s28 = smul.u32 4294967286, %s2503_s14 }
  0x2b   : > { %2229 = vmatpush3.msra.mxu0 %v2598_v10  ;;  %s2005_s25 = scalar_lea.vmem %s2628_s8, %s2103_s24 [#allocation4]  ;;  %s2115_s4 = smul.u32 4294967282, %s2503_s14 }
  0x2c   : > { %2230 = vmatprep.subr.mxu0 %v2513_v8  ;;  %s2013_s29 = scalar_lea.vmem %s2628_s8, %s2109_s28 [#allocation4] }
  0x2d   : > { %2231 = vmatpush3.msra.mxu0 %v2605_v11  ;;  %s2021_s5 = scalar_lea.vmem %s2628_s8, %s2115_s4 [#allocation4]  ;;  %s2025_s8 = scalar_lea.vmem %s2690_s26, %s2115_s4 }
  0x2e   : > { %2232 = vmatprep.subr.mxu0 %v2513_v8 }
  0x2f   : > { %2233 = vmatpush3.msra.mxu0 %v2609_v12 }
  0x30   : > { %2248 = vmatprep.subr.mxu0 %v2513_v8 }
  0xe8   : > { %v396_v15 = vpop.f32.mrf.mxu0 }
  0xe9   : > { %v400_v16 = vadd.f32 %v396_v15, %v319_v14 }
  0xea   : > { %v2214_v17 = vpop.f32.mrf.mxu0 }
  0xeb   : > { %2425 = vtanh.f32 %v400_v16  ;;  %v401_v20 = vmul.f32 0.5, %v400_v16 }
  0xed   : > { %2427 = vtanh.f32 %v401_v20 }
  0xf8   : > { %v2426_v18 = vpop.eup %2425 }
  0xf9   : > { %412 = vrot.lane.b32.xlu0 %v2426_v18, %s2515_s10 }
  0xfa   : > { %v2428_v21 = vpop.eup %2427 }
  0xfb   : > { %v403_v22 = vmul.f32 0.5, %v2428_v21 }
  0xfd   : > { %407 = vrot.lane.b32.xlu0 %v316_v19, %s2516_s11  ;;  %v404_v23 = vadd.f32 0.5, %v403_v22 }
 0x16b   : > { %v413_v24 = vpop.permute.xlu0 %412 }
 0x16c   : > { %v415_v25 = vmul.f32 %v413_v24, %v404_v23 }
 0x16e   : > { %417 = vrot.lane.b32.xlu1 %v415_v25, %s2516_s11 }
 0x16f   : > { %v408_v26 = vpop.permute.xlu0 %407 }
 0x170   : > { %v410_v27 = vmul.f32 %v408_v26, %v404_v23 }
 0x1e0   : > { %v418_v28 = vpop.permute.xlu1 %417 }
 0x1e1   : > { %v420_v29 = vadd.f32 %v418_v28, %v410_v27 }
 0x1e3   : > { %2429 = vtanh.f32 %v420_v29 }
 0x1f0   : > { %v2430_v30 = vpop.eup %2429 }
 0x1f1   : > { %423 = vrot.lane.b32.xlu1 %v2430_v30, %s2515_s10 }
 0x1f5   : > { %434 = vrot.lane.b32.xlu1 %v420_v29, %s2517_s21 }
 0x263   : > { %v424_v35 = vpop.permute.xlu1 %423 }
 0x264   : > { %v426_v36 = vmul.f32 %v424_v35, %v404_v23 }
 0x266   : > { %428 = vrot.lane.b32.xlu0 %v426_v36, %s2516_s11  ;;  %v2095_v36 = vld [vmem:[%s1994_s9 + $0x6] sm:$0x3] }
 0x267   : > { %v435_v37 = vpop.permute.xlu1 %434 }
 0x268   : > { %437 = vst.msk [vmem:[#allocation3] sm:$0x3] %vm311_vm0, %v435_v37 }
 0x26f   : > { %v520_v38 = vld [vmem:[#allocation3] sm:$0x3] }
 0x270   : > { %608 = vrot.lane.b32.xlu1 %v520_v38, %s2516_s11 }
 0x2d8   : > { %v429_v39 = vpop.permute.xlu0 %428 }
 0x2d9   : > { %432 = vst.msk [vmem:[#allocation2] sm:$0x3] %vm311_vm0, %v429_v39  ;;  %2224 = vmatmul.mubr.msk.f32.vlgmr.msra.gmra.mxu1 %vm326_vm2, %v429_v39 }
 0x2da   : > { %2238 = vmatpush3.msra.mxu1 %v2642_v31  ;;  %2245 = vmatprep.mubr.msk.f32.mxu1 %vm2514_vm1, %v2513_v8 }
 0x2db   : > { %2239 = vmatprep.subr.mxu1 %v2513_v8 }
 0x2dc   : > { %2240 = vmatpush3.msra.mxu1 %v2644_v32 }
 0x2dd   : > { %2241 = vmatprep.subr.mxu1 %v2513_v8 }
 0x2de   : > { %2242 = vmatpush3.msra.mxu1 %v2648_v33 }
 0x2df   : > { %2243 = vmatprep.subr.mxu1 %v2513_v8 }
 0x2e0   : > { %v519_v40 = vld [vmem:[#allocation2] sm:$0x3]  ;;  %2244 = vmatpush3.msra.mxu1 %v2653_v34 }
 0x2e1   : > { %2235 = vmatmul.mubr.msk.f32.vlgmr.msra.gmra.mxu0 %vm326_vm2, %v519_v40  ;;  %2259 = vmatprep.subr.mxu1 %v2513_v8 }
 0x2e2   : > { %2249 = vmatpush3.msra.mxu0 %v2596_v9  ;;  %2256 = vmatprep.mubr.msk.f32.mxu0 %vm2514_vm1, %v2513_v8  ;;  %v609_v54 = vpop.permute.xlu1 %608 }
 0x2e3   : > { %2250 = vmatprep.subr.mxu0 %v2513_v8 }
 0x2e4   : > { %2251 = vmatpush3.msra.mxu0 %v2598_v10 }
 0x2e5   : > { %2252 = vmatprep.subr.mxu0 %v2513_v8 }
 0x2e6   : > { %2253 = vmatpush3.msra.mxu0 %v2605_v11 }
 0x2e7   : > { %2254 = vmatprep.subr.mxu0 %v2513_v8 }
 0x2e8   : > { %2255 = vmatpush3.msra.mxu0 %v2609_v12 }
 0x2e9   : > { %2270 = vmatprep.subr.mxu0 %v2513_v8 }
 0x399   : > { %v511_v41 = vpop.f32.mrf.mxu1 }
 0x39a   : > { %516 = vst [vmem:[%s515_s27] sm:$0x3] %v511_v41  ;;  %s2009_s27 = scalar_lea.vmem %s2690_s26, %s2103_s24 }
 0x39b   : > { %v2225_v42 = vpop.f32.mrf.mxu1 }
 0x3a1   : > { %v597_v44 = vpop.f32.mrf.mxu0 }
 0x3a2   : > { %v601_v45 = vadd.f32 %v2083_v43, %v597_v44 }
 0x3a3   : > { %v2236_v46 = vpop.f32.mrf.mxu0 }
 0x3a4   : > { %2431 = vtanh.f32 %v601_v45  ;;  %v602_v48 = vmul.f32 0.5, %v601_v45 }
 0x3a6   : > { %2433 = vtanh.f32 %v602_v48 }
 0x3b1   : > { %v2432_v47 = vpop.eup %2431 }
 0x3b2   : > { %613 = vrot.lane.b32.xlu0 %v2432_v47, %s2515_s10 }
 0x3b3   : > { %v2434_v49 = vpop.eup %2433 }
 0x3b4   : > { %v604_v50 = vmul.f32 0.5, %v2434_v49 }
 0x3b6   : > { %v605_v51 = vadd.f32 0.5, %v604_v50 }
 0x3b8   : > { %v611_v55 = vmul.f32 %v609_v54, %v605_v51 }
 0x424   : > { %v614_v52 = vpop.permute.xlu0 %613 }
 0x425   : > { %v616_v53 = vmul.f32 %v614_v52, %v605_v51 }
 0x427   : > { %618 = vrot.lane.b32.xlu0 %v616_v53, %s2516_s11 }
 0x499   : > { %v619_v56 = vpop.permute.xlu0 %618 }
 0x49a   : > { %v621_v57 = vadd.f32 %v619_v56, %v611_v55 }
 0x49c   : > { %2435 = vtanh.f32 %v621_v57 }
 0x4a9   : > { %v2436_v58 = vpop.eup %2435 }
 0x4aa   : > { %624 = vrot.lane.b32.xlu1 %v2436_v58, %s2515_s10 }
 0x4ae   : > { %634 = vrot.lane.b32.xlu1 %v621_v57, %s2517_s21 }
 0x51c   : > { %v625_v59 = vpop.permute.xlu1 %624 }
 0x51d   : > { %v627_v60 = vmul.f32 %v625_v59, %v605_v51 }
 0x51f   : > { %629 = vrot.lane.b32.xlu0 %v627_v60, %s2516_s11  ;;  %v1118_v60 = vld [vmem:[%s1117_s22] sm:$0x3] }
 0x520   : > { %v635_v61 = vpop.permute.xlu1 %634 }
 0x521   : > { %637 = vst.msk [vmem:[#allocation3] sm:$0x3] %vm311_vm0, %v635_v61 }
 0x528   : > { %v719_v62 = vld [vmem:[#allocation3] sm:$0x3] }
 0x529   : > { %807 = vrot.lane.b32.xlu1 %v719_v62, %s2516_s11 }
 0x591   : > { %v630_v63 = vpop.permute.xlu0 %629 }
 0x592   : > { %632 = vst.msk [vmem:[#allocation2] sm:$0x3] %vm311_vm0, %v630_v63  ;;  %2246 = vmatmul.mubr.msk.f32.vlgmr.msra.gmra.mxu1 %vm326_vm2, %v630_v63 }
 0x593   : > { %2260 = vmatpush3.msra.mxu1 %v2642_v31  ;;  %2267 = vmatprep.mubr.msk.f32.mxu1 %vm2514_vm1, %v2513_v8 }
 0x594   : > { %2261 = vmatprep.subr.mxu1 %v2513_v8 }
 0x595   : > { %2262 = vmatpush3.msra.mxu1 %v2644_v32 }
 0x596   : > { %2263 = vmatprep.subr.mxu1 %v2513_v8 }
 0x597   : > { %2264 = vmatpush3.msra.mxu1 %v2648_v33 }
 0x598   : > { %2265 = vmatprep.subr.mxu1 %v2513_v8 }
 0x599   : > { %v718_v0 = vld [vmem:[#allocation2] sm:$0x3]  ;;  %2266 = vmatpush3.msra.mxu1 %v2653_v34 }
 0x59a   : > { %2257 = vmatmul.mubr.msk.f32.vlgmr.msra.gmra.mxu0 %vm326_vm2, %v718_v0  ;;  %2281 = vmatprep.subr.mxu1 %v2513_v8 }
 0x59b   : > { %2271 = vmatpush3.msra.mxu0 %v2596_v9  ;;  %2278 = vmatprep.mubr.msk.f32.mxu0 %vm2514_vm1, %v2513_v8  ;;  %v808_v19 = vpop.permute.xlu1 %807 }
 0x59c   : > { %2272 = vmatprep.subr.mxu0 %v2513_v8 }
 0x59d   : > { %2273 = vmatpush3.msra.mxu0 %v2598_v10 }
 0x59e   : > { %2274 = vmatprep.subr.mxu0 %v2513_v8 }
 0x59f   : > { %2275 = vmatpush3.msra.mxu0 %v2605_v11 }
 0x5a0   : > { %2276 = vmatprep.subr.mxu0 %v2513_v8 }
 0x5a1   : > { %2277 = vmatpush3.msra.mxu0 %v2609_v12 }
 0x5a2   : > { %2292 = vmatprep.subr.mxu0 %v2513_v8 }
 0x652   : > { %v710_v1 = vpop.f32.mrf.mxu1 }
 0x653   : > { %2087 = vst [vmem:[%s1983_s30 + $0x2] sm:$0x3] %v710_v1  ;;  %s2017_s30 = scalar_lea.vmem %s2690_s26, %s2109_s28 }
 0x654   : > { %v2247_v2 = vpop.f32.mrf.mxu1 }
 0x65a   : > { %v796_v4 = vpop.f32.mrf.mxu0 }
 0x65b   : > { %v800_v5 = vadd.f32 %v2089_v3, %v796_v4 }
 0x65c   : > { %v2258_v6 = vpop.f32.mrf.mxu0 }
 0x65d   : > { %2437 = vtanh.f32 %v800_v5  ;;  %v801_v13 = vmul.f32 0.5, %v800_v5 }
 0x65f   : > { %2439 = vtanh.f32 %v801_v13 }
 0x66a   : > { %v2438_v7 = vpop.eup %2437 }
 0x66b   : > { %812 = vrot.lane.b32.xlu0 %v2438_v7, %s2515_s10 }
 0x66c   : > { %v2440_v14 = vpop.eup %2439 }
 0x66d   : > { %v803_v15 = vmul.f32 0.5, %v2440_v14 }
 0x66f   : > { %v804_v16 = vadd.f32 0.5, %v803_v15 }
 0x671   : > { %v810_v20 = vmul.f32 %v808_v19, %v804_v16 }
 0x6dd   : > { %v813_v17 = vpop.permute.xlu0 %812 }
 0x6de   : > { %v815_v18 = vmul.f32 %v813_v17, %v804_v16 }
 0x6e0   : > { %817 = vrot.lane.b32.xlu0 %v815_v18, %s2516_s11 }
 0x752   : > { %v818_v21 = vpop.permute.xlu0 %817 }
 0x753   : > { %v820_v22 = vadd.f32 %v818_v21, %v810_v20 }
 0x755   : > { %2441 = vtanh.f32 %v820_v22 }
 0x762   : > { %v2442_v23 = vpop.eup %2441 }
 0x763   : > { %823 = vrot.lane.b32.xlu1 %v2442_v23, %s2515_s10 }
 0x767   : > { %833 = vrot.lane.b32.xlu1 %v820_v22, %s2517_s21 }
 0x7d5   : > { %v824_v24 = vpop.permute.xlu1 %823 }
 0x7d6   : > { %v826_v25 = vmul.f32 %v824_v24, %v804_v16 }
 0x7d8   : > { %828 = vrot.lane.b32.xlu0 %v826_v25, %s2516_s11  ;;  %v2104_v25 = vld [vmem:[%s2005_s25 + $0xa] sm:$0x3] }
 0x7d9   : > { %v834_v26 = vpop.permute.xlu1 %833 }
 0x7da   : > { %836 = vst.msk [vmem:[#allocation3] sm:$0x3] %vm311_vm0, %v834_v26 }
 0x7e1   : > { %v917_v27 = vld [vmem:[#allocation3] sm:$0x3] }
 0x7e2   : > { %1005 = vrot.lane.b32.xlu1 %v917_v27, %s2516_s11 }
 0x84a   : > { %v829_v28 = vpop.permute.xlu0 %828 }
 0x84b   : > { %831 = vst.msk [vmem:[#allocation2] sm:$0x3] %vm311_vm0, %v829_v28  ;;  %2268 = vmatmul.mubr.msk.f32.vlgmr.msra.gmra.mxu1 %vm326_vm2, %v829_v28 }
 0x84c   : > { %2282 = vmatpush3.msra.mxu1 %v2642_v31  ;;  %2289 = vmatprep.mubr.msk.f32.mxu1 %vm2514_vm1, %v2513_v8 }
 0x84d   : > { %2283 = vmatprep.subr.mxu1 %v2513_v8 }
 0x84e   : > { %2284 = vmatpush3.msra.mxu1 %v2644_v32 }
 0x84f   : > { %2285 = vmatprep.subr.mxu1 %v2513_v8 }
 0x850   : > { %2286 = vmatpush3.msra.mxu1 %v2648_v33 }
 0x851   : > { %2287 = vmatprep.subr.mxu1 %v2513_v8 }
 0x852   : > { %v916_v29 = vld [vmem:[#allocation2] sm:$0x3]  ;;  %2288 = vmatpush3.msra.mxu1 %v2653_v34 }
 0x853   : > { %2279 = vmatmul.mubr.msk.f32.vlgmr.msra.gmra.mxu0 %vm326_vm2, %v916_v29  ;;  %2303 = vmatprep.subr.mxu1 %v2513_v8 }
 0x854   : > { %2293 = vmatpush3.msra.mxu0 %v2596_v9  ;;  %2300 = vmatprep.mubr.msk.f32.mxu0 %vm2514_vm1, %v2513_v8  ;;  %v1006_v47 = vpop.permute.xlu1 %1005 }
 0x855   : > { %2294 = vmatprep.subr.mxu0 %v2513_v8 }
 0x856   : > { %2295 = vmatpush3.msra.mxu0 %v2598_v10 }
 0x857   : > { %2296 = vmatprep.subr.mxu0 %v2513_v8 }
 0x858   : > { %2297 = vmatpush3.msra.mxu0 %v2605_v11 }
 0x859   : > { %2298 = vmatprep.subr.mxu0 %v2513_v8 }
 0x85a   : > { %2299 = vmatpush3.msra.mxu0 %v2609_v12 }
 0x85b   : > { %2314 = vmatprep.subr.mxu0 %v2513_v8 }
 0x90b   : > { %v909_v30 = vpop.f32.mrf.mxu1 }
 0x90c   : > { %2093 = vst [vmem:[%s1991_s6 + $0x4] sm:$0x3] %v909_v30 }
 0x90d   : > { %v2269_v35 = vpop.f32.mrf.mxu1 }
 0x913   : > { %v994_v37 = vpop.f32.mrf.mxu0 }
 0x914   : > { %v998_v38 = vadd.f32 %v2095_v36, %v994_v37 }
 0x915   : > { %v2280_v39 = vpop.f32.mrf.mxu0 }
 0x916   : > { %2443 = vtanh.f32 %v998_v38  ;;  %v999_v41 = vmul.f32 0.5, %v998_v38 }
 0x918   : > { %2445 = vtanh.f32 %v999_v41 }
 0x923   : > { %v2444_v40 = vpop.eup %2443 }
 0x924   : > { %1010 = vrot.lane.b32.xlu0 %v2444_v40, %s2515_s10 }
 0x925   : > { %v2446_v42 = vpop.eup %2445 }
 0x926   : > { %v1001_v43 = vmul.f32 0.5, %v2446_v42 }
 0x928   : > { %v1002_v44 = vadd.f32 0.5, %v1001_v43 }
 0x92a   : > { %v1008_v48 = vmul.f32 %v1006_v47, %v1002_v44 }
 0x996   : > { %v1011_v45 = vpop.permute.xlu0 %1010 }
 0x997   : > { %v1013_v46 = vmul.f32 %v1011_v45, %v1002_v44 }
 0x999   : > { %1015 = vrot.lane.b32.xlu0 %v1013_v46, %s2516_s11 }
 0xa0b   : > { %v1016_v49 = vpop.permute.xlu0 %1015 }
 0xa0c   : > { %v1018_v50 = vadd.f32 %v1016_v49, %v1008_v48 }
 0xa0e   : > { %2447 = vtanh.f32 %v1018_v50 }
 0xa1b   : > { %v2448_v51 = vpop.eup %2447 }
 0xa1c   : > { %1021 = vrot.lane.b32.xlu1 %v2448_v51, %s2515_s10 }
 0xa20   : > { %1031 = vrot.lane.b32.xlu1 %v1018_v50, %s2517_s21 }
 0xa8e   : > { %v1022_v52 = vpop.permute.xlu1 %1021 }
 0xa8f   : > { %v1024_v53 = vmul.f32 %v1022_v52, %v1002_v44  ;;  %v2110_v52 = vld [vmem:[%s2013_s29 + $0xc] sm:$0x3] }
 0xa91   : > { %1026 = vrot.lane.b32.xlu0 %v1024_v53, %s2516_s11 }
 0xa92   : > { %v1032_v54 = vpop.permute.xlu1 %1031 }
 0xa93   : > { %1034 = vst.msk [vmem:[#allocation3] sm:$0x3] %vm311_vm0, %v1032_v54 }
 0xa9a   : > { %v1115_v55 = vld [vmem:[#allocation3] sm:$0x3] }
 0xa9b   : > { %1203 = vrot.lane.b32.xlu1 %v1115_v55, %s2516_s11 }
 0xb03   : > { %v1027_v56 = vpop.permute.xlu0 %1026 }
 0xb04   : > { %1029 = vst.msk [vmem:[#allocation2] sm:$0x3] %vm311_vm0, %v1027_v56  ;;  %2290 = vmatmul.mubr.msk.f32.vlgmr.msra.gmra.mxu1 %vm326_vm2, %v1027_v56 }
 0xb05   : > { %2304 = vmatpush3.msra.mxu1 %v2642_v31  ;;  %2311 = vmatprep.mubr.msk.f32.mxu1 %vm2514_vm1, %v2513_v8 }
 0xb06   : > { %2305 = vmatprep.subr.mxu1 %v2513_v8 }
 0xb07   : > { %2306 = vmatpush3.msra.mxu1 %v2644_v32 }
 0xb08   : > { %2307 = vmatprep.subr.mxu1 %v2513_v8 }
 0xb09   : > { %2308 = vmatpush3.msra.mxu1 %v2648_v33 }
 0xb0a   : > { %2309 = vmatprep.subr.mxu1 %v2513_v8 }
 0xb0b   : > { %v1114_v57 = vld [vmem:[#allocation2] sm:$0x3]  ;;  %2310 = vmatpush3.msra.mxu1 %v2653_v34 }
 0xb0c   : > { %2301 = vmatmul.mubr.msk.f32.vlgmr.msra.gmra.mxu0 %vm326_vm2, %v1114_v57  ;;  %2325 = vmatprep.subr.mxu1 %v2513_v8 }
 0xb0d   : > { %2315 = vmatpush3.msra.mxu0 %v2596_v9  ;;  %2322 = vmatprep.mubr.msk.f32.mxu0 %vm2514_vm1, %v2513_v8  ;;  %v1204_v7 = vpop.permute.xlu1 %1203 }
 0xb0e   : > { %2316 = vmatprep.subr.mxu0 %v2513_v8 }
 0xb0f   : > { %2317 = vmatpush3.msra.mxu0 %v2598_v10 }
 0xb10   : > { %2318 = vmatprep.subr.mxu0 %v2513_v8 }
 0xb11   : > { %2319 = vmatpush3.msra.mxu0 %v2605_v11 }
 0xb12   : > { %2320 = vmatprep.subr.mxu0 %v2513_v8 }
 0xb13   : > { %2321 = vmatpush3.msra.mxu0 %v2609_v12 }
 0xb14   : > { %2336 = vmatprep.subr.mxu0 %v2513_v8 }
 0xbc4   : > { %v1107_v58 = vpop.f32.mrf.mxu1 }
 0xbc5   : > { %2099 = vst [vmem:[%s1997_s18 + $0x6] sm:$0x3] %v1107_v58 }
 0xbc6   : > { %v2291_v59 = vpop.f32.mrf.mxu1 }
 0xbcc   : > { %v1192_v61 = vpop.f32.mrf.mxu0 }
 0xbcd   : > { %v1196_v62 = vadd.f32 %v1192_v61, %v1118_v60 }
 0xbce   : > { %v2302_v63 = vpop.f32.mrf.mxu0 }
 0xbcf   : > { %2449 = vtanh.f32 %v1196_v62  ;;  %v1197_v1 = vmul.f32 0.5, %v1196_v62 }
 0xbd1   : > { %2451 = vtanh.f32 %v1197_v1 }
 0xbdc   : > { %v2450_v0 = vpop.eup %2449 }
 0xbdd   : > { %1208 = vrot.lane.b32.xlu0 %v2450_v0, %s2515_s10 }
 0xbde   : > { %v2452_v2 = vpop.eup %2451 }
 0xbdf   : > { %v1199_v3 = vmul.f32 0.5, %v2452_v2 }
 0xbe1   : > { %v1200_v4 = vadd.f32 0.5, %v1199_v3 }
 0xbe3   : > { %v1206_v13 = vmul.f32 %v1204_v7, %v1200_v4 }
 0xc4f   : > { %v1209_v5 = vpop.permute.xlu0 %1208 }
 0xc50   : > { %v1211_v6 = vmul.f32 %v1209_v5, %v1200_v4 }
 0xc52   : > { %1213 = vrot.lane.b32.xlu0 %v1211_v6, %s2516_s11 }
 0xcc4   : > { %v1214_v14 = vpop.permute.xlu0 %1213 }
 0xcc5   : > { %v1216_v15 = vadd.f32 %v1214_v14, %v1206_v13 }
 0xcc7   : > { %2453 = vtanh.f32 %v1216_v15 }
 0xcd4   : > { %v2454_v16 = vpop.eup %2453 }
 0xcd5   : > { %1219 = vrot.lane.b32.xlu1 %v2454_v16, %s2515_s10 }
 0xcd9   : > { %1229 = vrot.lane.b32.xlu1 %v1216_v15, %s2517_s21 }
 0xd47   : > { %v1220_v17 = vpop.permute.xlu1 %1219 }
 0xd48   : > { %v1222_v18 = vmul.f32 %v1220_v17, %v1200_v4 }
 0xd4a   : > { %1224 = vrot.lane.b32.xlu0 %v1222_v18, %s2516_s11 }
 0xd4b   : > { %v1230_v19 = vpop.permute.xlu1 %1229 }
 0xd4c   : > { %1232 = vst.msk [vmem:[#allocation3] sm:$0x3] %vm311_vm0, %v1230_v19 }
 0xd53   : > { %v1314_v20 = vld [vmem:[#allocation3] sm:$0x3] }
 0xd54   : > { %1402 = vrot.lane.b32.xlu1 %v1314_v20, %s2516_s11 }
 0xdbc   : > { %v1225_v21 = vpop.permute.xlu0 %1224 }
 0xdbd   : > { %1227 = vst.msk [vmem:[#allocation2] sm:$0x3] %vm311_vm0, %v1225_v21  ;;  %2312 = vmatmul.mubr.msk.f32.vlgmr.msra.gmra.mxu1 %vm326_vm2, %v1225_v21 }
 0xdbe   : > { %2326 = vmatpush3.msra.mxu1 %v2642_v31  ;;  %2333 = vmatprep.mubr.msk.f32.mxu1 %vm2514_vm1, %v2513_v8 }
 0xdbf   : > { %2327 = vmatprep.subr.mxu1 %v2513_v8 }
 0xdc0   : > { %2328 = vmatpush3.msra.mxu1 %v2644_v32 }
 0xdc1   : > { %2329 = vmatprep.subr.mxu1 %v2513_v8 }
 0xdc2   : > { %2330 = vmatpush3.msra.mxu1 %v2648_v33 }
 0xdc3   : > { %2331 = vmatprep.subr.mxu1 %v2513_v8 }
 0xdc4   : > { %v1313_v22 = vld [vmem:[#allocation2] sm:$0x3]  ;;  %2332 = vmatpush3.msra.mxu1 %v2653_v34 }
 0xdc5   : > { %2323 = vmatmul.mubr.msk.f32.vlgmr.msra.gmra.mxu0 %vm326_vm2, %v1313_v22  ;;  %2347 = vmatprep.subr.mxu1 %v2513_v8 }
 0xdc6   : > { %2337 = vmatpush3.msra.mxu0 %v2596_v9  ;;  %2344 = vmatprep.mubr.msk.f32.mxu0 %vm2514_vm1, %v2513_v8  ;;  %v1403_v40 = vpop.permute.xlu1 %1402 }
 0xdc7   : > { %2338 = vmatprep.subr.mxu0 %v2513_v8 }
 0xdc8   : > { %2339 = vmatpush3.msra.mxu0 %v2598_v10 }
 0xdc9   : > { %2340 = vmatprep.subr.mxu0 %v2513_v8 }
 0xdca   : > { %2341 = vmatpush3.msra.mxu0 %v2605_v11 }
 0xdcb   : > { %2342 = vmatprep.subr.mxu0 %v2513_v8 }
 0xdcc   : > { %2343 = vmatpush3.msra.mxu0 %v2609_v12 }
 0xdcd   : > { %2358 = vmatprep.subr.mxu0 %v2513_v8 }
 0xe7d   : > { %v1305_v23 = vpop.f32.mrf.mxu1 }
 0xe7e   : > { %1310 = vst [vmem:[%s1309_s23] sm:$0x3] %v1305_v23 }
 0xe7f   : > { %v2313_v24 = vpop.f32.mrf.mxu1 }
 0xe85   : > { %v1391_v26 = vpop.f32.mrf.mxu0 }
 0xe86   : > { %v1395_v27 = vadd.f32 %v2104_v25, %v1391_v26 }
 0xe87   : > { %v2324_v28 = vpop.f32.mrf.mxu0 }
 0xe88   : > { %2455 = vtanh.f32 %v1395_v27  ;;  %v1396_v30 = vmul.f32 0.5, %v1395_v27 }
 0xe8a   : > { %2457 = vtanh.f32 %v1396_v30 }
 0xe95   : > { %v2456_v29 = vpop.eup %2455 }
 0xe96   : > { %1407 = vrot.lane.b32.xlu0 %v2456_v29, %s2515_s10 }
 0xe97   : > { %v2458_v35 = vpop.eup %2457 }
 0xe98   : > { %v1398_v36 = vmul.f32 0.5, %v2458_v35 }
 0xe9a   : > { %v1399_v37 = vadd.f32 0.5, %v1398_v36 }
 0xe9c   : > { %v1405_v41 = vmul.f32 %v1403_v40, %v1399_v37 }
 0xf08   : > { %v1408_v38 = vpop.permute.xlu0 %1407 }
 0xf09   : > { %v1410_v39 = vmul.f32 %v1408_v38, %v1399_v37 }
 0xf0b   : > { %1412 = vrot.lane.b32.xlu0 %v1410_v39, %s2516_s11 }
 0xf7d   : > { %v1413_v42 = vpop.permute.xlu0 %1412 }
 0xf7e   : > { %v1415_v43 = vadd.f32 %v1413_v42, %v1405_v41 }
 0xf80   : > { %2459 = vtanh.f32 %v1415_v43 }
 0xf8d   : > { %v2460_v44 = vpop.eup %2459 }
 0xf8e   : > { %1418 = vrot.lane.b32.xlu1 %v2460_v44, %s2515_s10 }
 0xf92   : > { %1428 = vrot.lane.b32.xlu1 %v1415_v43, %s2517_s21 }
0x1000   : > { %v1419_v45 = vpop.permute.xlu1 %1418 }
0x1001   : > { %v1421_v46 = vmul.f32 %v1419_v45, %v1399_v37 }
0x1003   : > { %1423 = vrot.lane.b32.xlu0 %v1421_v46, %s2516_s11 }
0x1004   : > { %v1429_v47 = vpop.permute.xlu1 %1428 }
0x1005   : > { %1431 = vst.msk [vmem:[#allocation3] sm:$0x3] %vm311_vm0, %v1429_v47 }
0x100c   : > { %v1513_v48 = vld [vmem:[#allocation3] sm:$0x3] }
0x100d   : > { %1601 = vrot.lane.b32.xlu1 %v1513_v48, %s2516_s11 }
0x1075   : > { %v1424_v49 = vpop.permute.xlu0 %1423 }
0x1076   : > { %1426 = vst.msk [vmem:[#allocation2] sm:$0x3] %vm311_vm0, %v1424_v49  ;;  %2334 = vmatmul.mubr.msk.f32.vlgmr.msra.gmra.mxu1 %vm326_vm2, %v1424_v49 }
0x1077   : > { %2348 = vmatpush3.msra.mxu1 %v2642_v31  ;;  %2355 = vmatprep.mubr.msk.f32.mxu1 %vm2514_vm1, %v2513_v8 }
0x1078   : > { %2349 = vmatprep.subr.mxu1 %v2513_v8 }
0x1079   : > { %2350 = vmatpush3.msra.mxu1 %v2644_v32 }
0x107a   : > { %2351 = vmatprep.subr.mxu1 %v2513_v8 }
0x107b   : > { %2352 = vmatpush3.msra.mxu1 %v2648_v33 }
0x107c   : > { %2353 = vmatprep.subr.mxu1 %v2513_v8 }
0x107d   : > { %v1512_v50 = vld [vmem:[#allocation2] sm:$0x3]  ;;  %2354 = vmatpush3.msra.mxu1 %v2653_v34 }
0x107e   : > { %2345 = vmatmul.mubr.msk.f32.vlgmr.msra.gmra.mxu0 %vm326_vm2, %v1512_v50  ;;  %2369 = vmatprep.subr.mxu1 %v2513_v8 }
0x107f   : > { %2359 = vmatpush3.msra.mxu0 %v2596_v9  ;;  %2366 = vmatprep.mubr.msk.f32.mxu0 %vm2514_vm1, %v2513_v8  ;;  %v1602_v60 = vpop.permute.xlu1 %1601 }
0x1080   : > { %2360 = vmatprep.subr.mxu0 %v2513_v8 }
0x1081   : > { %2361 = vmatpush3.msra.mxu0 %v2598_v10 }
0x1082   : > { %2362 = vmatprep.subr.mxu0 %v2513_v8 }
0x1083   : > { %2363 = vmatpush3.msra.mxu0 %v2605_v11 }
0x1084   : > { %2364 = vmatprep.subr.mxu0 %v2513_v8 }
0x1085   : > { %2365 = vmatpush3.msra.mxu0 %v2609_v12 }
0x1136   : > { %v1504_v51 = vpop.f32.mrf.mxu1 }
0x1137   : > { %2108 = vst [vmem:[%s2009_s27 + $0xa] sm:$0x3] %v1504_v51 }
0x1138   : > { %v2335_v9 = vpop.f32.mrf.mxu1 }
0x113e   : > { %v1590_v53 = vpop.f32.mrf.mxu0 }
0x113f   : > { %v1594_v54 = vadd.f32 %v2110_v52, %v1590_v53 }
0x1140   : > { %v2346_v10 = vpop.f32.mrf.mxu0 }
0x1141   : > { %2461 = vtanh.f32 %v1594_v54  ;;  %v1595_v11 = vmul.f32 0.5, %v1594_v54 }
0x1143   : > { %2463 = vtanh.f32 %v1595_v11 }
0x114e   : > { %v2462_v55 = vpop.eup %2461 }
0x114f   : > { %1606 = vrot.lane.b32.xlu0 %v2462_v55, %s2515_s10 }
0x1150   : > { %v2464_v56 = vpop.eup %2463 }
0x1151   : > { %v1597_v12 = vmul.f32 0.5, %v2464_v56 }
0x1153   : > { %v1598_v57 = vadd.f32 0.5, %v1597_v12 }
0x1155   : > { %v1604_v61 = vmul.f32 %v1602_v60, %v1598_v57 }
0x11c1   : > { %v1607_v58 = vpop.permute.xlu0 %1606 }
0x11c2   : > { %v1609_v59 = vmul.f32 %v1607_v58, %v1598_v57 }
0x11c4   : > { %1611 = vrot.lane.b32.xlu0 %v1609_v59, %s2516_s11 }
0x1236   : > { %v1612_v62 = vpop.permute.xlu0 %1611 }
0x1237   : > { %v1614_v63 = vadd.f32 %v1612_v62, %v1604_v61 }
0x1239   : > { %2465 = vtanh.f32 %v1614_v63 }
0x1246   : > { %v2466_v0 = vpop.eup %2465 }
0x1247   : > { %1617 = vrot.lane.b32.xlu1 %v2466_v0, %s2515_s10 }
0x124b   : > { %1627 = vrot.lane.b32.xlu1 %v1614_v63, %s2517_s21 }
0x12b9   : > { %v1618_v1 = vpop.permute.xlu1 %1617 }
0x12ba   : > { %v1620_v2 = vmul.f32 %v1618_v1, %v1598_v57 }
0x12bc   : > { %1622 = vrot.lane.b32.xlu0 %v1620_v2, %s2516_s11 }
0x12bd   : > { %v1628_v3 = vpop.permute.xlu1 %1627 }
0x12be   : > { %1630 = vst.msk [vmem:[#allocation3] sm:$0x3] %vm311_vm0, %v1628_v3 }
0x12c5   : > { %v1712_v4 = vld [vmem:[#allocation3] sm:$0x3] }
0x12c6   : > { %1800 = vrot.lane.b32.xlu1 %v1712_v4, %s2516_s11 }
0x132e   : > { %v1623_v5 = vpop.permute.xlu0 %1622 }
0x132f   : > { %1625 = vst.msk [vmem:[#allocation2] sm:$0x3] %vm311_vm0, %v1623_v5  ;;  %2356 = vmatmul.mubr.msk.f32.vlgmr.msra.gmra.mxu1 %vm326_vm2, %v1623_v5 }
0x1330   : > { %2370 = vmatpush3.msra.mxu1 %v2642_v31  ;;  %2377 = vmatprep.mubr.msk.f32.mxu1 %vm2514_vm1, %v2513_v8 }
0x1331   : > { %2371 = vmatprep.subr.mxu1 %v2513_v8 }
0x1332   : > { %2372 = vmatpush3.msra.mxu1 %v2644_v32  ;;  %v2116_v32 = vld [vmem:[%s2021_s5 + $0xe] sm:$0x3] }
0x1333   : > { %2373 = vmatprep.subr.mxu1 %v2513_v8 }
0x1334   : > { %2374 = vmatpush3.msra.mxu1 %v2648_v33 }
0x1335   : > { %2375 = vmatprep.subr.mxu1 %v2513_v8 }
0x1336   : > { %v1711_v6 = vld [vmem:[#allocation2] sm:$0x3]  ;;  %2376 = vmatpush3.msra.mxu1 %v2653_v34 }
0x1337   : > { %2367 = vmatmul.mubr.msk.f32.vlgmr.msra.gmra.mxu0 %vm326_vm2, %v1711_v6 }
0x1338   : > { %v1801_v20 = vpop.permute.xlu1 %1800 }
0x13ef   : > { %v1703_v31 = vpop.f32.mrf.mxu1 }
0x13f0   : > { %2114 = vst [vmem:[%s2017_s30 + $0xc] sm:$0x3] %v1703_v31 }
0x13f1   : > { %v2357_v7 = vpop.f32.mrf.mxu1 }
0x13f7   : > { %v1789_v13 = vpop.f32.mrf.mxu0 }
0x13f8   : > { %v1793_v14 = vadd.f32 %v2116_v32, %v1789_v13 }
0x13f9   : > { %v2368_v15 = vpop.f32.mrf.mxu0 }
0x13fa   : > { %2467 = vtanh.f32 %v1793_v14  ;;  %v1794_v8 = vmul.f32 0.5, %v1793_v14 }
0x13fc   : > { %2469 = vtanh.f32 %v1794_v8 }
0x1407   : > { %v2468_v33 = vpop.eup %2467 }
0x1408   : > { %1805 = vrot.lane.b32.xlu0 %v2468_v33, %s2515_s10 }
0x1409   : > { %v2470_v34 = vpop.eup %2469 }
0x140a   : > { %v1796_v16 = vmul.f32 0.5, %v2470_v34 }
0x140c   : > { %v1797_v17 = vadd.f32 0.5, %v1796_v16 }
0x140e   : > { %v1803_v21 = vmul.f32 %v1801_v20, %v1797_v17 }
0x147a   : > { %v1806_v18 = vpop.permute.xlu0 %1805 }
0x147b   : > { %v1808_v19 = vmul.f32 %v1806_v18, %v1797_v17 }
0x147d   : > { %1810 = vrot.lane.b32.xlu0 %v1808_v19, %s2516_s11 }
0x14ef   : > { %v1811_v22 = vpop.permute.xlu0 %1810 }
0x14f0   : > { %v1813_v23 = vadd.f32 %v1811_v22, %v1803_v21 }
0x14f2   : > { %2471 = vtanh.f32 %v1813_v23 }
0x14ff   : > { %v2472_v24 = vpop.eup %2471 }
0x1500   : > { %1816 = vrot.lane.b32.xlu1 %v2472_v24, %s2515_s10 }
0x1504   : > { %1826 = vrot.lane.b32.xlu1 %v1813_v23, %s2517_s21 }
0x1572   : > { %v1817_v25 = vpop.permute.xlu1 %1816 }
0x1573   : > { %v1819_v26 = vmul.f32 %v1817_v25, %v1797_v17 }
0x1575   : > { %1821 = vrot.lane.b32.xlu0 %v1819_v26, %s2516_s11 }
0x1576   : > { %v1827_v27 = vpop.permute.xlu1 %1826 }
0x1577   : > { %1829 = vst.msk [vmem:[#allocation3] sm:$0x3] %vm311_vm0, %v1827_v27 }
0x15e7   : > { %v1822_v28 = vpop.permute.xlu0 %1821 }
0x15e8   : > { %1824 = vst.msk [vmem:[#allocation2] sm:$0x3] %vm311_vm0, %v1822_v28  ;;  %2378 = vmatmul.mubr.msk.f32.vlgmr.msra.gmra.mxu1 %vm326_vm2, %v1822_v28 }
0x16a8   : > { %v1902_v29 = vpop.f32.mrf.mxu1 }
0x16a9   : > { %2120 = vst [vmem:[%s2025_s8 + $0xe] sm:$0x3] %v1902_v29 }
0x16aa   : > { %v2379_v30 = vpop.f32.mrf.mxu1 }
0x16ab PF: > { %s13_s16 = sadd.s32 1, %s2511_s16   ;;  %s2939_s12 = smov %s2499_s13 }
0x16ac   : > { %p10_p10 = scmp.ge.s32.totalorder %s13_s16, 4   ;;  %s2940_s13 = smov %s2573_s20 }
0x16ad   : > { %s2941_s14 = smov %s2507_s15  ;;  %s2942_s15 = smov %s2944_s17 }
0x16ae   :  { %12 = sbr.rel (!%p10_p10) target bundleno = 3 (0x3), region = 130 }

</bundles_post_ra>
